<compile_context>
chip_gen: v7x
topology: tpu7x:2x2x1
jax: 0.10.0
libtpu: 0.0.40
codegen_flags: <defaults>
</compile_context>

<pallas_src>
import functools
import math

import jax
import jax.numpy as jnp
from jax import lax
from jax.experimental import pallas as pl
from jax.experimental.pallas import tpu as pltpu

MIN_NORM = 1e-15
EPS_F32 = 4e-3          # PoincareBall.eps[torch.float32]
C_SEED = 1.0
SQRT_C = math.sqrt(C_SEED)
LANE = 128


# ----------------------------- shared helper ----------------------------------
def _artanh(x):
    x = jnp.clip(x, -1.0 + 1e-7, 1.0 - 1e-7)
    return 0.5 * jnp.log((1.0 + x) / (1.0 - x))


# ----------------------------- pure-JAX reference (module math) ----------------
def _norm_last(x):
    return jnp.sqrt(jnp.sum(x * x, axis=-1, keepdims=True))


def _proj(x, c=C_SEED):
    norm = jnp.maximum(_norm_last(x), MIN_NORM)
    maxnorm = (1.0 - EPS_F32) / math.sqrt(c)
    projected = x / norm * maxnorm
    return jnp.where(norm > maxnorm, projected, x)


def _klein_constraint(x):
    norm = _norm_last(x)
    maxnorm = 1.0 - EPS_F32
    projected = x / (norm + MIN_NORM) * maxnorm
    return jnp.where(norm > maxnorm, projected, x)


def _mobius_add(x, y, c=C_SEED):
    x2 = jnp.sum(x * x, axis=-1, keepdims=True)
    y2 = jnp.sum(y * y, axis=-1, keepdims=True)
    xy = jnp.sum(x * y, axis=-1, keepdims=True)
    num = (1.0 + 2.0 * c * xy + c * y2) * x + (1.0 - c * x2) * y
    denom = 1.0 + 2.0 * c * xy + c * c * x2 * y2
    return num / jnp.maximum(denom, MIN_NORM)


def _expmap0(u, c=C_SEED):
    sqrt_c = math.sqrt(c)
    u_norm = jnp.maximum(_norm_last(u), MIN_NORM)
    return jnp.tanh(sqrt_c * u_norm) * u / (sqrt_c * u_norm)


def _logmap0(p, c=C_SEED):
    sqrt_c = math.sqrt(c)
    p_norm = jnp.maximum(_norm_last(p), MIN_NORM)
    scale = (1.0 / sqrt_c) * _artanh(sqrt_c * p_norm) / p_norm
    return scale * p


def _einstein_midpoint(x, c=C_SEED):
    x2 = jnp.sum(x * x, axis=-1, keepdims=True)                 # (B, L, 1)
    xk = 2.0 * x / (1.0 + x2)                                   # to_klein
    xk = _klein_constraint(xk)
    xk_norm = _norm_last(xk)
    gamma = 1.0 / jnp.sqrt(1.0 - xk_norm * xk_norm + MIN_NORM)  # lorentz factors
    gamma = jnp.where(xk_norm == 0.0, 0.0, gamma)               # mask pad rows
    gamma_sum = jnp.maximum(jnp.sum(gamma, axis=1), MIN_NORM)   # guard all-pad
    mid = jnp.sum(gamma * xk, axis=1) / gamma_sum               # (B, D)
    mid = _klein_constraint(mid)
    mid = mid / (1.0 + jnp.sqrt(1.0 - jnp.sum(mid * mid, axis=-1, keepdims=True)))
    return _proj(mid, c)


def _mobius_matvec(wt, x, c=C_SEED):
    sqrt_c = math.sqrt(c)
    x_norm = jnp.maximum(_norm_last(x), MIN_NORM)
    mx = jnp.dot(x, wt, preferred_element_type=jnp.float32)
    mx_norm = jnp.maximum(_norm_last(mx), MIN_NORM)
    res_c = jnp.tanh(mx_norm / x_norm * _artanh(sqrt_c * x_norm)) * mx / (mx_norm * sqrt_c)
    all_zero = jnp.all(mx == 0.0, axis=-1, keepdims=True)
    return jnp.where(all_zero, 0.0, res_c)


def hypertext_reference(word_ids, ngram_ids, emb_word, emb_ngram, weight, bias):
    x = jnp.concatenate([emb_word[word_ids], emb_ngram[ngram_ids]], axis=1)
    mid = _einstein_midpoint(x.astype(jnp.float32), C_SEED)
    res = _proj(_mobius_matvec(weight.T.astype(jnp.float32), mid), C_SEED)
    hyp_bias = _proj(_expmap0(bias.reshape(1, -1).astype(jnp.float32)), C_SEED)
    res = _proj(_mobius_add(res, hyp_bias), C_SEED)
    return _logmap0(res, C_SEED)


# ----------------------------- init-time parameter prep ------------------------
def prepare_mobius_params(weight, bias):
    """Pure function of the MobiusLinear parameters (hoisted out of the forward):
    lane-pads the class dim and builds the hyperbolic bias point once at init.
    Zero weight rows / zero bias lanes stay exactly zero through the hyperbolic
    ops, so the padding is math-neutral (sliced off in the forward)."""
    C, D = weight.shape
    Cp = ((C + LANE - 1) // LANE) * LANE
    wt = jnp.zeros((Cp, D), jnp.float32).at[:C, :].set(weight.astype(jnp.float32))
    u = jnp.zeros((1, Cp), jnp.float32).at[0, :C].set(bias.astype(jnp.float32))
    hb = jnp.transpose(_proj(_expmap0(u, C_SEED), C_SEED))      # (Cp, 1) on the ball
    return wt, hb


# ----------------------------- kernel-side helpers (norm threading) ------------
# Feature axis = second-minor (sublanes); batch axis = minor (lanes).
def _klein_constraint_tracked(x, norm):
    maxnorm = 1.0 - EPS_F32
    cond = norm > maxnorm
    scale = maxnorm / (norm + MIN_NORM)          # exact: feeds artanh if clamped
    return jnp.where(cond, x * scale, x), jnp.where(cond, norm * scale, norm)


def _proj_tracked(x, norm):
    maxnorm = (1.0 - EPS_F32) / SQRT_C
    norm_c = jnp.maximum(norm, MIN_NORM)
    cond = norm_c > maxnorm
    scale = maxnorm / norm_c                     # exact: feeds artanh if clamped
    return jnp.where(cond, x * scale, x), jnp.where(cond, maxnorm, norm)


# ----------------------------- Pallas kernel ----------------------------------
def hypertext_kernel(xw_ref, xn_ref, wt_ref, hb_ref, o_ref):
    """Batch-in-lanes layout:
         xw_ref : (Lw, D, TB)  word embedding stream   (feature=sublane, batch=lane)
         xn_ref : (Ln, D, TB)  word-ngram embedding stream
         wt_ref : (Cp, D)      MobiusLinear weight, classes lane-padded (resident)
         hb_ref : (Cp, 1)      hyperbolic bias point (resident)
         o_ref  : (Cp, TB)     logmap0 logits (lane-dense)
    """
    f32 = jnp.float32

    def midpoint_partials(x_ref):
        x = x_ref[...].astype(f32)                              # (L, D, TB)
        x2 = jnp.sum(x * x, axis=1, keepdims=True)              # (L, 1, TB)
        inv_s = pl.reciprocal(1.0 + x2, approx=True)            # EUP vrcp
        xk = (2.0 * inv_s) * x                                  # to_klein
        nk = 2.0 * jnp.sqrt(x2) * inv_s                         # |xk| (analytic)
        xk, nk = _klein_constraint_tracked(xk, nk)
        gamma = lax.rsqrt(1.0 - nk * nk + MIN_NORM)             # lorentz factors
        gamma = jnp.where(nk == 0.0, 0.0, gamma)                # mask pad tokens
        return jnp.sum(gamma, axis=0), jnp.sum(gamma * xk, axis=0)   # (1,TB),(D,TB)

    # --- Einstein midpoint accumulated over both embedding streams (no concat) -
    gw, vw = midpoint_partials(xw_ref)
    gn, vn = midpoint_partials(xn_ref)
    gamma_sum = jnp.maximum(gw + gn, MIN_NORM)                  # guard all-pad rows
    mid = (vw + vn) * pl.reciprocal(gamma_sum, approx=True)     # (D, TB)

    m_norm = jnp.sqrt(jnp.sum(mid * mid, axis=0, keepdims=True))
    mid, m_norm = _klein_constraint_tracked(mid, m_norm)
    # klein -> poincare (the preceding clamp keeps 1 - m_norm^2 > 0; keep order)
    t = pl.reciprocal(1.0 + jnp.sqrt(1.0 - m_norm * m_norm))
    p = mid * t
    p_norm = m_norm * t
    p, p_norm = _proj_tracked(p, p_norm)

    # --- MobiusLinear: mobius_matvec, always on the MXU --------------------------
    mx = jnp.dot(wt_ref[...], p, preferred_element_type=f32)    # (Cp,D)x(D,TB)
    mx_norm = jnp.maximum(jnp.sqrt(jnp.sum(mx * mx, axis=0, keepdims=True)), MIN_NORM)
    p_norm_c = jnp.maximum(p_norm, MIN_NORM)
    arg = mx_norm * pl.reciprocal(p_norm_c) * _artanh(SQRT_C * p_norm_c)
    res = jnp.tanh(arg) * pl.reciprocal(mx_norm * SQRT_C, approx=True) * mx
    # all(mx == 0) per column, expressed as a float reduction (max|mx| == 0)
    all_zero = jnp.max(jnp.abs(mx), axis=0, keepdims=True) == 0.0
    res = jnp.where(all_zero, 0.0, res)

    r_norm = jnp.sqrt(jnp.sum(res * res, axis=0, keepdims=True))
    res, r_norm = _proj_tracked(res, r_norm)

    # --- MobiusLinear: hyperbolic bias (mobius_add) + proj ------------------------
    hb = hb_ref[...]                                            # (Cp, 1)
    hb2 = jnp.sum(hb * hb, axis=0, keepdims=True)               # (1, 1)
    x2 = r_norm * r_norm
    xy = jnp.sum(res * hb, axis=0, keepdims=True)               # (1, TB)
    num = (1.0 + 2.0 * C_SEED * xy + C_SEED * hb2) * res + (1.0 - C_SEED * x2) * hb
    den = 1.0 + 2.0 * C_SEED * xy + C_SEED * C_SEED * x2 * hb2
    out = num * pl.reciprocal(jnp.maximum(den, MIN_NORM), approx=True)

    o_norm = jnp.sqrt(jnp.sum(out * out, axis=0, keepdims=True))
    out, o_norm = _proj_tracked(out, o_norm)

    # --- logmap0 -------------------------------------------------------------------
    o_norm_c = jnp.maximum(o_norm, MIN_NORM)
    scale = _artanh(SQRT_C * o_norm_c) * pl.reciprocal(SQRT_C * o_norm_c, approx=True)
    o_ref[...] = (scale * out).astype(o_ref.dtype)


# ----------------------------- tiling / VMEM sizing ----------------------------
def _vmem_capacity_bytes():
    try:
        return int(pltpu.get_tpu_info().vmem_capacity_bytes)
    except Exception:
        return 64 * 1024 * 1024      # conservative (v7x has 64 MiB per TensorCore)


def _select_batch_tile(B, Lw, Ln, D, Cp, in_itemsize, vmem_cap):
    """Pick (padded batch, batch tile).  The batch tile lives on the 128-lane
    axis, so it must be a multiple of 128 (or cover the whole batch)."""
    # Resident (constant index_map) Mobius params; double-buffered by default.
    resident = 2 * (Cp * D * 4 + Cp * 4)
    # Per-batch-row bytes: double-buffered streamed blocks + f32 working set.
    streamed = 2 * ((Lw + Ln) * D * in_itemsize + Cp * 4)
    working = 4 * (Lw + Ln) * D * 4 + 6 * Cp * 4 + 16 * 4
    per_row = streamed + working
    budget = max(vmem_cap // 4 - resident, 2 * 1024 * 1024)
    cap = max(LANE, budget // max(per_row, 1))

    if B <= LANE:
        return B, B                  # single full-batch lane block (legal: full dim)
    Bp = (B + LANE - 1) // LANE * LANE
    tb = LANE
    # Grow only while lane-aligned, inside the budget, and the grid keeps >= 4
    # steps (>= 2 per TensorCore on dual-core chips) for DMA/compute overlap.
    while tb * 2 <= cap and Bp % (tb * 2) == 0 and Bp // (tb * 2) >= 4:
        tb *= 2
    return Bp, tb


# ----------------------------- wrapper -----------------------------------------
@functools.partial(jax.jit, static_argnames=("num_classes",))
def hypertext_forward(word_ids, ngram_ids, emb_word, emb_ngram, wt_pad, hb_pad,
                      *, num_classes):
    B, Lw = word_ids.shape
    Ln = ngram_ids.shape[1]
    D = emb_word.shape[1]
    Cp = wt_pad.shape[0]

    vmem_cap = _vmem_capacity_bytes()
    Bp, tb = _select_batch_tile(B, Lw, Ln, D, Cp, emb_word.dtype.itemsize, vmem_cap)
    if Bp != B:                      # pad batch with id 0 (the zero padding row)
        pad = Bp - B
        word_ids = jnp.pad(word_ids, ((0, pad), (0, 0)))
        ngram_ids = jnp.pad(ngram_ids, ((0, pad), (0, 0)))

    # Embedding gathers stay in XLA (efficient fused gather); the gathered slabs
    # are produced directly in the batch-in-lanes (L, D, B) layout the kernel
    # consumes and the whole forward is a single jitted dispatch.
    # TODO(synk): an in-kernel gather (per-row DMA or one-hot MXU gather from
    # VMEM-resident tables) costs more than the HBM round trip it saves at D=32;
    # revisit for large embedding dims / vocabularies.
    xw = jnp.transpose(emb_word[word_ids], (1, 2, 0))            # (Lw, D, Bp)
    xn = jnp.transpose(emb_ngram[ngram_ids], (1, 2, 0))          # (Ln, D, Bp)

    out = pl.pallas_call(
        hypertext_kernel,
        out_shape=jax.ShapeDtypeStruct((Cp, Bp), jnp.float32),
        grid=(Bp // tb,),
        in_specs=[
            pl.BlockSpec((Lw, D, tb), lambda i: (0, 0, i)),
            pl.BlockSpec((Ln, D, tb), lambda i: (0, 0, i)),
            pl.BlockSpec((Cp, D), lambda i: (0, 0)),             # resident weight
            pl.BlockSpec((Cp, 1), lambda i: (0, 0)),             # resident bias
        ],
        out_specs=pl.BlockSpec((Cp, tb), lambda i: (0, i)),      # lane-dense output
        compiler_params=pltpu.CompilerParams(
            dimension_semantics=("parallel",),                   # megacore-shardable
            vmem_limit_bytes=int(vmem_cap // 2),
        ),
    )(xw, xn, wt_pad, hb_pad)

    return jnp.transpose(out[:num_classes, :B])                  # (B, num_classes)


# ----------------------------- main --------------------------------------------
if __name__ == "__main__":
    # Small, deterministic config (config.n_vocab / bucket / embed / num_classes)
    n_vocab, bucket, embed, num_classes = 500, 2000, 32, 8
    batch, seq_word, seq_ngram = 256, 8, 8

    key = jax.random.PRNGKey(0)
    k_emb, k_ng, k_w, k_b, k_ids_w, k_ids_n = jax.random.split(key, 6)

    # xavier_normal_ for embeddings, row 0 zeroed (padding idx)
    std_w = math.sqrt(2.0 / (n_vocab + embed))
    emb_word = jax.random.normal(k_emb, (n_vocab, embed), jnp.float32) * std_w
    emb_word = emb_word.at[0].set(0.0)

    std_n = math.sqrt(2.0 / (bucket + embed))
    emb_ngram = jax.random.normal(k_ng, (bucket, embed), jnp.float32) * std_n
    emb_ngram = emb_ngram.at[0].set(0.0)

    # MobiusLinear: xavier_uniform_(weight, gain=sqrt(2)); small nonzero bias to
    # exercise the hyperbolic-bias (mobius_add) path.
    bound = math.sqrt(2.0) * math.sqrt(6.0 / (embed + num_classes))
    weight = jax.random.uniform(k_w, (num_classes, embed), jnp.float32, -bound, bound)
    bias = 0.05 * jax.random.normal(k_b, (num_classes,), jnp.float32)

    # token ids (x[0]) and word-ngram bucket ids (x[1]); force some pad (0) ids
    word_ids = jax.random.randint(k_ids_w, (batch, seq_word), 0, n_vocab)
    ngram_ids = jax.random.randint(k_ids_n, (batch, seq_ngram), 0, bucket)
    word_ids = word_ids.at[:, -2:].set(0)        # trailing padding tokens
    ngram_ids = ngram_ids.at[0, :].set(0)        # one row with all-pad ngrams

    # Hoisted out of the per-call path: pure function of the parameters.
    wt_pad, hb_pad = prepare_mobius_params(weight, bias)

    out = hypertext_forward(word_ids, ngram_ids, emb_word, emb_ngram,
                            wt_pad, hb_pad, num_classes=num_classes)
    out = jax.block_until_ready(out)

    ref = hypertext_reference(word_ids, ngram_ids, emb_word, emb_ngram, weight, bias)
    assert out.shape == (batch, num_classes)
    assert bool(jnp.all(jnp.isfinite(out)))
    # approx=True EUP reciprocals + deduped/reordered f32 reductions vs. the
    # straight reference -> compare with a modest tolerance.
    assert bool(jnp.allclose(out, ref, atol=1e-3, rtol=1e-3))

    print("KERNEL_OK")
</pallas_src>

<mosaic_0001>
module attributes {stable_mosaic.version = 11 : i64} {
  func.func private @main(%arg0: i32) attributes {dimension_semantics = [#tpu.dimension_semantics<core_parallel>], iteration_bounds = array<i64: 2>, tpu.core_type = #tpu.core_type<sc_scalar_subcore>, window_params = []} {
    return
  }
}

module attributes {stable_mosaic.version = 11 : i64} {
  func.func private @main(%arg0: i32) attributes {dimension_semantics = [#tpu.dimension_semantics<core_parallel>], iteration_bounds = array<i64: 2>, tpu.core_type = #tpu.core_type<sc_scalar_subcore>, window_params = []} {
    return
  }
}

module attributes {stable_mosaic.version = 11 : i64} {
  func.func @hypertext_kernel(%arg0: i32, %arg1: memref<8x32x128xf32, #tpu.memory_space<vmem>>, %arg2: memref<8x32x128xf32, #tpu.memory_space<vmem>>, %arg3: memref<128x32xf32, #tpu.memory_space<vmem>>, %arg4: memref<128x1xf32, #tpu.memory_space<vmem>>, %arg5: memref<128x128xf32, #tpu.memory_space<vmem>>) attributes {dimension_semantics = [#tpu.dimension_semantics<parallel>], iteration_bounds = array<i64: 2>, scalar_prefetch = 0 : i64, scratch_operands = 0 : i64, tpu.core_type = #tpu.core_type<tc>, window_params = [{transform_indices = @transform_0, window_bounds = array<i64: 8, 32, 128>}, {transform_indices = @transform_1, window_bounds = array<i64: 8, 32, 128>}, {pipeline_mode = #tpu.pipeline_mode<synchronous>, transform_indices = @transform_2, window_bounds = array<i64: 128, 32>}, {pipeline_mode = #tpu.pipeline_mode<synchronous>, transform_indices = @transform_3, window_bounds = array<i64: 128, 1>}, {transform_indices = @transform_4, window_bounds = array<i64: 128, 128>}]} {
    %c0 = arith.constant 0 : index
    %c0_0 = arith.constant 0 : index
    %c0_1 = arith.constant 0 : index
    %0 = vector.load %arg1[%c0, %c0_0, %c0_1] : memref<8x32x128xf32, #tpu.memory_space<vmem>>, vector<8x32x128xf32>
    %1 = arith.mulf %0, %0 : vector<8x32x128xf32>
    %cst = arith.constant dense<0.000000e+00> : vector<8x128xf32>
    %2 = vector.multi_reduction <add>, %1, %cst [1] : vector<8x32x128xf32> to vector<8x128xf32>
    %3 = vector.shape_cast %2 : vector<8x128xf32> to vector<8x1x128xf32>
    %cst_2 = arith.constant 1.000000e+00 : f32
    %4 = vector.broadcast %cst_2 : f32 to vector<8x1x128xf32>
    %5 = arith.addf %4, %3 : vector<8x1x128xf32>
    %6 = tpu.reciprocal %5 {approx = true} : vector<8x1x128xf32> -> vector<8x1x128xf32>
    %cst_3 = arith.constant 2.000000e+00 : f32
    %7 = vector.broadcast %cst_3 : f32 to vector<8x1x128xf32>
    %8 = arith.mulf %7, %6 : vector<8x1x128xf32>
    %9 = vector.broadcast %8 : vector<8x1x128xf32> to vector<8x32x128xf32>
    %10 = arith.mulf %9, %0 : vector<8x32x128xf32>
    %11 = math.sqrt %3 : vector<8x1x128xf32>
    %cst_4 = arith.constant 2.000000e+00 : f32
    %12 = vector.broadcast %cst_4 : f32 to vector<8x1x128xf32>
    %13 = arith.mulf %12, %11 : vector<8x1x128xf32>
    %14 = arith.mulf %13, %6 : vector<8x1x128xf32>
    %cst_5 = arith.constant 0.995999991 : f32
    %15 = vector.broadcast %cst_5 : f32 to vector<8x1x128xf32>
    %16 = arith.cmpf ogt, %14, %15 : vector<8x1x128xf32>
    %cst_6 = arith.constant 1.000000e-15 : f32
    %17 = vector.broadcast %cst_6 : f32 to vector<8x1x128xf32>
    %18 = arith.addf %14, %17 : vector<8x1x128xf32>
    %cst_7 = arith.constant 0.995999991 : f32
    %19 = vector.broadcast %cst_7 : f32 to vector<8x1x128xf32>
    %20 = arith.divf %19, %18 : vector<8x1x128xf32>
    %21 = vector.broadcast %20 : vector<8x1x128xf32> to vector<8x32x128xf32>
    %22 = arith.mulf %10, %21 : vector<8x32x128xf32>
    %23 = vector.shape_cast %16 : vector<8x1x128xi1> to vector<8x1x128xi1>
    %24 = vector.broadcast %23 : vector<8x1x128xi1> to vector<8x32x128xi1>
    %25 = arith.select %24, %22, %10 : vector<8x32x128xi1>, vector<8x32x128xf32>
    %26 = arith.mulf %14, %20 : vector<8x1x128xf32>
    %27 = arith.select %16, %26, %14 : vector<8x1x128xi1>, vector<8x1x128xf32>
    %28 = arith.mulf %27, %27 : vector<8x1x128xf32>
    %cst_8 = arith.constant 1.000000e+00 : f32
    %29 = vector.broadcast %cst_8 : f32 to vector<8x1x128xf32>
    %30 = arith.subf %29, %28 : vector<8x1x128xf32>
    %cst_9 = arith.constant 1.000000e-15 : f32
    %31 = vector.broadcast %cst_9 : f32 to vector<8x1x128xf32>
    %32 = arith.addf %30, %31 : vector<8x1x128xf32>
    %33 = math.rsqrt %32 : vector<8x1x128xf32>
    %cst_10 = arith.constant 0.000000e+00 : f32
    %34 = vector.broadcast %cst_10 : f32 to vector<8x1x128xf32>
    %35 = arith.cmpf oeq, %27, %34 : vector<8x1x128xf32>
    %cst_11 = arith.constant 0.000000e+00 : f32
    %36 = vector.broadcast %cst_11 : f32 to vector<8x1x128xf32>
    %37 = arith.select %35, %36, %33 : vector<8x1x128xi1>, vector<8x1x128xf32>
    %cst_12 = arith.constant dense<0.000000e+00> : vector<1x128xf32>
    %38 = vector.multi_reduction <add>, %37, %cst_12 [0] : vector<8x1x128xf32> to vector<1x128xf32>
    %39 = vector.broadcast %37 : vector<8x1x128xf32> to vector<8x32x128xf32>
    %40 = arith.mulf %39, %25 : vector<8x32x128xf32>
    %cst_13 = arith.constant dense<0.000000e+00> : vector<32x128xf32>
    %41 = vector.multi_reduction <add>, %40, %cst_13 [0] : vector<8x32x128xf32> to vector<32x128xf32>
    %c0_14 = arith.constant 0 : index
    %c0_15 = arith.constant 0 : index
    %c0_16 = arith.constant 0 : index
    %42 = vector.load %arg2[%c0_14, %c0_15, %c0_16] : memref<8x32x128xf32, #tpu.memory_space<vmem>>, vector<8x32x128xf32>
    %43 = arith.mulf %42, %42 : vector<8x32x128xf32>
    %cst_17 = arith.constant dense<0.000000e+00> : vector<8x128xf32>
    %44 = vector.multi_reduction <add>, %43, %cst_17 [1] : vector<8x32x128xf32> to vector<8x128xf32>
    %45 = vector.shape_cast %44 : vector<8x128xf32> to vector<8x1x128xf32>
    %cst_18 = arith.constant 1.000000e+00 : f32
    %46 = vector.broadcast %cst_18 : f32 to vector<8x1x128xf32>
    %47 = arith.addf %46, %45 : vector<8x1x128xf32>
    %48 = tpu.reciprocal %47 {approx = true} : vector<8x1x128xf32> -> vector<8x1x128xf32>
    %cst_19 = arith.constant 2.000000e+00 : f32
    %49 = vector.broadcast %cst_19 : f32 to vector<8x1x128xf32>
    %50 = arith.mulf %49, %48 : vector<8x1x128xf32>
    %51 = vector.broadcast %50 : vector<8x1x128xf32> to vector<8x32x128xf32>
    %52 = arith.mulf %51, %42 : vector<8x32x128xf32>
    %53 = math.sqrt %45 : vector<8x1x128xf32>
    %cst_20 = arith.constant 2.000000e+00 : f32
    %54 = vector.broadcast %cst_20 : f32 to vector<8x1x128xf32>
    %55 = arith.mulf %54, %53 : vector<8x1x128xf32>
    %56 = arith.mulf %55, %48 : vector<8x1x128xf32>
    %cst_21 = arith.constant 0.995999991 : f32
    %57 = vector.broadcast %cst_21 : f32 to vector<8x1x128xf32>
    %58 = arith.cmpf ogt, %56, %57 : vector<8x1x128xf32>
    %cst_22 = arith.constant 1.000000e-15 : f32
    %59 = vector.broadcast %cst_22 : f32 to vector<8x1x128xf32>
    %60 = arith.addf %56, %59 : vector<8x1x128xf32>
    %cst_23 = arith.constant 0.995999991 : f32
    %61 = vector.broadcast %cst_23 : f32 to vector<8x1x128xf32>
    %62 = arith.divf %61, %60 : vector<8x1x128xf32>
    %63 = vector.broadcast %62 : vector<8x1x128xf32> to vector<8x32x128xf32>
    %64 = arith.mulf %52, %63 : vector<8x32x128xf32>
    %65 = vector.shape_cast %58 : vector<8x1x128xi1> to vector<8x1x128xi1>
    %66 = vector.broadcast %65 : vector<8x1x128xi1> to vector<8x32x128xi1>
    %67 = arith.select %66, %64, %52 : vector<8x32x128xi1>, vector<8x32x128xf32>
    %68 = arith.mulf %56, %62 : vector<8x1x128xf32>
    %69 = arith.select %58, %68, %56 : vector<8x1x128xi1>, vector<8x1x128xf32>
    %70 = arith.mulf %69, %69 : vector<8x1x128xf32>
    %cst_24 = arith.constant 1.000000e+00 : f32
    %71 = vector.broadcast %cst_24 : f32 to vector<8x1x128xf32>
    %72 = arith.subf %71, %70 : vector<8x1x128xf32>
    %cst_25 = arith.constant 1.000000e-15 : f32
    %73 = vector.broadcast %cst_25 : f32 to vector<8x1x128xf32>
    %74 = arith.addf %72, %73 : vector<8x1x128xf32>
    %75 = math.rsqrt %74 : vector<8x1x128xf32>
    %cst_26 = arith.constant 0.000000e+00 : f32
    %76 = vector.broadcast %cst_26 : f32 to vector<8x1x128xf32>
    %77 = arith.cmpf oeq, %69, %76 : vector<8x1x128xf32>
    %cst_27 = arith.constant 0.000000e+00 : f32
    %78 = vector.broadcast %cst_27 : f32 to vector<8x1x128xf32>
    %79 = arith.select %77, %78, %75 : vector<8x1x128xi1>, vector<8x1x128xf32>
    %cst_28 = arith.constant dense<0.000000e+00> : vector<1x128xf32>
    %80 = vector.multi_reduction <add>, %79, %cst_28 [0] : vector<8x1x128xf32> to vector<1x128xf32>
    %81 = vector.broadcast %79 : vector<8x1x128xf32> to vector<8x32x128xf32>
    %82 = arith.mulf %81, %67 : vector<8x32x128xf32>
    %cst_29 = arith.constant dense<0.000000e+00> : vector<32x128xf32>
    %83 = vector.multi_reduction <add>, %82, %cst_29 [0] : vector<8x32x128xf32> to vector<32x128xf32>
    %84 = arith.addf %38, %80 : vector<1x128xf32>
    %cst_30 = arith.constant 1.000000e-15 : f32
    %85 = vector.broadcast %cst_30 : f32 to vector<1x128xf32>
    %86 = arith.maximumf %84, %85 : vector<1x128xf32>
    %87 = arith.addf %41, %83 : vector<32x128xf32>
    %88 = tpu.reciprocal %86 {approx = true} : vector<1x128xf32> -> vector<1x128xf32>
    %89 = vector.broadcast %88 : vector<1x128xf32> to vector<32x128xf32>
    %90 = arith.mulf %87, %89 : vector<32x128xf32>
    %91 = arith.mulf %90, %90 : vector<32x128xf32>
    %cst_31 = arith.constant dense<0.000000e+00> : vector<128xf32>
    %92 = vector.multi_reduction <add>, %91, %cst_31 [0] : vector<32x128xf32> to vector<128xf32>
    %93 = vector.shape_cast %92 : vector<128xf32> to vector<1x128xf32>
    %94 = math.sqrt %93 : vector<1x128xf32>
    %cst_32 = arith.constant 0.995999991 : f32
    %95 = vector.broadcast %cst_32 : f32 to vector<1x128xf32>
    %96 = arith.cmpf ogt, %94, %95 : vector<1x128xf32>
    %cst_33 = arith.constant 1.000000e-15 : f32
    %97 = vector.broadcast %cst_33 : f32 to vector<1x128xf32>
    %98 = arith.addf %94, %97 : vector<1x128xf32>
    %cst_34 = arith.constant 0.995999991 : f32
    %99 = vector.broadcast %cst_34 : f32 to vector<1x128xf32>
    %100 = arith.divf %99, %98 : vector<1x128xf32>
    %101 = vector.broadcast %100 : vector<1x128xf32> to vector<32x128xf32>
    %102 = arith.mulf %90, %101 : vector<32x128xf32>
    %103 = vector.shape_cast %96 : vector<1x128xi1> to vector<1x128xi1>
    %104 = vector.broadcast %103 : vector<1x128xi1> to vector<32x128xi1>
    %105 = arith.select %104, %102, %90 : vector<32x128xi1>, vector<32x128xf32>
    %106 = arith.mulf %94, %100 : vector<1x128xf32>
    %107 = arith.select %96, %106, %94 : vector<1x128xi1>, vector<1x128xf32>
    %108 = arith.mulf %107, %107 : vector<1x128xf32>
    %cst_35 = arith.constant 1.000000e+00 : f32
    %109 = vector.broadcast %cst_35 : f32 to vector<1x128xf32>
    %110 = arith.subf %109, %108 : vector<1x128xf32>
    %111 = math.sqrt %110 : vector<1x128xf32>
    %cst_36 = arith.constant 1.000000e+00 : f32
    %112 = vector.broadcast %cst_36 : f32 to vector<1x128xf32>
    %113 = arith.addf %112, %111 : vector<1x128xf32>
    %114 = tpu.reciprocal %113 : vector<1x128xf32> -> vector<1x128xf32>
    %115 = vector.broadcast %114 : vector<1x128xf32> to vector<32x128xf32>
    %116 = arith.mulf %105, %115 : vector<32x128xf32>
    %117 = arith.mulf %107, %114 : vector<1x128xf32>
    %cst_37 = arith.constant 1.000000e-15 : f32
    %118 = vector.broadcast %cst_37 : f32 to vector<1x128xf32>
    %119 = arith.maximumf %117, %118 : vector<1x128xf32>
    %cst_38 = arith.constant 0.995999991 : f32
    %120 = vector.broadcast %cst_38 : f32 to vector<1x128xf32>
    %121 = arith.cmpf ogt, %119, %120 : vector<1x128xf32>
    %cst_39 = arith.constant 0.995999991 : f32
    %122 = vector.broadcast %cst_39 : f32 to vector<1x128xf32>
    %123 = arith.divf %122, %119 : vector<1x128xf32>
    %124 = vector.broadcast %123 : vector<1x128xf32> to vector<32x128xf32>
    %125 = arith.mulf %116, %124 : vector<32x128xf32>
    %126 = vector.shape_cast %121 : vector<1x128xi1> to vector<1x128xi1>
    %127 = vector.broadcast %126 : vector<1x128xi1> to vector<32x128xi1>
    %128 = arith.select %127, %125, %116 : vector<32x128xi1>, vector<32x128xf32>
    %cst_40 = arith.constant 0.995999991 : f32
    %129 = vector.broadcast %cst_40 : f32 to vector<1x128xf32>
    %130 = arith.select %121, %129, %117 : vector<1x128xi1>, vector<1x128xf32>
    %c0_41 = arith.constant 0 : index
    %c0_42 = arith.constant 0 : index
    %131 = vector.load %arg3[%c0_41, %c0_42] : memref<128x32xf32, #tpu.memory_space<vmem>>, vector<128x32xf32>
    %cst_43 = arith.constant dense<0.000000e+00> : vector<128x128xf32>
    %132 = tpu.matmul %131, %128, %cst_43 {dimension_numbers = #tpu.dot_dimension_numbers<[1], [0], [0], [1], [0, 0, 1, 1], [], []>} : vector<128x32xf32>, vector<32x128xf32>, vector<128x128xf32> -> vector<128x128xf32>
    %133 = arith.mulf %132, %132 : vector<128x128xf32>
    %cst_44 = arith.constant dense<0.000000e+00> : vector<128xf32>
    %134 = vector.multi_reduction <add>, %133, %cst_44 [0] : vector<128x128xf32> to vector<128xf32>
    %135 = vector.shape_cast %134 : vector<128xf32> to vector<1x128xf32>
    %136 = math.sqrt %135 : vector<1x128xf32>
    %cst_45 = arith.constant 1.000000e-15 : f32
    %137 = vector.broadcast %cst_45 : f32 to vector<1x128xf32>
    %138 = arith.maximumf %136, %137 : vector<1x128xf32>
    %cst_46 = arith.constant 1.000000e-15 : f32
    %139 = vector.broadcast %cst_46 : f32 to vector<1x128xf32>
    %140 = arith.maximumf %130, %139 : vector<1x128xf32>
    %141 = tpu.reciprocal %140 : vector<1x128xf32> -> vector<1x128xf32>
    %142 = arith.mulf %138, %141 : vector<1x128xf32>
    %cst_47 = arith.constant 1.000000e+00 : f32
    %143 = vector.broadcast %cst_47 : f32 to vector<1x128xf32>
    %144 = arith.mulf %143, %140 : vector<1x128xf32>
    %cst_48 = arith.constant -0.99999988 : f32
    %cst_49 = arith.constant 0.99999988 : f32
    %145 = vector.broadcast %cst_48 : f32 to vector<1x128xf32>
    %146 = arith.maximumf %145, %144 : vector<1x128xf32>
    %147 = vector.broadcast %cst_49 : f32 to vector<1x128xf32>
    %148 = arith.minimumf %147, %146 : vector<1x128xf32>
    %cst_50 = arith.constant 1.000000e+00 : f32
    %149 = vector.broadcast %cst_50 : f32 to vector<1x128xf32>
    %150 = arith.addf %149, %148 : vector<1x128xf32>
    %cst_51 = arith.constant 1.000000e+00 : f32
    %151 = vector.broadcast %cst_51 : f32 to vector<1x128xf32>
    %152 = arith.subf %151, %148 : vector<1x128xf32>
    %153 = arith.divf %150, %152 : vector<1x128xf32>
    %154 = math.log %153 : vector<1x128xf32>
    %cst_52 = arith.constant 5.000000e-01 : f32
    %155 = vector.broadcast %cst_52 : f32 to vector<1x128xf32>
    %156 = arith.mulf %155, %154 : vector<1x128xf32>
    %157 = arith.mulf %142, %156 : vector<1x128xf32>
    %158 = math.tanh %157 : vector<1x128xf32>
    %cst_53 = arith.constant 1.000000e+00 : f32
    %159 = vector.broadcast %cst_53 : f32 to vector<1x128xf32>
    %160 = arith.mulf %138, %159 : vector<1x128xf32>
    %161 = tpu.reciprocal %160 {approx = true} : vector<1x128xf32> -> vector<1x128xf32>
    %162 = arith.mulf %158, %161 : vector<1x128xf32>
    %163 = vector.broadcast %162 : vector<1x128xf32> to vector<128x128xf32>
    %164 = arith.mulf %163, %132 : vector<128x128xf32>
    %165 = math.absf %132 : vector<128x128xf32>
    %cst_54 = arith.constant dense<0xFF800000> : vector<128xf32>
    %166 = vector.multi_reduction <maximumf>, %165, %cst_54 [0] : vector<128x128xf32> to vector<128xf32>
    %167 = vector.shape_cast %166 : vector<128xf32> to vector<1x128xf32>
    %cst_55 = arith.constant 0.000000e+00 : f32
    %168 = vector.broadcast %cst_55 : f32 to vector<1x128xf32>
    %169 = arith.cmpf oeq, %167, %168 : vector<1x128xf32>
    %cst_56 = arith.constant 0.000000e+00 : f32
    %170 = vector.shape_cast %169 : vector<1x128xi1> to vector<1x128xi1>
    %171 = vector.broadcast %170 : vector<1x128xi1> to vector<128x128xi1>
    %172 = vector.broadcast %cst_56 : f32 to vector<128x128xf32>
    %173 = arith.select %171, %172, %164 : vector<128x128xi1>, vector<128x128xf32>
    %174 = arith.mulf %173, %173 : vector<128x128xf32>
    %cst_57 = arith.constant dense<0.000000e+00> : vector<128xf32>
    %175 = vector.multi_reduction <add>, %174, %cst_57 [0] : vector<128x128xf32> to vector<128xf32>
    %176 = vector.shape_cast %175 : vector<128xf32> to vector<1x128xf32>
    %177 = math.sqrt %176 : vector<1x128xf32>
    %cst_58 = arith.constant 1.000000e-15 : f32
    %178 = vector.broadcast %cst_58 : f32 to vector<1x128xf32>
    %179 = arith.maximumf %177, %178 : vector<1x128xf32>
    %cst_59 = arith.constant 0.995999991 : f32
    %180 = vector.broadcast %cst_59 : f32 to vector<1x128xf32>
    %181 = arith.cmpf ogt, %179, %180 : vector<1x128xf32>
    %cst_60 = arith.constant 0.995999991 : f32
    %182 = vector.broadcast %cst_60 : f32 to vector<1x128xf32>
    %183 = arith.divf %182, %179 : vector<1x128xf32>
    %184 = vector.broadcast %183 : vector<1x128xf32> to vector<128x128xf32>
    %185 = arith.mulf %173, %184 : vector<128x128xf32>
    %186 = vector.shape_cast %181 : vector<1x128xi1> to vector<1x128xi1>
    %187 = vector.broadcast %186 : vector<1x128xi1> to vector<128x128xi1>
    %188 = arith.select %187, %185, %173 : vector<128x128xi1>, vector<128x128xf32>
    %cst_61 = arith.constant 0.995999991 : f32
    %189 = vector.broadcast %cst_61 : f32 to vector<1x128xf32>
    %190 = arith.select %181, %189, %177 : vector<1x128xi1>, vector<1x128xf32>
    %c0_62 = arith.constant 0 : index
    %c0_63 = arith.constant 0 : index
    %191 = vector.load %arg4[%c0_62, %c0_63] : memref<128x1xf32, #tpu.memory_space<vmem>>, vector<128x1xf32>
    %192 = arith.mulf %191, %191 : vector<128x1xf32>
    %cst_64 = arith.constant dense<0.000000e+00> : vector<1xf32>
    %193 = vector.multi_reduction <add>, %192, %cst_64 [0] : vector<128x1xf32> to vector<1xf32>
    %194 = vector.shape_cast %193 : vector<1xf32> to vector<1x1xf32>
    %195 = arith.mulf %190, %190 : vector<1x128xf32>
    %196 = vector.broadcast %191 : vector<128x1xf32> to vector<128x128xf32>
    %197 = arith.mulf %188, %196 : vector<128x128xf32>
    %cst_65 = arith.constant dense<0.000000e+00> : vector<128xf32>
    %198 = vector.multi_reduction <add>, %197, %cst_65 [0] : vector<128x128xf32> to vector<128xf32>
    %199 = vector.shape_cast %198 : vector<128xf32> to vector<1x128xf32>
    %cst_66 = arith.constant 2.000000e+00 : f32
    %200 = vector.broadcast %cst_66 : f32 to vector<1x128xf32>
    %201 = arith.mulf %200, %199 : vector<1x128xf32>
    %cst_67 = arith.constant 1.000000e+00 : f32
    %202 = vector.broadcast %cst_67 : f32 to vector<1x128xf32>
    %203 = arith.addf %202, %201 : vector<1x128xf32>
    %cst_68 = arith.constant 1.000000e+00 : f32
    %204 = vector.broadcast %cst_68 : f32 to vector<1x1xf32>
    %205 = arith.mulf %204, %194 : vector<1x1xf32>
    %206 = vector.broadcast %205 : vector<1x1xf32> to vector<1x128xf32>
    %207 = arith.addf %203, %206 : vector<1x128xf32>
    %208 = vector.broadcast %207 : vector<1x128xf32> to vector<128x128xf32>
    %209 = arith.mulf %208, %188 : vector<128x128xf32>
    %cst_69 = arith.constant 1.000000e+00 : f32
    %210 = vector.broadcast %cst_69 : f32 to vector<1x128xf32>
    %211 = arith.mulf %210, %195 : vector<1x128xf32>
    %cst_70 = arith.constant 1.000000e+00 : f32
    %212 = vector.broadcast %cst_70 : f32 to vector<1x128xf32>
    %213 = arith.subf %212, %211 : vector<1x128xf32>
    %214 = vector.broadcast %213 : vector<1x128xf32> to vector<128x128xf32>
    %215 = vector.broadcast %191 : vector<128x1xf32> to vector<128x128xf32>
    %216 = arith.mulf %214, %215 : vector<128x128xf32>
    %217 = arith.addf %209, %216 : vector<128x128xf32>
    %cst_71 = arith.constant 2.000000e+00 : f32
    %218 = vector.broadcast %cst_71 : f32 to vector<1x128xf32>
    %219 = arith.mulf %218, %199 : vector<1x128xf32>
    %cst_72 = arith.constant 1.000000e+00 : f32
    %220 = vector.broadcast %cst_72 : f32 to vector<1x128xf32>
    %221 = arith.addf %220, %219 : vector<1x128xf32>
    %cst_73 = arith.constant 1.000000e+00 : f32
    %222 = vector.broadcast %cst_73 : f32 to vector<1x128xf32>
    %223 = arith.mulf %222, %195 : vector<1x128xf32>
    %224 = vector.broadcast %194 : vector<1x1xf32> to vector<1x128xf32>
    %225 = arith.mulf %223, %224 : vector<1x128xf32>
    %226 = arith.addf %221, %225 : vector<1x128xf32>
    %cst_74 = arith.constant 1.000000e-15 : f32
    %227 = vector.broadcast %cst_74 : f32 to vector<1x128xf32>
    %228 = arith.maximumf %226, %227 : vector<1x128xf32>
    %229 = tpu.reciprocal %228 {approx = true} : vector<1x128xf32> -> vector<1x128xf32>
    %230 = vector.broadcast %229 : vector<1x128xf32> to vector<128x128xf32>
    %231 = arith.mulf %217, %230 : vector<128x128xf32>
    %232 = arith.mulf %231, %231 : vector<128x128xf32>
    %cst_75 = arith.constant dense<0.000000e+00> : vector<128xf32>
    %233 = vector.multi_reduction <add>, %232, %cst_75 [0] : vector<128x128xf32> to vector<128xf32>
    %234 = vector.shape_cast %233 : vector<128xf32> to vector<1x128xf32>
    %235 = math.sqrt %234 : vector<1x128xf32>
    %cst_76 = arith.constant 1.000000e-15 : f32
    %236 = vector.broadcast %cst_76 : f32 to vector<1x128xf32>
    %237 = arith.maximumf %235, %236 : vector<1x128xf32>
    %cst_77 = arith.constant 0.995999991 : f32
    %238 = vector.broadcast %cst_77 : f32 to vector<1x128xf32>
    %239 = arith.cmpf ogt, %237, %238 : vector<1x128xf32>
    %cst_78 = arith.constant 0.995999991 : f32
    %240 = vector.broadcast %cst_78 : f32 to vector<1x128xf32>
    %241 = arith.divf %240, %237 : vector<1x128xf32>
    %242 = vector.broadcast %241 : vector<1x128xf32> to vector<128x128xf32>
    %243 = arith.mulf %231, %242 : vector<128x128xf32>
    %244 = vector.shape_cast %239 : vector<1x128xi1> to vector<1x128xi1>
    %245 = vector.broadcast %244 : vector<1x128xi1> to vector<128x128xi1>
    %246 = arith.select %245, %243, %231 : vector<128x128xi1>, vector<128x128xf32>
    %cst_79 = arith.constant 0.995999991 : f32
    %247 = vector.broadcast %cst_79 : f32 to vector<1x128xf32>
    %248 = arith.select %239, %247, %235 : vector<1x128xi1>, vector<1x128xf32>
    %cst_80 = arith.constant 1.000000e-15 : f32
    %249 = vector.broadcast %cst_80 : f32 to vector<1x128xf32>
    %250 = arith.maximumf %248, %249 : vector<1x128xf32>
    %cst_81 = arith.constant 1.000000e+00 : f32
    %251 = vector.broadcast %cst_81 : f32 to vector<1x128xf32>
    %252 = arith.mulf %251, %250 : vector<1x128xf32>
    %cst_82 = arith.constant -0.99999988 : f32
    %cst_83 = arith.constant 0.99999988 : f32
    %253 = vector.broadcast %cst_82 : f32 to vector<1x128xf32>
    %254 = arith.maximumf %253, %252 : vector<1x128xf32>
    %255 = vector.broadcast %cst_83 : f32 to vector<1x128xf32>
    %256 = arith.minimumf %255, %254 : vector<1x128xf32>
    %cst_84 = arith.constant 1.000000e+00 : f32
    %257 = vector.broadcast %cst_84 : f32 to vector<1x128xf32>
    %258 = arith.addf %257, %256 : vector<1x128xf32>
    %cst_85 = arith.constant 1.000000e+00 : f32
    %259 = vector.broadcast %cst_85 : f32 to vector<1x128xf32>
    %260 = arith.subf %259, %256 : vector<1x128xf32>
    %261 = arith.divf %258, %260 : vector<1x128xf32>
    %262 = math.log %261 : vector<1x128xf32>
    %cst_86 = arith.constant 5.000000e-01 : f32
    %263 = vector.broadcast %cst_86 : f32 to vector<1x128xf32>
    %264 = arith.mulf %263, %262 : vector<1x128xf32>
    %cst_87 = arith.constant 1.000000e+00 : f32
    %265 = vector.broadcast %cst_87 : f32 to vector<1x128xf32>
    %266 = arith.mulf %265, %250 : vector<1x128xf32>
    %267 = tpu.reciprocal %266 {approx = true} : vector<1x128xf32> -> vector<1x128xf32>
    %268 = arith.mulf %264, %267 : vector<1x128xf32>
    %269 = vector.broadcast %268 : vector<1x128xf32> to vector<128x128xf32>
    %270 = arith.mulf %269, %246 : vector<128x128xf32>
    %c0_88 = arith.constant 0 : index
    %c0_89 = arith.constant 0 : index
    %271 = vector.load %arg5[%c0_88, %c0_89] : memref<128x128xf32, #tpu.memory_space<vmem>>, vector<128x128xf32>
    tpu.vector_store %arg5[%c0_88, %c0_89], %270 {strides = array<i32>} : memref<128x128xf32, #tpu.memory_space<vmem>>, vector<128x128xf32>,
    return
  }
  func.func @transform_0(%arg0: i32) -> (i32, i32, i32) {
    %c0_i32 = arith.constant 0 : i32
    %c0_i32_0 = arith.constant 0 : i32
    %c0_i32_1 = arith.constant 0 : i32
    return %c0_i32, %c0_i32_0, %arg0 : i32, i32, i32
  }
  func.func @transform_1(%arg0: i32) -> (i32, i32, i32) {
    %c0_i32 = arith.constant 0 : i32
    %c0_i32_0 = arith.constant 0 : i32
    %c0_i32_1 = arith.constant 0 : i32
    return %c0_i32, %c0_i32_0, %arg0 : i32, i32, i32
  }
  func.func @transform_2(%arg0: i32) -> (i32, i32) {
    %c0_i32 = arith.constant 0 : i32
    %c0_i32_0 = arith.constant 0 : i32
    %c0_i32_1 = arith.constant 0 : i32
    return %c0_i32, %c0_i32_0 : i32, i32
  }
  func.func @transform_3(%arg0: i32) -> (i32, i32) {
    %c0_i32 = arith.constant 0 : i32
    %c0_i32_0 = arith.constant 0 : i32
    %c0_i32_1 = arith.constant 0 : i32
    return %c0_i32, %c0_i32_0 : i32, i32
  }
  func.func @transform_4(%arg0: i32) -> (i32, i32) {
    %c0_i32 = arith.constant 0 : i32
    %c0_i32_0 = arith.constant 0 : i32
    return %c0_i32, %arg0 : i32, i32
  }
}

</mosaic_0001>

<bundles_post_ra>
// kernel: hypertext_forward.1
= control target key start
LH: loop header
LB: loop body
LE: loop exit
PB: predicated region body
PF: predicated region fallthrough
CT: control target
= control target key end

     0   :  { %s2965_s15 = smov 0   ;;  %s2967_s16 = smov 0   ;;  %s5608_s0 = inlined_call_operand.vmem [shape: f32[8,32,256], index: 0, kind: input, shape index: {}]   ;;  %s5609_s1 = inlined_call_operand.vmem [shape: f32[8,32,256], index: 1, kind: input, shape index: {}]   ;;  %s5610_s2 = inlined_call_operand.vmem [shape: f32[128,32], index: 2, kind: input, shape index: {}]   ;;  %s5611_s3 = inlined_call_operand.vmem [shape: f32[128,1], index: 3, kind: input, shape index: {}]   ;;  %s5612_s4 = inlined_call_operand.vmem [shape: f32[128,256], index: 4, kind: output, shape index: {}]  }
   0x1   :  { %s2969_s17 = smov 0  }
   0x2 LB: > { %s2613_s18 = sadd.s32 4294967295, %s2937_s17   ;;  %s2982_s19 = sadd.s32 1, %s2937_s17   ;;  %s2937_s17 = sphi %s2969_s17, %s5985_s17   ;;  %s2933_s16 = sphi %s2967_s16, %s5984_s16   ;;  %s2929_s15 = sphi %s2965_s15, %s5983_s15  }
   0x3   : > { %s18_s20 = ssub.s32 %s2937_s17, %s2982_s19  ;;  %s21_s21 = sadd.s32 1, %s2933_s16 }
   0x4   : > { %p19_p0 = scmp.eq.s32.totalorder %s18_s20, 0  ;;  %p28_p1 = scmp.ne.s32.totalorder %s2933_s16, %s2929_s15 }
   0x5   : > { %p29_p2 = scmp.eq.s32.totalorder %s2937_s17, 0  ;;  %p126_p3 = scmp.eq.s32.totalorder %s2613_s18, 1 }
   0x6   : > { %s2993_s22 = scalar_select %p19_p0, %s2933_s16, %s21_s21  }
   0x7   : > { %p2995_p4 = por %p29_p2, %p28_p1  ;;  %p2999_p5 = por %p126_p3, %p28_p1 }
   0x8   : > { %p2616_p6 = scmp.ge.s32.totalorder %s2937_s17, 2 }
   0xa   : > { %154 = sbr.rel (%p2616_p6) target bundleno = 57 (0x39), region = 24 }
  0x11   : > { %157 = sbr.rel (!%p2995_p4) target bundleno = 37 (0x25), region = 28  ;;  %s159_s25 = sand.u32 (%p2995_p4), 1, %s2933_s16  }
  0x12   : > { %s2618_s26 = sshll.u32 (%p2995_p4), %s2937_s17, 3  ;;  %s2617_s27 = sshll.u32 (%p2995_p4), %s159_s25, 8 }
  0x13   : > { %s3011_s30 = scalar_lea.vmem (%p2995_p4), %s5608_s0, %s2618_s26  ;;  %s3016_s5 = scalar_lea.vmem (%p2995_p4), [#allocation2], %s2617_s27 }
  0x14   : > { %v253_v0 = vld [vmem:[%s3011_s30] sm:$0xff] (%p2995_p4)  ;;  %v255_v1 = vld [vmem:[%s3011_s30 + $0x10] sm:$0xff] (%p2995_p4) }
  0x15   : > { %v257_v2 = vld [vmem:[%s3011_s30 + $0x20] sm:$0xff] (%p2995_p4)  ;;  %254 = vst [vmem:[%s3016_s5] sm:$0xff] (%p2995_p4), %v253_v0  ;;  %256 = vst [vmem:[%s3016_s5 + $0x8] sm:$0xff] (%p2995_p4), %v255_v1  ;;  %v259_v3 = vld [vmem:[%s3011_s30 + $0x30] sm:$0xff] (%p2995_p4) }
  0x16   : > { %258 = vst [vmem:[%s3016_s5 + $0x10] sm:$0xff] (%p2995_p4), %v257_v2  ;;  %v261_v4 = vld [vmem:[%s3011_s30 + $0x40] sm:$0xff] (%p2995_p4)  ;;  %v263_v5 = vld [vmem:[%s3011_s30 + $0x50] sm:$0xff] (%p2995_p4)  ;;  %260 = vst [vmem:[%s3016_s5 + $0x18] sm:$0xff] (%p2995_p4), %v259_v3 }
  0x17   : > { %262 = vst [vmem:[%s3016_s5 + $0x20] sm:$0xff] (%p2995_p4), %v261_v4  ;;  %264 = vst [vmem:[%s3016_s5 + $0x28] sm:$0xff] (%p2995_p4), %v263_v5  ;;  %v265_v6 = vld [vmem:[%s3011_s30 + $0x60] sm:$0xff] (%p2995_p4)  ;;  %v267_v7 = vld [vmem:[%s3011_s30 + $0x70] sm:$0xff] (%p2995_p4) }
  0x18   : > { %v269_v8 = vld [vmem:[%s3011_s30 + $0x80] sm:$0xff]  ;;  %266 = vst [vmem:[%s3016_s5 + $0x30] sm:$0xff] %v265_v6  ;;  %268 = vst [vmem:[%s3016_s5 + $0x38] sm:$0xff] %v267_v7  ;;  %v271_v9 = vld [vmem:[%s3011_s30 + $0x90] sm:$0xff] }
  0x19   : > { %270 = vst [vmem:[%s3016_s5 + $0x40] sm:$0xff] %v269_v8  ;;  %v273_v10 = vld [vmem:[%s3011_s30 + $0xa0] sm:$0xff]  ;;  %v275_v11 = vld [vmem:[%s3011_s30 + $0xb0] sm:$0xff]  ;;  %272 = vst [vmem:[%s3016_s5 + $0x48] sm:$0xff] %v271_v9 }
  0x1a   : > { %274 = vst [vmem:[%s3016_s5 + $0x50] sm:$0xff] %v273_v10  ;;  %276 = vst [vmem:[%s3016_s5 + $0x58] sm:$0xff] %v275_v11  ;;  %v277_v12 = vld [vmem:[%s3011_s30 + $0xc0] sm:$0xff]  ;;  %v279_v13 = vld [vmem:[%s3011_s30 + $0xd0] sm:$0xff] }
  0x1b   : > { %v281_v14 = vld [vmem:[%s3011_s30 + $0xe0] sm:$0xff]  ;;  %278 = vst [vmem:[%s3016_s5 + $0x60] sm:$0xff] %v277_v12  ;;  %280 = vst [vmem:[%s3016_s5 + $0x68] sm:$0xff] %v279_v13  ;;  %v283_v15 = vld [vmem:[%s3011_s30 + $0xf0] sm:$0xff] }
  0x1c   : > { %282 = vst [vmem:[%s3016_s5 + $0x70] sm:$0xff] %v281_v14  ;;  %v285_v16 = vld [vmem:[%s3011_s30 + $0x100] sm:$0xff]  ;;  %v287_v17 = vld [vmem:[%s3011_s30 + $0x110] sm:$0xff]  ;;  %284 = vst [vmem:[%s3016_s5 + $0x78] sm:$0xff] %v283_v15 }
  0x1d   : > { %286 = vst [vmem:[%s3016_s5 + $0x80] sm:$0xff] %v285_v16  ;;  %288 = vst [vmem:[%s3016_s5 + $0x88] sm:$0xff] %v287_v17  ;;  %v289_v18 = vld [vmem:[%s3011_s30 + $0x120] sm:$0xff]  ;;  %v291_v19 = vld [vmem:[%s3011_s30 + $0x130] sm:$0xff] }
  0x1e   : > { %v293_v20 = vld [vmem:[%s3011_s30 + $0x140] sm:$0xff]  ;;  %290 = vst [vmem:[%s3016_s5 + $0x90] sm:$0xff] %v289_v18  ;;  %292 = vst [vmem:[%s3016_s5 + $0x98] sm:$0xff] %v291_v19  ;;  %v295_v21 = vld [vmem:[%s3011_s30 + $0x150] sm:$0xff] }
  0x1f   : > { %294 = vst [vmem:[%s3016_s5 + $0xa0] sm:$0xff] %v293_v20  ;;  %v297_v22 = vld [vmem:[%s3011_s30 + $0x160] sm:$0xff]  ;;  %v299_v23 = vld [vmem:[%s3011_s30 + $0x170] sm:$0xff]  ;;  %296 = vst [vmem:[%s3016_s5 + $0xa8] sm:$0xff] %v295_v21 }
  0x20   : > { %298 = vst [vmem:[%s3016_s5 + $0xb0] sm:$0xff] %v297_v22  ;;  %300 = vst [vmem:[%s3016_s5 + $0xb8] sm:$0xff] %v299_v23  ;;  %v301_v24 = vld [vmem:[%s3011_s30 + $0x180] sm:$0xff]  ;;  %v303_v25 = vld [vmem:[%s3011_s30 + $0x190] sm:$0xff] }
  0x21   : > { %v305_v26 = vld [vmem:[%s3011_s30 + $0x1a0] sm:$0xff]  ;;  %302 = vst [vmem:[%s3016_s5 + $0xc0] sm:$0xff] %v301_v24  ;;  %304 = vst [vmem:[%s3016_s5 + $0xc8] sm:$0xff] %v303_v25  ;;  %v307_v27 = vld [vmem:[%s3011_s30 + $0x1b0] sm:$0xff] }
  0x22   : > { %306 = vst [vmem:[%s3016_s5 + $0xd0] sm:$0xff] %v305_v26  ;;  %v309_v28 = vld [vmem:[%s3011_s30 + $0x1c0] sm:$0xff]  ;;  %v311_v29 = vld [vmem:[%s3011_s30 + $0x1d0] sm:$0xff]  ;;  %308 = vst [vmem:[%s3016_s5 + $0xd8] sm:$0xff] %v307_v27 }
  0x23   : > { %310 = vst [vmem:[%s3016_s5 + $0xe0] sm:$0xff] %v309_v28  ;;  %312 = vst [vmem:[%s3016_s5 + $0xe8] sm:$0xff] %v311_v29  ;;  %v313_v30 = vld [vmem:[%s3011_s30 + $0x1e0] sm:$0xff]  ;;  %v315_v31 = vld [vmem:[%s3011_s30 + $0x1f0] sm:$0xff] }
  0x24   : > { %314 = vst [vmem:[%s3016_s5 + $0xf0] sm:$0xff] %v313_v30  ;;  %316 = vst [vmem:[%s3016_s5 + $0xf8] sm:$0xff] %v315_v31 }
  0x25 PF: > { %322 = sbr.rel (!%p2995_p4) target bundleno = 57 (0x39), region = 66  ;;  %s324_s6 = sand.u32 (%p2995_p4), 1, %s2933_s16  }
  0x26   : > { %s2620_s7 = sshll.u32 (%p2995_p4), %s2937_s17, 3  ;;  %s2619_s8 = sshll.u32 (%p2995_p4), %s324_s6, 8 }
  0x27   : > { %s3086_s11 = scalar_lea.vmem (%p2995_p4), %s5609_s1, %s2620_s7  ;;  %s3091_s12 = scalar_lea.vmem (%p2995_p4), [#allocation3], %s2619_s8 }
  0x28   : > { %v418_v32 = vld [vmem:[%s3086_s11] sm:$0xff] (%p2995_p4)  ;;  %v420_v33 = vld [vmem:[%s3086_s11 + $0x10] sm:$0xff] (%p2995_p4) }
  0x29   : > { %v422_v34 = vld [vmem:[%s3086_s11 + $0x20] sm:$0xff] (%p2995_p4)  ;;  %419 = vst [vmem:[%s3091_s12] sm:$0xff] (%p2995_p4), %v418_v32  ;;  %421 = vst [vmem:[%s3091_s12 + $0x8] sm:$0xff] (%p2995_p4), %v420_v33  ;;  %v424_v35 = vld [vmem:[%s3086_s11 + $0x30] sm:$0xff] (%p2995_p4) }
  0x2a   : > { %423 = vst [vmem:[%s3091_s12 + $0x10] sm:$0xff] (%p2995_p4), %v422_v34  ;;  %v426_v36 = vld [vmem:[%s3086_s11 + $0x40] sm:$0xff] (%p2995_p4)  ;;  %v428_v37 = vld [vmem:[%s3086_s11 + $0x50] sm:$0xff] (%p2995_p4)  ;;  %425 = vst [vmem:[%s3091_s12 + $0x18] sm:$0xff] (%p2995_p4), %v424_v35 }
  0x2b   : > { %427 = vst [vmem:[%s3091_s12 + $0x20] sm:$0xff] (%p2995_p4), %v426_v36  ;;  %429 = vst [vmem:[%s3091_s12 + $0x28] sm:$0xff] (%p2995_p4), %v428_v37  ;;  %v430_v38 = vld [vmem:[%s3086_s11 + $0x60] sm:$0xff] (%p2995_p4)  ;;  %v432_v39 = vld [vmem:[%s3086_s11 + $0x70] sm:$0xff] (%p2995_p4) }
  0x2c   : > { %v434_v40 = vld [vmem:[%s3086_s11 + $0x80] sm:$0xff]  ;;  %431 = vst [vmem:[%s3091_s12 + $0x30] sm:$0xff] %v430_v38  ;;  %433 = vst [vmem:[%s3091_s12 + $0x38] sm:$0xff] %v432_v39  ;;  %v436_v41 = vld [vmem:[%s3086_s11 + $0x90] sm:$0xff] }
  0x2d   : > { %435 = vst [vmem:[%s3091_s12 + $0x40] sm:$0xff] %v434_v40  ;;  %v438_v42 = vld [vmem:[%s3086_s11 + $0xa0] sm:$0xff]  ;;  %v440_v43 = vld [vmem:[%s3086_s11 + $0xb0] sm:$0xff]  ;;  %437 = vst [vmem:[%s3091_s12 + $0x48] sm:$0xff] %v436_v41 }
  0x2e   : > { %439 = vst [vmem:[%s3091_s12 + $0x50] sm:$0xff] %v438_v42  ;;  %441 = vst [vmem:[%s3091_s12 + $0x58] sm:$0xff] %v440_v43  ;;  %v442_v44 = vld [vmem:[%s3086_s11 + $0xc0] sm:$0xff]  ;;  %v444_v45 = vld [vmem:[%s3086_s11 + $0xd0] sm:$0xff] }
  0x2f   : > { %v446_v46 = vld [vmem:[%s3086_s11 + $0xe0] sm:$0xff]  ;;  %443 = vst [vmem:[%s3091_s12 + $0x60] sm:$0xff] %v442_v44  ;;  %445 = vst [vmem:[%s3091_s12 + $0x68] sm:$0xff] %v444_v45  ;;  %v448_v47 = vld [vmem:[%s3086_s11 + $0xf0] sm:$0xff] }
  0x30   : > { %447 = vst [vmem:[%s3091_s12 + $0x70] sm:$0xff] %v446_v46  ;;  %v450_v48 = vld [vmem:[%s3086_s11 + $0x100] sm:$0xff]  ;;  %v452_v49 = vld [vmem:[%s3086_s11 + $0x110] sm:$0xff]  ;;  %449 = vst [vmem:[%s3091_s12 + $0x78] sm:$0xff] %v448_v47 }
  0x31   : > { %451 = vst [vmem:[%s3091_s12 + $0x80] sm:$0xff] %v450_v48  ;;  %453 = vst [vmem:[%s3091_s12 + $0x88] sm:$0xff] %v452_v49  ;;  %v454_v50 = vld [vmem:[%s3086_s11 + $0x120] sm:$0xff]  ;;  %v456_v51 = vld [vmem:[%s3086_s11 + $0x130] sm:$0xff] }
  0x32   : > { %v458_v52 = vld [vmem:[%s3086_s11 + $0x140] sm:$0xff]  ;;  %455 = vst [vmem:[%s3091_s12 + $0x90] sm:$0xff] %v454_v50  ;;  %457 = vst [vmem:[%s3091_s12 + $0x98] sm:$0xff] %v456_v51  ;;  %v460_v53 = vld [vmem:[%s3086_s11 + $0x150] sm:$0xff] }
  0x33   : > { %459 = vst [vmem:[%s3091_s12 + $0xa0] sm:$0xff] %v458_v52  ;;  %v462_v54 = vld [vmem:[%s3086_s11 + $0x160] sm:$0xff]  ;;  %v464_v55 = vld [vmem:[%s3086_s11 + $0x170] sm:$0xff]  ;;  %461 = vst [vmem:[%s3091_s12 + $0xa8] sm:$0xff] %v460_v53 }
  0x34   : > { %463 = vst [vmem:[%s3091_s12 + $0xb0] sm:$0xff] %v462_v54  ;;  %465 = vst [vmem:[%s3091_s12 + $0xb8] sm:$0xff] %v464_v55  ;;  %v466_v56 = vld [vmem:[%s3086_s11 + $0x180] sm:$0xff]  ;;  %v468_v57 = vld [vmem:[%s3086_s11 + $0x190] sm:$0xff] }
  0x35   : > { %v470_v58 = vld [vmem:[%s3086_s11 + $0x1a0] sm:$0xff]  ;;  %467 = vst [vmem:[%s3091_s12 + $0xc0] sm:$0xff] %v466_v56  ;;  %469 = vst [vmem:[%s3091_s12 + $0xc8] sm:$0xff] %v468_v57  ;;  %v472_v59 = vld [vmem:[%s3086_s11 + $0x1b0] sm:$0xff] }
  0x36   : > { %471 = vst [vmem:[%s3091_s12 + $0xd0] sm:$0xff] %v470_v58  ;;  %v474_v60 = vld [vmem:[%s3086_s11 + $0x1c0] sm:$0xff]  ;;  %v476_v61 = vld [vmem:[%s3086_s11 + $0x1d0] sm:$0xff]  ;;  %473 = vst [vmem:[%s3091_s12 + $0xd8] sm:$0xff] %v472_v59 }
  0x37   : > { %475 = vst [vmem:[%s3091_s12 + $0xe0] sm:$0xff] %v474_v60  ;;  %477 = vst [vmem:[%s3091_s12 + $0xe8] sm:$0xff] %v476_v61  ;;  %v478_v62 = vld [vmem:[%s3086_s11 + $0x1e0] sm:$0xff]  ;;  %v480_v63 = vld [vmem:[%s3086_s11 + $0x1f0] sm:$0xff] }
  0x38   : > { %479 = vst [vmem:[%s3091_s12 + $0xf0] sm:$0xff] %v478_v62  ;;  %481 = vst [vmem:[%s3091_s12 + $0xf8] sm:$0xff] %v480_v63 }
  0x39 PF: > { %p2621_p7 = scmp.ge.s32.totalorder %s2937_s17, 1  ;;  %p486_p8 = scmp.lt.s32.totalorder %s2937_s17, 3 }
  0x3b   : > { %p487_p9 = pnand %p2621_p7, %p486_p8 }
  0x3d   : > { %490 = sbr.rel (%p487_p9) target bundleno = 997 (0x3e5), region = 104 }
  0x44   : > { %s493_s13 = sand.u32 1, %s2929_s15  }
  0x45   : > { %s3159_s14 = sshll.u32 %s493_s13, 8  ;;  %s2624_s8 = sshll.u32 %s493_s13, 7 }
  0x46   : > { %s3162_s20 = scalar_lea.vmem [#allocation2], %s3159_s14  ;;  %s3547_s21 = scalar_lea.vmem [#allocation3], %s3159_s14 }
  0x47   : > { %v3165_v0 = vld [vmem:[%s3162_s20] sm:$0xff]  ;;  %v3168_v1 = vld [vmem:[%s3162_s20 + $0x8] sm:$0xff]  ;;  %v3171_v2 = vld [vmem:[%s3162_s20 + $0x10] sm:$0xff]  ;;  %s5557_s15 = scalar_lea.vmem [#allocation4], %s2624_s8  ;;  %s2644_s13 = sshll.u32 (%p2999_p5), %s2613_s18, 3 }
  0x48   : > { %v3174_v3 = vld [vmem:[%s3162_s20 + $0x18] sm:$0xff]  ;;  %v3177_v4 = vld [vmem:[%s3162_s20 + $0x20] sm:$0xff]  ;;  %v3180_v5 = vld [vmem:[%s3162_s20 + $0x28] sm:$0xff]  ;;  %v560_v6 = vmul.f32 %v3165_v0, %v3165_v0  ;;  %v561_v7 = vmul.f32 %v3168_v1, %v3168_v1  ;;  %v562_v8 = vmul.f32 %v3171_v2, %v3171_v2  ;;  %s2446_s24 = scalar_lea.vmem (%p2999_p5), %s5612_s4, %s2644_s13 }
  0x49   : > { %v3189_v9 = vld [vmem:[%s3162_s20 + $0x30] sm:$0xff]  ;;  %v3192_v10 = vld [vmem:[%s3162_s20 + $0x38] sm:$0xff]  ;;  %v3195_v11 = vld [vmem:[%s3162_s20 + $0x40] sm:$0xff]  ;;  %v563_v12 = vmul.f32 %v3174_v3, %v3174_v3  ;;  %v564_v13 = vmul.f32 %v3177_v4, %v3177_v4  ;;  %v565_v14 = vmul.f32 %v3180_v5, %v3180_v5 }
  0x4a   : > { %v3204_v15 = vld [vmem:[%s3162_s20 + $0x48] sm:$0xff]  ;;  %v3207_v16 = vld [vmem:[%s3162_s20 + $0x50] sm:$0xff]  ;;  %v3210_v17 = vld [vmem:[%s3162_s20 + $0x58] sm:$0xff]  ;;  %v566_v18 = vmul.f32 %v3189_v9, %v3189_v9  ;;  %v567_v19 = vmul.f32 %v3192_v10, %v3192_v10  ;;  %v568_v20 = vmul.f32 %v3195_v11, %v3195_v11  ;;  %v592_v21 = vadd.f32 %v561_v7, %v560_v6 }
  0x4b   : > { %v3219_v22 = vld [vmem:[%s3162_s20 + $0x60] sm:$0xff]  ;;  %v3222_v23 = vld [vmem:[%s3162_s20 + $0x68] sm:$0xff]  ;;  %v3225_v24 = vld [vmem:[%s3162_s20 + $0x70] sm:$0xff]  ;;  %v569_v25 = vmul.f32 %v3204_v15, %v3204_v15  ;;  %v570_v26 = vmul.f32 %v3207_v16, %v3207_v16  ;;  %v571_v27 = vmul.f32 %v3210_v17, %v3210_v17  ;;  %v601_v28 = vadd.f32 %v565_v14, %v564_v13 }
  0x4c   : > { %v3234_v29 = vld [vmem:[%s3162_s20 + $0x78] sm:$0xff]  ;;  %v3237_v30 = vld [vmem:[%s3162_s20 + $0x80] sm:$0xff]  ;;  %v3240_v31 = vld [vmem:[%s3162_s20 + $0x88] sm:$0xff]  ;;  %v572_v32 = vmul.f32 %v3219_v22, %v3219_v22  ;;  %v573_v33 = vmul.f32 %v3222_v23, %v3222_v23  ;;  %v574_v34 = vmul.f32 %v3225_v24, %v3225_v24  ;;  %v593_v35 = vadd.f32 %v592_v21, %v562_v8 }
  0x4d   : > { %5704 = vst [vmem:[#allocation5_spill] sm:$0xff] %v3237_v30  ;;  %5705 = vst [vmem:[#allocation6_spill] sm:$0xff] %v3240_v31  ;;  %v3249_v36 = vld [vmem:[%s3162_s20 + $0x90] sm:$0xff]  ;;  %v3252_v37 = vld [vmem:[%s3162_s20 + $0x98] sm:$0xff]  ;;  %v575_v39 = vmul.f32 %v3234_v29, %v3234_v29  ;;  %v576_v40 = vmul.f32 %v3237_v30, %v3237_v30  ;;  %v577_v41 = vmul.f32 %v3240_v31, %v3240_v31 }
  0x4e   : > { %5706 = vst [vmem:[#allocation7_spill] sm:$0xff] %v3249_v36  ;;  %5707 = vst [vmem:[#allocation8_spill] sm:$0xff] %v3252_v37  ;;  %v3255_v38 = vld [vmem:[%s3162_s20 + $0xa0] sm:$0xff]  ;;  %v602_v42 = vadd.f32 %v601_v28, %v566_v18  ;;  %v3264_v43 = vld [vmem:[%s3162_s20 + $0xa8] sm:$0xff]  ;;  %v578_v46 = vmul.f32 %v3249_v36, %v3249_v36  ;;  %v579_v47 = vmul.f32 %v3252_v37, %v3252_v37 }
  0x4f   : > { %5708 = vst [vmem:[#allocation9_spill] sm:$0xff] %v3255_v38  ;;  %5709 = vst [vmem:[#allocation10_spill] sm:$0xff] %v3264_v43  ;;  %v3267_v44 = vld [vmem:[%s3162_s20 + $0xb0] sm:$0xff]  ;;  %v3270_v45 = vld [vmem:[%s3162_s20 + $0xb8] sm:$0xff]  ;;  %v580_v48 = vmul.f32 %v3255_v38, %v3255_v38  ;;  %v594_v49 = vadd.f32 %v593_v35, %v563_v12  ;;  %v581_v53 = vmul.f32 %v3264_v43, %v3264_v43 }
  0x50   : > { %5710 = vst [vmem:[#allocation11_spill] sm:$0xff] %v3267_v44  ;;  %5711 = vst [vmem:[#allocation12_spill] sm:$0xff] %v3270_v45  ;;  %v3279_v50 = vld [vmem:[%s3162_s20 + $0xc0] sm:$0xff]  ;;  %v3282_v51 = vld [vmem:[%s3162_s20 + $0xc8] sm:$0xff]  ;;  %v582_v54 = vmul.f32 %v3267_v44, %v3267_v44  ;;  %v583_v55 = vmul.f32 %v3270_v45, %v3270_v45  ;;  %v603_v56 = vadd.f32 %v602_v42, %v567_v19 }
  0x51   : > { %5712 = vst [vmem:[#allocation13_spill] sm:$0xff] %v3279_v50  ;;  %5713 = vst [vmem:[#allocation14_spill] sm:$0xff] %v3282_v51  ;;  %v3285_v52 = vld [vmem:[%s3162_s20 + $0xd0] sm:$0xff]  ;;  %v3294_v57 = vld [vmem:[%s3162_s20 + $0xd8] sm:$0xff]  ;;  %v584_v60 = vmul.f32 %v3279_v50, %v3279_v50  ;;  %v585_v61 = vmul.f32 %v3282_v51, %v3282_v51  ;;  %v595_v63 = vrot.slane %v594_v49, 4  ;;  %v610_v28 = vadd.f32 %v569_v25, %v568_v20 }
  0x52   : > { %5714 = vst [vmem:[#allocation15_spill] sm:$0xff] %v3285_v52  ;;  %5715 = vst [vmem:[#allocation16_spill] sm:$0xff] %v3294_v57  ;;  %v3297_v58 = vld [vmem:[%s3162_s20 + $0xe0] sm:$0xff]  ;;  %v3300_v59 = vld [vmem:[%s3162_s20 + $0xe8] sm:$0xff]  ;;  %v586_v62 = vmul.f32 %v3285_v52, %v3285_v52  ;;  %v587_v8 = vmul.f32 %v3294_v57, %v3294_v57  ;;  %v604_v14 = vrot.slane %v603_v56, 4  ;;  %v619_v42 = vadd.f32 %v573_v33, %v572_v32 }
  0x53   : > { %5716 = vst [vmem:[#allocation17_spill] sm:$0xff] %v3297_v58  ;;  %5717 = vst [vmem:[#allocation18_spill] sm:$0xff] %v3300_v59  ;;  %v3309_v6 = vld [vmem:[%s3162_s20 + $0xf0] sm:$0xff]  ;;  %v3312_v7 = vld [vmem:[%s3162_s20 + $0xf8] sm:$0xff]  ;;  %v588_v12 = vmul.f32 %v3297_v58, %v3297_v58  ;;  %v589_v13 = vmul.f32 %v3300_v59, %v3300_v59  ;;  %v596_v21 = vadd.f32 %v595_v63, %v594_v49 }
  0x54   : > { %5718 = vst [vmem:[#allocation19_spill] sm:$0xff] %v3309_v6  ;;  %5719 = vst [vmem:[#allocation20_spill] sm:$0xff] %v3312_v7  ;;  %v590_v18 = vmul.f32 %v3309_v6, %v3309_v6  ;;  %v591_v19 = vmul.f32 %v3312_v7, %v3312_v7  ;;  %v605_v35 = vadd.f32 %v604_v14, %v603_v56 }
  0x55   : > { %v628_v52 = vadd.f32 %v577_v41, %v576_v40  ;;  %v637_v51 = vadd.f32 %v581_v53, %v580_v48  ;;  %v597_v57 = vrot.slane %v596_v21, 2  ;;  %v611_v50 = vadd.f32 %v610_v28, %v570_v26 }
  0x56   : > { %v646_v45 = vadd.f32 %v585_v61, %v584_v60  ;;  %v655_v58 = vadd.f32 %v589_v13, %v588_v12  ;;  %v606_v44 = vrot.slane %v605_v35, 2  ;;  %v620_v43 = vadd.f32 %v619_v42, %v574_v34 }
  0x57   : > { %v629_v59 = vadd.f32 %v628_v52, %v578_v46  ;;  %v638_v38 = vadd.f32 %v637_v51, %v582_v54  ;;  %v598_v37 = vadd.f32 %v597_v57, %v596_v21  ;;  %v612_v36 = vadd.f32 %v611_v50, %v571_v27 }
  0x58   : > { %v647_v6 = vadd.f32 %v646_v45, %v586_v62  ;;  %v656_v31 = vadd.f32 %v655_v58, %v590_v18  ;;  %v621_v30 = vadd.f32 %v620_v43, %v575_v39  ;;  %v607_v20 = vadd.f32 %v606_v44, %v605_v35 }
  0x59   : > { %v630_v7 = vadd.f32 %v629_v59, %v579_v47  ;;  %v639_v49 = vadd.f32 %v638_v38, %v583_v55  ;;  %v613_v25 = vrot.slane %v612_v36, 4  ;;  %v599_v48 = vrot.slane %v598_v37, 1 }
  0x5a   : > { %v648_v32 = vadd.f32 %v647_v6, %v587_v8  ;;  %v657_v33 = vadd.f32 %v656_v31, %v591_v19  ;;  %v622_v40 = vrot.slane %v621_v30, 4  ;;  %v608_v52 = vrot.slane %v607_v20, 1 }
  0x5b   : > { %v631_v41 = vrot.slane %v630_v7, 4  ;;  %v640_v26 = vrot.slane %v639_v49, 4  ;;  %v614_v53 = vadd.f32 %v613_v25, %v612_v36  ;;  %v3324_v38 = vadd.f32 %v599_v48, %v598_v37 }
  0x5c   : > { %v649_v56 = vrot.slane %v648_v32, 4  ;;  %v658_v34 = vrot.slane %v657_v33, 4  ;;  %v623_v46 = vadd.f32 %v622_v40, %v621_v30  ;;  %v3326_v55 = vadd.f32 %v608_v52, %v607_v20 }
  0x5d   : > { %v632_v51 = vadd.f32 %v631_v41, %v630_v7  ;;  %v615_v27 = vrot.slane %v614_v53, 2  ;;  %v641_v45 = vadd.f32 %v640_v26, %v639_v49  ;;  %v664_v58 = vadd.f32 1.0, %v3324_v38 }
  0x5e   : > { %v624_v50 = vrot.slane %v623_v46, 2  ;;  %v650_v43 = vadd.f32 %v649_v56, %v648_v32  ;;  %v659_v47 = vadd.f32 %v658_v34, %v657_v33  ;;  %v665_v62 = vadd.f32 1.0, %v3326_v55 }
  0x5f   : > { %v633_v39 = vrot.slane %v632_v51, 2  ;;  %v616_v44 = vadd.f32 %v615_v27, %v614_v53  ;;  %v642_v36 = vrot.slane %v641_v45, 2  ;;  %2738 = vrcp.f32 %v664_v58 }
  0x60   : > { %v625_v31 = vadd.f32 %v624_v50, %v623_v46  ;;  %v651_v59 = vrot.slane %v650_v43, 2  ;;  %v660_v61 = vrot.slane %v659_v47, 2  ;;  %2740 = vrsqrt.f32 %v3324_v38 }
  0x61   : > { %v634_v54 = vadd.f32 %v633_v39, %v632_v51  ;;  %v617_v57 = vrot.slane %v616_v44, 1  ;;  %v643_v37 = vadd.f32 %v642_v36, %v641_v45  ;;  %2742 = vrcp.f32 %v665_v62 }
  0x62   : > { %v626_v30 = vrot.slane %v625_v31, 1  ;;  %v652_v7 = vadd.f32 %v651_v59, %v650_v43  ;;  %v661_v12 = vadd.f32 %v660_v61, %v659_v47  ;;  %2744 = vrsqrt.f32 %v3326_v55 }
  0x63   : > { %v635_v60 = vrot.slane %v634_v54, 1  ;;  %v3330_v63 = vadd.f32 %v617_v57, %v616_v44  ;;  %v644_v18 = vrot.slane %v643_v37, 1  ;;  %vm722_vm0 = vcmp.eq.f32.partialorder %v3324_v38, inf }
  0x64   : > { %v3332_v6 = vadd.f32 %v626_v30, %v625_v31  ;;  %v653_v21 = vrot.slane %v652_v7, 1  ;;  %v662_v28 = vrot.slane %v661_v12, 1  ;;  %vm724_vm1 = vcmp.eq.f32.partialorder %v3324_v38, 0.0 }
  0x65   : > { %v3335_v8 = vadd.f32 %v635_v60, %v634_v54  ;;  %v666_v13 = vadd.f32 1.0, %v3330_v63  ;;  %v3341_v35 = vadd.f32 %v644_v18, %v643_v37  ;;  %v725_v33 = vand.u32 2147483648, %v3324_v38 }
  0x66   : > { %v667_v14 = vadd.f32 1.0, %v3332_v6  ;;  %v3343_v42 = vadd.f32 %v653_v21, %v652_v7  ;;  %v3348_v20 = vadd.f32 %v662_v28, %v661_v12  ;;  %vm729_vm2 = vcmp.eq.f32.partialorder %v3326_v55, inf }
  0x67   : > { %v668_v19 = vadd.f32 1.0, %v3335_v8  ;;  %2746 = vrcp.f32 %v666_v13  ;;  %v669_v32 = vadd.f32 1.0, %v3341_v35  ;;  %vm731_vm3 = vcmp.eq.f32.partialorder %v3326_v55, 0.0 }
  0x68   : > { %2748 = vrcp.f32 %v667_v14  ;;  %v670_v41 = vadd.f32 1.0, %v3343_v42  ;;  %v671_v26 = vadd.f32 1.0, %v3348_v20  ;;  %v732_v56 = vand.u32 2147483648, %v3326_v55 }
  0x69   : > { %2750 = vrcp.f32 %v668_v19  ;;  %v3346_v49 = vpop.eup %2738  ;;  %vm736_vm4 = vcmp.eq.f32.partialorder %v3330_v63, inf  ;;  %vm738_vm5 = vcmp.eq.f32.partialorder %v3330_v63, 0.0  ;;  %v739_v51 = vand.u32 2147483648, %v3330_v63 }
  0x6a   : > { %2752 = vrsqrt.f32 %v3330_v63  ;;  %v2741_v25 = vpop.eup %2740  ;;  %v680_v53 = vmul.f32 2.0, %v3346_v49  ;;  %vm743_vm6 = vcmp.eq.f32.partialorder %v3332_v6, inf  ;;  %vm745_vm7 = vcmp.eq.f32.partialorder %v3332_v6, 0.0 }
  0x6b   : > { %2754 = vrsqrt.f32 %v3332_v6  ;;  %v3356_v40 = vpop.eup %2742  ;;  %v721_v46 = vmul.f32 %v2741_v25, %v3324_v38  ;;  %v746_v45 = vand.u32 2147483648, %v3332_v6  ;;  %vm750_vm8 = vcmp.eq.f32.partialorder %v3335_v8, inf }
  0x6c   : > { %2756 = vrsqrt.f32 %v3335_v8  ;;  %v2745_v48 = vpop.eup %2744  ;;  %v681_v34 = vmul.f32 2.0, %v3356_v40  ;;  %v3382_v39 = vmul.f32 %v680_v53, %v3165_v0  ;;  %v3385_v43 = vmul.f32 %v680_v53, %v3168_v1 }
  0x6d   : > { %2758 = vrsqrt.f32 %v3341_v35  ;;  %v728_v27 = vmul.f32 %v2745_v48, %v3326_v55  ;;  %vm752_vm9 = vcmp.eq.f32.partialorder %v3335_v8, 0.0  ;;  %v753_v44 = vand.u32 2147483648, %v3335_v8 }
  0x6e   : > { %2760 = vrsqrt.f32 %v3343_v42  ;;  %v3392_v31 = vmul.f32 %v680_v53, %v3171_v2  ;;  %v3395_v54 = vmul.f32 %v680_v53, %v3174_v3  ;;  %v3398_v57 = vmul.f32 %v681_v34, %v3177_v4 }
  0x6f   : > { %2762 = vrsqrt.f32 %v3348_v20  ;;  %v723_v0 = vsel %vm722_vm0, %v3324_v38, %v721_v46  ;;  %v3404_v36 = vmul.f32 %v681_v34, %v3180_v5  ;;  %v3407_v58 = vmul.f32 %v681_v34, %v3189_v9 }
  0x70   : > { %2764 = vrcp.f32 %v669_v32  ;;  %v3410_v2 = vmul.f32 %v681_v34, %v3192_v10  ;;  %vm757_vm10 = vcmp.eq.f32.partialorder %v3341_v35, inf  ;;  %v730_v4 = vsel %vm729_vm2, %v3326_v55, %v728_v27 }
  0x71   : > { %v3373_v52 = vpop.eup %2746  ;;  %2766 = vrcp.f32 %v670_v41  ;;  %vm759_vm11 = vcmp.eq.f32.partialorder %v3341_v35, 0.0  ;;  %v760_v30 = vand.u32 2147483648, %v3341_v35  ;;  %vm764_vm12 = vcmp.eq.f32.partialorder %v3343_v42, inf }
  0x72   : > { %v3379_v50 = vpop.eup %2748  ;;  %2768 = vrcp.f32 %v671_v26  ;;  %v682_v9 = vmul.f32 2.0, %v3373_v52  ;;  %v726_v10 = vsel %vm724_vm1, %v725_v33, %v723_v0  ;;  %vm766_vm13 = vcmp.eq.f32.partialorder %v3343_v42, 0.0 }
  0x73   : > { %v3389_v47 = vpop.eup %2750  ;;  %v767_v59 = vand.u32 2147483648, %v3343_v42  ;;  %vm771_vm14 = vcmp.eq.f32.partialorder %v3348_v20, inf  ;;  %v683_v12 = vmul.f32 2.0, %v3379_v50  ;;  %v733_v38 = vsel %vm731_vm3, %v732_v56, %v730_v4 }
  0x74   : > { %v2753_v1 = vpop.eup %2752  ;;  %vm773_vm15 = vcmp.eq.f32.partialorder %v3348_v20, 0.0  ;;  %v774_v28 = vand.u32 2147483648, %v3348_v20  ;;  %v684_v55 = vmul.f32 2.0, %v3389_v47  ;;  %v3443_v32 = vmul.f32 %v682_v9, %v3195_v11 }
  0x75   : > { %v2755_v3 = vpop.eup %2754  ;;  %v735_v61 = vmul.f32 %v2753_v1, %v3330_v63  ;;  %v3446_v33 = vmul.f32 %v682_v9, %v3204_v15  ;;  %v3452_v48 = vmul.f32 %v682_v9, %v3207_v16  ;;  %v776_v16 = vmul.f32 2.0, %v726_v10 }
  0x76   : > { %v2757_v5 = vpop.eup %2756  ;;  %v742_v62 = vmul.f32 %v2755_v3, %v3332_v6  ;;  %v3466_v0 = vmul.f32 %v682_v9, %v3210_v17  ;;  %v777_v1 = vmul.f32 2.0, %v733_v38  ;;  %v3474_v3 = vmul.f32 %v683_v12, %v3219_v22 }
  0x77   : > { %v2759_v60 = vpop.eup %2758  ;;  %v749_v37 = vmul.f32 %v2757_v5, %v3335_v8  ;;  %v737_v18 = vsel %vm736_vm4, %v3330_v63, %v735_v61  ;;  %v3482_v5 = vmul.f32 %v683_v12, %v3225_v24  ;;  %v3487_v9 = vmul.f32 %v683_v12, %v3234_v29  ;;  %v5723_v29 = vld [vmem:[#allocation7_spill] sm:$0xff] }
  0x78   : > { %v2761_v7 = vpop.eup %2760  ;;  %v756_v13 = vmul.f32 %v2759_v60, %v3341_v35  ;;  %v744_v19 = vsel %vm743_vm6, %v3332_v6, %v742_v62  ;;  %v740_v53 = vsel %vm738_vm5, %v739_v51, %v737_v18  ;;  %v3477_v6 = vmul.f32 %v683_v12, %v3222_v23  ;;  %v5727_v12 = vld [vmem:[#allocation9_spill] sm:$0xff] }
  0x79   : > { %v2763_v14 = vpop.eup %2762  ;;  %v763_v21 = vmul.f32 %v2761_v7, %v3343_v42  ;;  %v751_v41 = vsel %vm750_vm8, %v3335_v8, %v749_v37  ;;  %v747_v46 = vsel %vm745_vm7, %v746_v45, %v744_v19  ;;  %v778_v4 = vmul.f32 2.0, %v740_v53  ;;  %v5731_v19 = vld [vmem:[#allocation11_spill] sm:$0xff]  ;;  %v5735_v53 = vld [vmem:[#allocation13_spill] sm:$0xff] }
  0x7a   : > { %v2765_v25 = vpop.eup %2764  ;;  %v758_v56 = vsel %vm757_vm10, %v3341_v35, %v756_v13  ;;  %v770_v11 = vmul.f32 %v2763_v14, %v3348_v20  ;;  %v754_v63 = vsel %vm752_vm9, %v753_v44, %v751_v41  ;;  %v779_v44 = vmul.f32 2.0, %v747_v46  ;;  %v5729_v14 = vld [vmem:[#allocation10_spill] sm:$0xff] }
  0x7b   : > { %v2767_v26 = vpop.eup %2766  ;;  %v685_v15 = vmul.f32 2.0, %v2765_v25  ;;  %v765_v27 = vsel %vm764_vm12, %v3343_v42, %v763_v21  ;;  %v761_v45 = vsel %vm759_vm11, %v760_v30, %v758_v56  ;;  %v780_v23 = vmul.f32 2.0, %v754_v63  ;;  %v5720_v30 = vld [vmem:[#allocation5_spill] sm:$0xff]  ;;  %v5721_v42 = vld [vmem:[#allocation6_spill] sm:$0xff] }
  0x7c   : > { %v2769_v34 = vpop.eup %2768  ;;  %v772_v51 = vsel %vm771_vm14, %v3348_v20, %v770_v11  ;;  %v686_v17 = vmul.f32 2.0, %v2767_v26  ;;  %v768_v8 = vsel %vm766_vm13, %v767_v59, %v765_v27  ;;  %v3492_v10 = vmul.f32 %v3346_v49, %v776_v16  ;;  %v5725_v49 = vld [vmem:[#allocation8_spill] sm:$0xff]  ;;  %v5737_v46 = vld [vmem:[#allocation14_spill] sm:$0xff]  ;;  %v5739_v16 = vld [vmem:[#allocation15_spill] sm:$0xff] }
  0x7d   : > { %v775_v22 = vsel %vm773_vm15, %v774_v28, %v772_v51  ;;  %v687_v35 = vmul.f32 2.0, %v2769_v34  ;;  %v3495_v60 = vmul.f32 %v684_v55, %v5720_v30  ;;  %v781_v24 = vmul.f32 2.0, %v761_v45  ;;  %v5744_v45 = vld [vmem:[#allocation17_spill] sm:$0xff] }
  0x7e   : > { %v3498_v61 = vmul.f32 %v3356_v40, %v777_v1  ;;  %v3501_v59 = vmul.f32 %v684_v55, %v5721_v42  ;;  %v3504_v62 = vmul.f32 %v684_v55, %v5723_v29  ;;  %v782_v20 = vmul.f32 2.0, %v768_v8  ;;  %v3578_v29 = vld [vmem:[%s3547_s21 + $0x20] sm:$0xff] }
  0x7f   : > { %v3507_v37 = vmul.f32 %v3373_v52, %v778_v4  ;;  %v3510_v7 = vmul.f32 %v684_v55, %v5725_v49  ;;  %v3513_v38 = vmul.f32 %v685_v15, %v5727_v12  ;;  %v783_v13 = vmul.f32 2.0, %v775_v22  ;;  %v5733_v55 = vld [vmem:[#allocation12_spill] sm:$0xff]  ;;  %v3565_v22 = vld [vmem:[%s3547_s21 + $0x10] sm:$0xff]  ;;  %5753 = vst [vmem:[#allocation24_spill] sm:$0xff] %v3578_v29 }
  0x80   : > { %5722 = vst [vmem:[#allocation5_spill] sm:$0xff] %v3501_v59  ;;  %5724 = vst [vmem:[#allocation6_spill] sm:$0xff] %v3504_v62  ;;  %v3516_v40 = vmul.f32 %v3379_v50, %v779_v44  ;;  %v3519_v18 = vmul.f32 %v685_v15, %v5729_v14  ;;  %v3522_v21 = vmul.f32 %v685_v15, %v5731_v19  ;;  %v800_v28 = vadd.f32 1e-15, %v3492_v10  ;;  %v3562_v44 = vld [vmem:[%s3547_s21 + $0x8] sm:$0xff]  ;;  %v5755_v49 = vld [vmem:[#allocation20_spill] sm:$0xff] }
  0x81   : > { %5726 = vst [vmem:[#allocation7_spill] sm:$0xff] %v3510_v7  ;;  %5728 = vst [vmem:[#allocation8_spill] sm:$0xff] %v3513_v38  ;;  %v3525_v52 = vmul.f32 %v3389_v47, %v780_v23  ;;  %v3529_v41 = vmul.f32 %v685_v15, %v5733_v55  ;;  %v3532_v56 = vmul.f32 %v686_v17, %v5735_v53  ;;  %v801_v50 = vadd.f32 1e-15, %v3498_v61  ;;  %v5742_v15 = vld [vmem:[#allocation16_spill] sm:$0xff]  ;;  %v5748_v23 = vld [vmem:[#allocation18_spill] sm:$0xff] }
  0x82   : > { %5730 = vst [vmem:[#allocation9_spill] sm:$0xff] %v3519_v18  ;;  %5732 = vst [vmem:[#allocation10_spill] sm:$0xff] %v3522_v21  ;;  %v3534_v11 = vmul.f32 %v2765_v25, %v781_v24  ;;  %v3538_v27 = vmul.f32 %v686_v17, %v5737_v46  ;;  %v3541_v63 = vmul.f32 %v686_v17, %v5739_v16  ;;  %v802_v51 = vadd.f32 1e-15, %v3507_v37  ;;  %v3550_v25 = vld [vmem:[%s3547_s21] sm:$0xff]  ;;  %v5750_v24 = vld [vmem:[#allocation19_spill] sm:$0xff] }
  0x83   : > { %5734 = vst [vmem:[#allocation11_spill] sm:$0xff] %v3529_v41  ;;  %5736 = vst [vmem:[#allocation12_spill] sm:$0xff] %v3532_v56  ;;  %v3543_v47 = vmul.f32 %v2767_v26, %v782_v20  ;;  %v3553_v1 = vmul.f32 %v686_v17, %v5742_v15  ;;  %v3556_v4 = vmul.f32 %v687_v35, %v5744_v45  ;;  %v803_v8 = vadd.f32 1e-15, %v3516_v40  ;;  %v3581_v20 = vld [vmem:[%s3547_s21 + $0x28] sm:$0xff]  ;;  %v3588_v14 = vld [vmem:[%s3547_s21 + $0x30] sm:$0xff] }
  0x84   : > { %5738 = vst [vmem:[#allocation13_spill] sm:$0xff] %v3538_v27  ;;  %5740 = vst [vmem:[#allocation14_spill] sm:$0xff] %v3541_v63  ;;  %v3558_v26 = vmul.f32 %v2769_v34, %v783_v13  ;;  %v3568_v30 = vmul.f32 %v687_v35, %v5748_v23  ;;  %v3571_v17 = vmul.f32 %v687_v35, %v5750_v24  ;;  %v804_v42 = vadd.f32 1e-15, %v3525_v52  ;;  %v3575_v34 = vld [vmem:[%s3547_s21 + $0x18] sm:$0xff]  ;;  %v3603_v46 = vld [vmem:[%s3547_s21 + $0x50] sm:$0xff] }
  0x85   : > { %5741 = vst [vmem:[#allocation15_spill] sm:$0xff] %v3550_v25  ;;  %5743 = vst [vmem:[#allocation16_spill] sm:$0xff] %v3553_v1  ;;  %2770 = vrcp.f32 %v800_v28  ;;  %v3584_v12 = vmul.f32 %v687_v35, %v5755_v49  ;;  %v805_v13 = vadd.f32 1e-15, %v3534_v11  ;;  %v3591_v19 = vld [vmem:[%s3547_s21 + $0x38] sm:$0xff]  ;;  %v3594_v28 = vld [vmem:[%s3547_s21 + $0x40] sm:$0xff]  ;;  %v1067_v55 = vmul.f32 %v3550_v25, %v3550_v25 }
  0x86   : > { %5745 = vst [vmem:[#allocation17_spill] sm:$0xff] %v3556_v4  ;;  %5746 = vst [vmem:[#allocation21_spill] sm:$0xff] %v3562_v44  ;;  %2772 = vrcp.f32 %v801_v50  ;;  %v806_v53 = vadd.f32 1e-15, %v3543_v47  ;;  %v3600_v35 = vld [vmem:[%s3547_s21 + $0x48] sm:$0xff]  ;;  %v3606_v50 = vld [vmem:[%s3547_s21 + $0x58] sm:$0xff]  ;;  %v1068_v16 = vmul.f32 %v3562_v44, %v3562_v44  ;;  %v3612_v15 = vmul.f32 %v3565_v22, %v3565_v22 }
  0x87   : > { %5747 = vst [vmem:[#allocation22_spill] sm:$0xff] %v3565_v22  ;;  %5749 = vst [vmem:[#allocation18_spill] sm:$0xff] %v3568_v30  ;;  %2774 = vrcp.f32 %v802_v51  ;;  %v807_v45 = vadd.f32 1e-15, %v3558_v26  ;;  %v3616_v51 = vld [vmem:[%s3547_s21 + $0x60] sm:$0xff]  ;;  %v3619_v23 = vld [vmem:[%s3547_s21 + $0x68] sm:$0xff]  ;;  %v3626_v49 = vmul.f32 %v3575_v34, %v3575_v34  ;;  %v1071_v22 = vmul.f32 %v3578_v29, %v3578_v29 }
  0x88   : > { %5751 = vst [vmem:[#allocation19_spill] sm:$0xff] %v3571_v17  ;;  %5752 = vst [vmem:[#allocation23_spill] sm:$0xff] %v3575_v34  ;;  %2776 = vrcp.f32 %v803_v8  ;;  %v3622_v24 = vld [vmem:[%s3547_s21 + $0x70] sm:$0xff]  ;;  %v3631_v44 = vld [vmem:[%s3547_s21 + $0x78] sm:$0xff]  ;;  %v1073_v17 = vmul.f32 %v3588_v14, %v3588_v14  ;;  %v3645_v34 = vmul.f32 %v3591_v19, %v3591_v19  ;;  %v3670_v30 = vmul.f32 %v3606_v50, %v3606_v50 }
  0x89   : > { %5754 = vst [vmem:[#allocation25_spill] sm:$0xff] %v3581_v20  ;;  %5756 = vst [vmem:[#allocation20_spill] sm:$0xff] %v3584_v12  ;;  %2778 = vrcp.f32 %v804_v42  ;;  %v3634_v8 = vld [vmem:[%s3547_s21 + $0x80] sm:$0xff]  ;;  %v3637_v25 = vld [vmem:[%s3547_s21 + $0x88] sm:$0xff]  ;;  %v1072_v12 = vmul.f32 %v3581_v20, %v3581_v20  ;;  %v1075_v20 = vmul.f32 %v3594_v28, %v3594_v28  ;;  %v3702_v63 = vmul.f32 %v3631_v44, %v3631_v44 }
  0x8a   : > { %5757 = vst [vmem:[#allocation26_spill] sm:$0xff] %v3588_v14  ;;  %5758 = vst [vmem:[#allocation27_spill] sm:$0xff] %v3591_v19  ;;  %2780 = vrcp.f32 %v805_v13  ;;  %v3648_v42 = vld [vmem:[%s3547_s21 + $0x90] sm:$0xff]  ;;  %v3651_v29 = vld [vmem:[%s3547_s21 + $0x98] sm:$0xff]  ;;  %v1076_v14 = vmul.f32 %v3600_v35, %v3600_v35  ;;  %v1077_v19 = vmul.f32 %v3603_v46, %v3603_v46  ;;  %vm792_vm0 = vcmp.gt.f32.partialorder %v3492_v10, 0.996 }
  0x8b   : > { %5759 = vst [vmem:[#allocation28_spill] sm:$0xff] %v3594_v28  ;;  %5760 = vst [vmem:[#allocation29_spill] sm:$0xff] %v3600_v35  ;;  %2782 = vrcp.f32 %v806_v53  ;;  %v3663_v13 = vld [vmem:[%s3547_s21 + $0xa8] sm:$0xff]  ;;  %v1079_v28 = vmul.f32 %v3616_v51, %v3616_v51  ;;  %v1080_v35 = vmul.f32 %v3619_v23, %v3619_v23  ;;  %v3680_v53 = vld [vmem:[%s3547_s21 + $0xc0] sm:$0xff]  ;;  %v1085_v27 = vmul.f32 %v3648_v42, %v3648_v42 }
  0x8c   : > { %5761 = vst [vmem:[#allocation30_spill] sm:$0xff] %v3603_v46  ;;  %5762 = vst [vmem:[#allocation31_spill] sm:$0xff] %v3606_v50  ;;  %2784 = vrcp.f32 %v807_v45  ;;  %v3677_v46 = vld [vmem:[%s3547_s21 + $0xb8] sm:$0xff]  ;;  %v3683_v4 = vld [vmem:[%s3547_s21 + $0xc8] sm:$0xff]  ;;  %v1081_v50 = vmul.f32 %v3622_v24, %v3622_v24  ;;  %v1108_v21 = vadd.f32 %v1072_v12, %v1071_v22  ;;  %v1117_v18 = vadd.f32 %v1076_v14, %v1075_v20 }
  0x8d   : > { %5763 = vst [vmem:[#allocation32_spill] sm:$0xff] %v3616_v51  ;;  %5764 = vst [vmem:[#allocation33_spill] sm:$0xff] %v3619_v23  ;;  %v1084_v51 = vmul.f32 %v3637_v25, %v3637_v25  ;;  %v3692_v1 = vld [vmem:[%s3547_s21 + $0xd0] sm:$0xff]  ;;  %v3695_v23 = vld [vmem:[%s3547_s21 + $0xd8] sm:$0xff]  ;;  %v1126_v38 = vadd.f32 %v1080_v35, %v1079_v28  ;;  %v3733_v62 = vmul.f32 %v3677_v46, %v3677_v46  ;;  %vm793_vm1 = vcmp.gt.f32.partialorder %v3498_v61, 0.996 }
  0x8e   : > { %5765 = vst [vmem:[#allocation34_spill] sm:$0xff] %v3622_v24  ;;  %5766 = vst [vmem:[#allocation35_spill] sm:$0xff] %v3626_v49  ;;  %v3654_v49 = vld [vmem:[%s3547_s21 + $0xa0] sm:$0xff]  ;;  %v3708_v24 = vmul.f32 %v3651_v29, %v3651_v29  ;;  %v3716_v56 = vld [vmem:[%s3547_s21 + $0xf0] sm:$0xff]  ;;  %v3741_v22 = vmul.f32 %v3695_v23, %v3695_v23  ;;  %vm794_vm2 = vcmp.gt.f32.partialorder %v3507_v37, 0.996 }
  0x8f   : > { %5767 = vst [vmem:[#allocation36_spill] sm:$0xff] %v3631_v44  ;;  %5768 = vst [vmem:[#allocation37_spill] sm:$0xff] %v3634_v8  ;;  %v3698_v45 = vld [vmem:[%s3547_s21 + $0xe0] sm:$0xff]  ;;  %v3719_v41 = vld [vmem:[%s3547_s21 + $0xf8] sm:$0xff]  ;;  %v1088_v44 = vmul.f32 %v3663_v13, %v3663_v13  ;;  %v3753_v14 = vmul.f32 %v3716_v56, %v3716_v56  ;;  %vm795_vm3 = vcmp.gt.f32.partialorder %v3516_v40, 0.996 }
  0x90   : > { %5769 = vst [vmem:[#allocation38_spill] sm:$0xff] %v3637_v25  ;;  %5770 = vst [vmem:[#allocation39_spill] sm:$0xff] %v3645_v34  ;;  %v3666_v34 = vld [vmem:[%s3547_s21 + $0xb0] sm:$0xff]  ;;  %v1087_v25 = vmul.f32 %v3654_v49, %v3654_v49  ;;  %v3757_v28 = vmul.f32 %v3719_v41, %v3719_v41  ;;  %vm796_vm4 = vcmp.gt.f32.partialorder %v3525_v52, 0.996 }
  0x91   : > { %5771 = vst [vmem:[#allocation40_spill] sm:$0xff] %v3648_v42  ;;  %5772 = vst [vmem:[#allocation41_spill] sm:$0xff] %v3651_v29  ;;  %v1099_v42 = vadd.f32 %v1068_v16, %v1067_v55  ;;  %v2771_v29 = vpop.eup %2770  ;;  %v3745_v16 = vmul.f32 %v3698_v45, %v3698_v45  ;;  %vm797_vm5 = vcmp.gt.f32.partialorder %v3534_v11, 0.996  ;;  %vm798_vm6 = vcmp.gt.f32.partialorder %v3543_v47, 0.996 }
  0x92   : > { %5773 = vst [vmem:[#allocation42_spill] sm:$0xff] %v3654_v49  ;;  %5774 = vst [vmem:[#allocation43_spill] sm:$0xff] %v3663_v13  ;;  %v1092_v49 = vmul.f32 %v3683_v4, %v3683_v4  ;;  %v2773_v7 = vpop.eup %2772  ;;  %vm799_vm7 = vcmp.gt.f32.partialorder %v3558_v26, 0.996 }
  0x93   : > { %5775 = vst [vmem:[#allocation44_spill] sm:$0xff] %v3666_v34  ;;  %5776 = vst [vmem:[#allocation45_spill] sm:$0xff] %v3670_v30  ;;  %v1083_v30 = vmul.f32 %v3634_v8, %v3634_v8  ;;  %v3713_v8 = vld [vmem:[%s3547_s21 + $0xe8] sm:$0xff]  ;;  %v2775_v55 = vpop.eup %2774 }
  0x94   : > { %5777 = vst [vmem:[#allocation46_spill] sm:$0xff] %v3677_v46  ;;  %5778 = vst [vmem:[#allocation47_spill] sm:$0xff] %v3680_v53  ;;  %v3749_v20 = vmul.f32 %v3713_v8, %v3713_v8  ;;  %v2777_v35 = vpop.eup %2776 }
  0x95   : > { %5779 = vst [vmem:[#allocation48_spill] sm:$0xff] %v3683_v4  ;;  %5780 = vst [vmem:[#allocation49_spill] sm:$0xff] %v3692_v1  ;;  %v1135_v12 = vadd.f32 %v1084_v51, %v1083_v30  ;;  %v3762_v30 = vadd.f32 %v1099_v42, %v3612_v15  ;;  %v3764_v51 = vadd.f32 %v1108_v21, %v1073_v17 }
  0x96   : > { %5781 = vst [vmem:[#allocation50_spill] sm:$0xff] %v3695_v23  ;;  %5782 = vst [vmem:[#allocation51_spill] sm:$0xff] %v3698_v45  ;;  %v3759_v23 = vmul.f32 0.996, %v2771_v29  ;;  %v3766_v45 = vadd.f32 %v1088_v44, %v1087_v25  ;;  %v3768_v4 = vadd.f32 %v1117_v18, %v1077_v19  ;;  %v813_v29 = vmul.f32 0.996, %v2775_v55 }
  0x97   : > { %5783 = vst [vmem:[#allocation52_spill] sm:$0xff] %v3702_v63  ;;  %5784 = vst [vmem:[#allocation53_spill] sm:$0xff] %v3708_v24  ;;  %v3725_v63 = vmul.f32 %v3666_v34, %v3666_v34  ;;  %v1091_v24 = vmul.f32 %v3680_v53, %v3680_v53  ;;  %v3737_v34 = vmul.f32 %v3692_v1, %v3692_v1  ;;  %v811_v1 = vmul.f32 0.996, %v2773_v7 }
  0x98   : > { %5785 = vst [vmem:[#allocation54_spill] sm:$0xff] %v3713_v8  ;;  %5786 = vst [vmem:[#allocation55_spill] sm:$0xff] %v3716_v56  ;;  %v2779_v8 = vpop.eup %2778  ;;  %v3770_v56 = vadd.f32 %v1126_v38, %v1081_v50  ;;  %v824_v15 = vmul.f32 %v3759_v23, %v3382_v39  ;;  %v825_v21 = vmul.f32 %v3759_v23, %v3385_v43  ;;  %v815_v7 = vmul.f32 0.996, %v2777_v35 }
  0x99   : > { %5787 = vst [vmem:[#allocation56_spill] sm:$0xff] %v3719_v41  ;;  %5788 = vst [vmem:[#allocation57_spill] sm:$0xff] %v3725_v63  ;;  %v3772_v53 = vadd.f32 %v1092_v49, %v1091_v24  ;;  %v2781_v41 = vpop.eup %2780  ;;  %v3779_v25 = vadd.f32 %v1135_v12, %v1085_v27  ;;  %v826_v38 = vmul.f32 %v3759_v23, %v3392_v31  ;;  %v817_v50 = vmul.f32 0.996, %v2779_v8 }
  0x9a   : > { %5789 = vst [vmem:[#allocation58_spill] sm:$0xff] %v3733_v62  ;;  %5790 = vst [vmem:[#allocation59_spill] sm:$0xff] %v3737_v34  ;;  %v2783_v44 = vpop.eup %2782  ;;  %v827_v18 = vmul.f32 %v3759_v23, %v3395_v54  ;;  %v828_v17 = vmul.f32 %v811_v1, %v3398_v57  ;;  %v829_v24 = vmul.f32 %v811_v1, %v3404_v36  ;;  %v819_v42 = vmul.f32 0.996, %v2781_v41  ;;  %v5806_v34 = vld [vmem:[#allocation7_spill] sm:$0xff] }
  0x9b   : > { %5791 = vst [vmem:[#allocation60_spill] sm:$0xff] %v3741_v22  ;;  %5792 = vst [vmem:[#allocation61_spill] sm:$0xff] %v3745_v16  ;;  %v2785_v19 = vpop.eup %2784  ;;  %v830_v49 = vmul.f32 %v811_v1, %v3407_v58  ;;  %v3790_v27 = vmul.f32 %v811_v1, %v3410_v2  ;;  %v832_v12 = vmul.f32 %v813_v29, %v3443_v32  ;;  %v821_v35 = vmul.f32 0.996, %v2783_v44  ;;  %v5804_v44 = vld [vmem:[#allocation6_spill] sm:$0xff] }
  0x9c   : > { %5793 = vst [vmem:[#allocation62_spill] sm:$0xff] %v3749_v20  ;;  %5794 = vst [vmem:[#allocation63_spill] sm:$0xff] %v3753_v14  ;;  %v833_v8 = vmul.f32 %v813_v29, %v3446_v33  ;;  %v834_v55 = vmul.f32 %v813_v29, %v3452_v48  ;;  %v835_v46 = vmul.f32 %v813_v29, %v3466_v0  ;;  %v823_v14 = vmul.f32 0.996, %v2785_v19 }
  0x9d   : > { %5795 = vst [vmem:[#allocation64_spill] sm:$0xff] %v3757_v28  ;;  %5796 = vst [vmem:[#allocation65_spill] sm:$0xff] %v3764_v51  ;;  %v836_v13 = vmul.f32 %v815_v7, %v3474_v3  ;;  %v3804_v28 = vmul.f32 %v815_v7, %v3477_v6  ;;  %v3807_v41 = vmul.f32 %v815_v7, %v3482_v5  ;;  %v5814_v51 = vld [vmem:[#allocation11_spill] sm:$0xff] }
  0x9e   : > { %5797 = vst [vmem:[#allocation66_spill] sm:$0xff] %v3766_v45  ;;  %5798 = vst [vmem:[#allocation67_spill] sm:$0xff] %v3768_v4  ;;  %v3810_v22 = vmul.f32 %v815_v7, %v3487_v9  ;;  %v3813_v20 = vmul.f32 %v817_v50, %v3495_v60  ;;  %v3816_v16 = vmul.f32 %v817_v50, %v3501_v59  ;;  %v5810_v45 = vld [vmem:[#allocation9_spill] sm:$0xff]  ;;  %v5816_v59 = vld [vmem:[#allocation12_spill] sm:$0xff] }
  0x9f   : > { %5799 = vst [vmem:[#allocation68_spill] sm:$0xff] %v3770_v56  ;;  %5800 = vst [vmem:[#allocation69_spill] sm:$0xff] %v3772_v53  ;;  %v3819_v53 = vmul.f32 %v817_v50, %v5804_v44  ;;  %v3822_v62 = vmul.f32 %v817_v50, %v5806_v34  ;;  %v3828_v63 = vmul.f32 %v819_v42, %v5810_v45  ;;  %v5812_v56 = vld [vmem:[#allocation10_spill] sm:$0xff]  ;;  %v5818_v44 = vld [vmem:[#allocation13_spill] sm:$0xff] }
  0xa0   : > { %5801 = vst [vmem:[#allocation70_spill] sm:$0xff] %v3779_v25  ;;  %5802 = vst [vmem:[#allocation71_spill] sm:$0xff] %v3813_v20  ;;  %v5808_v25 = vld [vmem:[#allocation8_spill] sm:$0xff]  ;;  %v3831_v4 = vmul.f32 %v819_v42, %v5812_v56  ;;  %v3834_v20 = vmul.f32 %v819_v42, %v5814_v51  ;;  %v5819_v34 = vld [vmem:[#allocation14_spill] sm:$0xff] }
  0xa1   : > { %5803 = vst [vmem:[#allocation72_spill] sm:$0xff] %v3816_v16  ;;  %5805 = vst [vmem:[#allocation73_spill] sm:$0xff] %v3819_v53  ;;  %v3825_v19 = vmul.f32 %v819_v42, %v5808_v25  ;;  %v3837_v16 = vmul.f32 %v821_v35, %v5816_v59  ;;  %v3840_v53 = vmul.f32 %v821_v35, %v5818_v44  ;;  %v5820_v25 = vld [vmem:[#allocation16_spill] sm:$0xff]  ;;  %v5822_v45 = vld [vmem:[#allocation17_spill] sm:$0xff] }
  0xa2   : > { %5807 = vst [vmem:[#allocation74_spill] sm:$0xff] %v3822_v62  ;;  %5811 = vst [vmem:[#allocation76_spill] sm:$0xff] %v3828_v63  ;;  %v3843_v62 = vmul.f32 %v821_v35, %v5819_v34  ;;  %v3849_v63 = vmul.f32 %v823_v14, %v5822_v45  ;;  %v5823_v56 = vld [vmem:[#allocation18_spill] sm:$0xff]  ;;  %v5825_v51 = vld [vmem:[#allocation19_spill] sm:$0xff]  ;;  %v3863_v34 = vsel %vm792_vm0, %v824_v15, %v3382_v39 }
  0xa3   : > { %5809 = vst [vmem:[#allocation75_spill] sm:$0xff] %v3825_v19  ;;  %5813 = vst [vmem:[#allocation77_spill] sm:$0xff] %v3831_v4  ;;  %v3846_v19 = vmul.f32 %v821_v35, %v5820_v25  ;;  %v3852_v4 = vmul.f32 %v823_v14, %v5823_v56  ;;  %v5826_v59 = vld [vmem:[#allocation20_spill] sm:$0xff]  ;;  %v3883_v39 = vsel %vm793_vm1, %v828_v17, %v3398_v57 }
  0xa4   : > { %5815 = vst [vmem:[#allocation78_spill] sm:$0xff] %v3834_v20  ;;  %5817 = vst [vmem:[#allocation79_spill] sm:$0xff] %v3837_v16  ;;  %v3855_v20 = vmul.f32 %v823_v14, %v5825_v51  ;;  %v3858_v16 = vmul.f32 %v823_v14, %v5826_v59  ;;  %v3878_v59 = vsel %vm792_vm0, %v827_v18, %v3395_v54 }
  0xa5   : > { %5821 = vst [vmem:[#allocation13_spill] sm:$0xff] %v3846_v19  ;;  %5824 = vst [vmem:[#allocation16_spill] sm:$0xff] %v3852_v4  ;;  %v3868_v19 = vsel %vm792_vm0, %v825_v21, %v3385_v43  ;;  %v3873_v4 = vsel %vm792_vm0, %v826_v38, %v3392_v31  ;;  %v3888_v43 = vsel %vm793_vm1, %v829_v24, %v3404_v36 }
  0xa6   : > { %v3893_v31 = vsel %vm793_vm1, %v830_v49, %v3407_v58  ;;  %v904_v15 = vmul.f32 %v3759_v23, %v3492_v10  ;;  %v905_v54 = vmul.f32 %v811_v1, %v3498_v61  ;;  %v906_v21 = vmul.f32 %v813_v29, %v3507_v37 }
  0xa7   : > { %v907_v57 = vmul.f32 %v815_v7, %v3516_v40  ;;  %v908_v38 = vmul.f32 %v817_v50, %v3525_v52  ;;  %v909_v18 = vmul.f32 %v819_v42, %v3534_v11  ;;  %v910_v36 = vmul.f32 %v821_v35, %v3543_v47 }
  0xa8   : > { %v911_v17 = vmul.f32 %v823_v14, %v3558_v26  ;;  %v3907_v58 = vsel %vm792_vm0, %v904_v15, %v3492_v10  ;;  %v3912_v1 = vsel %vm793_vm1, %v905_v54, %v3498_v61  ;;  %v3917_v23 = vsel %vm794_vm2, %v906_v21, %v3507_v37 }
  0xa9   : > { %v3922_v29 = vsel %vm795_vm3, %v907_v57, %v3516_v40  ;;  %v3927_v10 = vsel %vm796_vm4, %v908_v38, %v3525_v52  ;;  %v3932_v14 = vsel %vm797_vm5, %v909_v18, %v3534_v11  ;;  %v3937_v7 = vsel %vm798_vm6, %v910_v36, %v3543_v47  ;;  %v5837_v40 = vld [vmem:[#allocation7_spill] sm:$0xff] }
  0xaa   : > { %v3942_v50 = vsel %vm799_vm7, %v911_v17, %v3558_v26  ;;  %v920_v24 = vmul.f32 %v3907_v58, %v3907_v58  ;;  %v921_v49 = vmul.f32 %v3912_v1, %v3912_v1  ;;  %v922_v42 = vmul.f32 %v3917_v23, %v3917_v23  ;;  %v5846_v52 = vld [vmem:[#allocation75_spill] sm:$0xff] }
  0xab   : > { %v923_v35 = vmul.f32 %v3922_v29, %v3922_v29  ;;  %v924_v15 = vmul.f32 %v3927_v10, %v3927_v10  ;;  %v925_v54 = vmul.f32 %v3932_v14, %v3932_v14  ;;  %v3960_v21 = vsel %vm793_vm1, %v3790_v27, %v3410_v2 }
  0xac   : > { %v3965_v57 = vsel %vm794_vm2, %v832_v12, %v3443_v32  ;;  %v928_v38 = vsub.f32 1.0, %v920_v24  ;;  %v929_v18 = vsub.f32 1.0, %v921_v49  ;;  %v3970_v36 = vsel %vm794_vm2, %v833_v8, %v3446_v33  ;;  %v5827_v24 = vld [vmem:[#allocation35_spill] sm:$0xff] }
  0xad   : > { %v3975_v17 = vsel %vm794_vm2, %v834_v55, %v3452_v48  ;;  %v926_v2 = vmul.f32 %v3937_v7, %v3937_v7  ;;  %v930_v61 = vsub.f32 1.0, %v922_v42  ;;  %v3982_v32 = vsel %vm794_vm2, %v835_v46, %v3466_v0 }
  0xae   : > { %v3987_v27 = vsel %vm795_vm3, %v836_v13, %v3474_v3  ;;  %v927_v33 = vmul.f32 %v3942_v50, %v3942_v50  ;;  %v931_v12 = vsub.f32 1.0, %v923_v35  ;;  %v932_v48 = vsub.f32 1.0, %v924_v15  ;;  %v5829_v13 = vld [vmem:[#allocation71_spill] sm:$0xff]  ;;  %v5834_v35 = vld [vmem:[#allocation6_spill] sm:$0xff]  ;;  %v5835_v15 = vld [vmem:[#allocation73_spill] sm:$0xff] }
  0xaf   : > { %v933_v8 = vsub.f32 1.0, %v925_v54  ;;  %v936_v55 = vadd.f32 1e-15, %v928_v38  ;;  %v1101_v49 = vadd.f32 %v3762_v30, %v5827_v24  ;;  %v3997_v0 = vsel %vm795_vm3, %v3804_v28, %v3477_v6  ;;  %v5831_v6 = vld [vmem:[#allocation5_spill] sm:$0xff]  ;;  %v5832_v28 = vld [vmem:[#allocation72_spill] sm:$0xff] }
  0xb0   : > { %v4003_v3 = vsel %vm795_vm3, %v3807_v41, %v3482_v5  ;;  %v4009_v37 = vsel %vm795_vm3, %v3810_v22, %v3487_v9  ;;  %v937_v46 = vadd.f32 1e-15, %v929_v18  ;;  %v4015_v30 = vsel %vm796_vm4, %v5829_v13, %v3495_v60  ;;  %v5838_v22 = vld [vmem:[#allocation74_spill] sm:$0xff] }
  0xb1   : > { %5828 = vst [vmem:[#allocation17_spill] sm:$0xff] %v4009_v37  ;;  %5830 = vst [vmem:[#allocation18_spill] sm:$0xff] %v4015_v30  ;;  %v4021_v42 = vsel %vm796_vm4, %v5832_v28, %v5831_v6  ;;  %v934_v5 = vsub.f32 1.0, %v926_v2  ;;  %v938_v41 = vadd.f32 1e-15, %v930_v61  ;;  %v4027_v9 = vsel %vm796_vm4, %v5835_v15, %v5834_v35  ;;  %v5839_v2 = vld [vmem:[#allocation39_spill] sm:$0xff] }
  0xb2   : > { %5833 = vst [vmem:[#allocation19_spill] sm:$0xff] %v4021_v42  ;;  %5836 = vst [vmem:[#allocation35_spill] sm:$0xff] %v4027_v9  ;;  %v4033_v60 = vsel %vm796_vm4, %v5838_v22, %v5837_v40  ;;  %v935_v54 = vsub.f32 1.0, %v927_v33  ;;  %v939_v38 = vadd.f32 1e-15, %v931_v12  ;;  %2786 = vrsqrt.f32 %v936_v55  ;;  %v5840_v61 = vld [vmem:[#allocation65_spill] sm:$0xff] }
  0xb3   : > { %v940_v18 = vadd.f32 1e-15, %v932_v48  ;;  %v941_v24 = vadd.f32 1e-15, %v933_v8  ;;  %v1102_v13 = vrot.slane %v1101_v49, 4  ;;  %2788 = vrsqrt.f32 %v937_v46  ;;  %v5841_v28 = vld [vmem:[#allocation45_spill] sm:$0xff] }
  0xb4   : > { %v1110_v6 = vadd.f32 %v5840_v61, %v5839_v2  ;;  %v5842_v42 = vld [vmem:[#allocation67_spill] sm:$0xff]  ;;  %v5843_v15 = vld [vmem:[#allocation52_spill] sm:$0xff]  ;;  %v942_v12 = vadd.f32 1e-15, %v934_v5  ;;  %2790 = vrsqrt.f32 %v938_v41  ;;  %v5847_v48 = vld [vmem:[#allocation57_spill] sm:$0xff]  ;;  %v4079_v11 = vsel %vm798_vm6, %v3840_v53, %v5818_v44 }
  0xb5   : > { %v1119_v35 = vadd.f32 %v5842_v42, %v5841_v28  ;;  %v5844_v9 = vld [vmem:[#allocation68_spill] sm:$0xff]  ;;  %v5848_v8 = vld [vmem:[#allocation66_spill] sm:$0xff]  ;;  %v5849_v46 = vld [vmem:[#allocation9_spill] sm:$0xff]  ;;  %v943_v61 = vadd.f32 1e-15, %v935_v54  ;;  %2792 = vrsqrt.f32 %v939_v38  ;;  %v1103_v28 = vadd.f32 %v1102_v13, %v1101_v49 }
  0xb6   : > { %v1128_v30 = vadd.f32 %v5844_v9, %v5843_v15  ;;  %v5845_v37 = vld [vmem:[#allocation8_spill] sm:$0xff]  ;;  %v1145_v55 = vadd.f32 %v5848_v8, %v5847_v48  ;;  %v5852_v42 = vld [vmem:[#allocation10_spill] sm:$0xff]  ;;  %v5853_v2 = vld [vmem:[#allocation77_spill] sm:$0xff]  ;;  %2794 = vrsqrt.f32 %v940_v18  ;;  %v1111_v8 = vrot.slane %v1110_v6, 4 }
  0xb7   : > { %v4045_v33 = vsel %vm797_vm5, %v5846_v52, %v5845_v37  ;;  %v5850_v40 = vld [vmem:[#allocation76_spill] sm:$0xff]  ;;  %v4059_v9 = vsel %vm797_vm5, %v5853_v2, %v5852_v42  ;;  %v5854_v37 = vld [vmem:[#allocation11_spill] sm:$0xff]  ;;  %v5855_v5 = vld [vmem:[#allocation78_spill] sm:$0xff]  ;;  %2796 = vrsqrt.f32 %v941_v24  ;;  %v4098_v53 = vsel %vm799_vm7, %v3849_v63, %v5822_v45 }
  0xb8   : > { %v4053_v22 = vsel %vm797_vm5, %v5850_v40, %v5849_v46  ;;  %v4065_v41 = vsel %vm797_vm5, %v5855_v5, %v5854_v37  ;;  %v5856_v15 = vld [vmem:[#allocation53_spill] sm:$0xff]  ;;  %v5857_v52 = vld [vmem:[#allocation70_spill] sm:$0xff]  ;;  %v1120_v46 = vrot.slane %v1119_v35, 4  ;;  %v1129_v40 = vrot.slane %v1128_v30, 4  ;;  %v5859_v42 = vld [vmem:[#allocation79_spill] sm:$0xff] }
  0xb9   : > { %5851 = vst [vmem:[#allocation71_spill] sm:$0xff] %v4053_v22  ;;  %v1137_v48 = vadd.f32 %v5857_v52, %v5856_v15  ;;  %v5858_v22 = vld [vmem:[#allocation12_spill] sm:$0xff]  ;;  %2798 = vrsqrt.f32 %v942_v12  ;;  %v5860_v49 = vld [vmem:[#allocation58_spill] sm:$0xff]  ;;  %v5862_v13 = vld [vmem:[#allocation13_spill] sm:$0xff]  ;;  %v1104_v47 = vrot.slane %v1103_v28, 2  ;;  %v4118_v45 = vadd.f32 %v1111_v8, %v1110_v6 }
  0xba   : > { %v4073_v54 = vsel %vm798_vm6, %v5859_v42, %v5858_v22  ;;  %v1146_v38 = vadd.f32 %v1145_v55, %v5860_v49  ;;  %v5861_v18 = vld [vmem:[#allocation14_spill] sm:$0xff]  ;;  %v4092_v22 = vsel %vm798_vm6, %v5862_v13, %v5820_v25  ;;  %2800 = vrsqrt.f32 %v943_v61  ;;  %v5863_v44 = vld [vmem:[#allocation16_spill] sm:$0xff]  ;;  %v5866_v37 = vld [vmem:[#allocation69_spill] sm:$0xff] }
  0xbb   : > { %v4086_v24 = vsel %vm798_vm6, %v3843_v62, %v5861_v18  ;;  %v4104_v12 = vsel %vm799_vm7, %v5863_v44, %v5823_v56  ;;  %v4110_v62 = vsel %vm799_vm7, %v3855_v20, %v5825_v51  ;;  %v1138_v25 = vrot.slane %v1137_v48, 4  ;;  %v5864_v55 = vld [vmem:[#allocation20_spill] sm:$0xff]  ;;  %v5865_v51 = vld [vmem:[#allocation59_spill] sm:$0xff] }
  0xbc   : > { %v4116_v63 = vsel %vm799_vm7, %v3858_v16, %v5864_v55  ;;  %v4120_v2 = vadd.f32 %v1120_v46, %v1119_v35  ;;  %v4122_v56 = vadd.f32 %v1129_v40, %v1128_v30  ;;  %v2787_v61 = vpop.eup %2786  ;;  %vm952_vm8 = vcmp.eq.f32.partialorder %v3907_v58, 0.0  ;;  %v5867_v46 = vld [vmem:[#allocation61_spill] sm:$0xff]  ;;  %v5868_v40 = vld [vmem:[#allocation62_spill] sm:$0xff]  ;;  %v5869_v13 = vld [vmem:[#allocation60_spill] sm:$0xff] }
  0xbd   : > { %vm953_vm9 = vcmp.eq.f32.partialorder %v3912_v1, 0.0  ;;  %v1147_v20 = vrot.slane %v1146_v38, 4  ;;  %v1154_v5 = vadd.f32 %v5866_v37, %v5865_v51  ;;  %v2789_v15 = vpop.eup %2788  ;;  %vm954_vm10 = vcmp.eq.f32.partialorder %v3917_v23, 0.0 }
  0xbe   : > { %vm955_vm11 = vcmp.eq.f32.partialorder %v3922_v29, 0.0  ;;  %vm956_vm12 = vcmp.eq.f32.partialorder %v3927_v10, 0.0  ;;  %vm957_vm13 = vcmp.eq.f32.partialorder %v3932_v14, 0.0  ;;  %v2791_v26 = vpop.eup %2790  ;;  %vm958_vm14 = vcmp.eq.f32.partialorder %v3937_v7, 0.0 }
  0xbf   : > { %vm959_vm15 = vcmp.eq.f32.partialorder %v3942_v50, 0.0  ;;  %v4134_v16 = vadd.f32 %v1104_v47, %v1103_v28  ;;  %v4136_v30 = vadd.f32 %v1138_v25, %v1137_v48  ;;  %v2793_v6 = vpop.eup %2792  ;;  %v1113_v35 = vrot.slane %v4118_v45, 2 }
  0xc0   : > { %v1122_v52 = vrot.slane %v4120_v2, 2  ;;  %v1131_v8 = vrot.slane %v4122_v56, 2  ;;  %v4143_v42 = vadd.f32 %v5868_v40, %v5867_v46  ;;  %v2795_v49 = vpop.eup %2794  ;;  %v4147_v18 = vsel %vm952_vm8, 0.0, %v2787_v61  ;;  %v5873_v40 = vld [vmem:[#allocation35_spill] sm:$0xff] }
  0xc1   : > { %v4151_v28 = vsel %vm953_vm9, 0.0, %v2789_v15  ;;  %v4153_v48 = vadd.f32 %v1147_v20, %v1146_v38  ;;  %v4156_v44 = vadd.f32 %v1154_v5, %v5869_v13  ;;  %v2797_v47 = vpop.eup %2796  ;;  %v4160_v25 = vsel %vm954_vm10, 0.0, %v2791_v26  ;;  %v5870_v15 = vld [vmem:[#allocation17_spill] sm:$0xff]  ;;  %v5871_v26 = vld [vmem:[#allocation18_spill] sm:$0xff] }
  0xc2   : > { %v975_v55 = vmul.f32 %v4147_v18, %v3863_v34  ;;  %v976_v58 = vmul.f32 %v4147_v18, %v3868_v19  ;;  %v977_v1 = vmul.f32 %v4147_v18, %v3873_v4  ;;  %v978_v38 = vmul.f32 %v4147_v18, %v3878_v59 }
  0xc3   : > { %v2799_v61 = vpop.eup %2798  ;;  %v979_v20 = vmul.f32 %v4151_v28, %v3883_v39  ;;  %v980_v23 = vmul.f32 %v4151_v28, %v3888_v43  ;;  %v981_v51 = vmul.f32 %v4151_v28, %v3893_v31  ;;  %v4178_v19 = vsel %vm955_vm11, 0.0, %v2793_v6 }
  0xc4   : > { %v2801_v34 = vpop.eup %2800  ;;  %v4182_v4 = vsel %vm956_vm12, 0.0, %v2795_v49  ;;  %v982_v59 = vmul.f32 %v4151_v28, %v3960_v21  ;;  %v983_v39 = vmul.f32 %v4160_v25, %v3965_v57  ;;  %v4190_v43 = vsel %vm957_vm13, 0.0, %v2797_v47 }
  0xc5   : > { %v984_v31 = vmul.f32 %v4160_v25, %v3970_v36  ;;  %v985_v29 = vmul.f32 %v4160_v25, %v3975_v17  ;;  %v986_v10 = vmul.f32 %v4160_v25, %v3982_v32  ;;  %v4200_v37 = vsel %vm958_vm14, 0.0, %v2799_v61 }
  0xc6   : > { %v987_v21 = vmul.f32 %v4178_v19, %v3987_v27  ;;  %v988_v14 = vmul.f32 %v4178_v19, %v3997_v0  ;;  %v989_v57 = vmul.f32 %v4178_v19, %v4003_v3  ;;  %v4210_v36 = vsel %vm959_vm15, 0.0, %v2801_v34  ;;  %v5872_v27 = vld [vmem:[#allocation19_spill] sm:$0xff] }
  0xc7   : > { %v1007_v17 = vadd.f32 %v979_v20, %v975_v55  ;;  %v1014_v5 = vadd.f32 %v980_v23, %v976_v58  ;;  %v1021_v32 = vadd.f32 %v981_v51, %v977_v1  ;;  %v990_v7 = vmul.f32 %v4178_v19, %v5870_v15  ;;  %v5874_v58 = vld [vmem:[#allocation71_spill] sm:$0xff] }
  0xc8   : > { %v991_v6 = vmul.f32 %v4182_v4, %v5871_v26  ;;  %v992_v46 = vmul.f32 %v4182_v4, %v5872_v27  ;;  %v1028_v0 = vadd.f32 %v982_v59, %v978_v38  ;;  %v993_v3 = vmul.f32 %v4182_v4, %v5873_v40  ;;  %v5876_v27 = vld [vmem:[#allocation64_spill] sm:$0xff] }
  0xc9   : > { %v1008_v49 = vadd.f32 %v1007_v17, %v983_v39  ;;  %v1015_v50 = vadd.f32 %v1014_v5, %v984_v31  ;;  %v1022_v13 = vadd.f32 %v1021_v32, %v985_v29  ;;  %v994_v47 = vmul.f32 %v4182_v4, %v4033_v60 }
  0xca   : > { %v995_v55 = vmul.f32 %v4190_v43, %v4045_v33  ;;  %v996_v1 = vmul.f32 %v4190_v43, %v5874_v58  ;;  %v1029_v61 = vadd.f32 %v1028_v0, %v986_v10  ;;  %v997_v20 = vmul.f32 %v4190_v43, %v4059_v9 }
  0xcb   : > { %v1009_v38 = vadd.f32 %v1008_v49, %v987_v21  ;;  %v1016_v23 = vadd.f32 %v1015_v50, %v988_v14  ;;  %v1023_v51 = vadd.f32 %v1022_v13, %v989_v57  ;;  %v998_v34 = vmul.f32 %v4190_v43, %v4065_v41 }
  0xcc   : > { %v999_v59 = vmul.f32 %v4200_v37, %v4073_v54  ;;  %v1000_v60 = vmul.f32 %v4200_v37, %v4079_v11  ;;  %v1030_v33 = vadd.f32 %v1029_v61, %v990_v7  ;;  %v1001_v39 = vmul.f32 %v4200_v37, %v4086_v24 }
  0xcd   : > { %v1010_v31 = vadd.f32 %v1009_v38, %v991_v6  ;;  %v1017_v29 = vadd.f32 %v1016_v23, %v992_v46  ;;  %v1024_v10 = vadd.f32 %v1023_v51, %v993_v3  ;;  %v1002_v9 = vmul.f32 %v4200_v37, %v4092_v22  ;;  %v5875_v22 = vld [vmem:[#allocation63_spill] sm:$0xff] }
  0xce   : > { %v1003_v21 = vmul.f32 %v4210_v36, %v4098_v53  ;;  %v1004_v41 = vmul.f32 %v4210_v36, %v4104_v12  ;;  %v1031_v54 = vadd.f32 %v1030_v33, %v994_v47  ;;  %v1005_v11 = vmul.f32 %v4210_v36, %v4110_v62 }
  0xcf   : > { %v1011_v14 = vadd.f32 %v1010_v31, %v995_v55  ;;  %v1018_v57 = vadd.f32 %v1017_v29, %v996_v1  ;;  %v1025_v17 = vadd.f32 %v1024_v10, %v997_v20  ;;  %v1006_v24 = vmul.f32 %v4210_v36, %v4116_v63 }
  0xd0   : > { %v1032_v5 = vadd.f32 %v1031_v54, %v998_v34  ;;  %v1140_v32 = vrot.slane %v4136_v30, 2  ;;  %v1163_v15 = vadd.f32 %v4143_v42, %v5875_v22  ;;  %v1114_v12 = vadd.f32 %v1113_v35, %v4118_v45 }
  0xd1   : > { %v1012_v53 = vadd.f32 %v1011_v14, %v999_v59  ;;  %v1019_v7 = vadd.f32 %v1018_v57, %v1000_v60  ;;  %v1026_v26 = vadd.f32 %v1025_v17, %v1001_v39  ;;  %v1123_v6 = vadd.f32 %v1122_v52, %v4120_v2 }
  0xd2   : > { %v1033_v62 = vadd.f32 %v1032_v5, %v1002_v9  ;;  %v1149_v63 = vrot.slane %v4153_v48, 2  ;;  %v1164_v46 = vadd.f32 %v1163_v15, %v5876_v27  ;;  %v1156_v3 = vrot.slane %v4156_v44, 4 }
  0xd3   : > { %v4257_v0 = vadd.f32 %v1012_v53, %v1003_v21  ;;  %v4259_v40 = vadd.f32 %v1019_v7, %v1004_v41  ;;  %v4261_v42 = vadd.f32 %v1026_v26, %v1005_v11  ;;  %v1132_v45 = vadd.f32 %v1131_v8, %v4122_v56 }
  0xd4   : > { %v4264_v49 = vadd.f32 %v1033_v62, %v1006_v24  ;;  %v1165_v35 = vrot.slane %v1164_v46, 4  ;;  %v1106_v2 = vrot.slane %v4134_v16, 1  ;;  %v1141_v52 = vadd.f32 %v1140_v32, %v4136_v30 }
  0xd5   : > { %5877 = vst [vmem:[#allocation5_spill] sm:$0xff] %v4257_v0  ;;  %5878 = vst [vmem:[#allocation72_spill] sm:$0xff] %v4259_v40  ;;  %v1115_v50 = vrot.slane %v1114_v12, 1  ;;  %v1150_v13 = vadd.f32 %v1149_v63, %v4153_v48  ;;  %v1124_v47 = vrot.slane %v1123_v6, 1  ;;  %v1157_v55 = vadd.f32 %v1156_v3, %v4156_v44 }
  0xd6   : > { %5879 = vst [vmem:[#allocation6_spill] sm:$0xff] %v4261_v42  ;;  %5880 = vst [vmem:[#allocation73_spill] sm:$0xff] %v4264_v49  ;;  %v1133_v58 = vrot.slane %v1132_v45, 1  ;;  %v1166_v1 = vadd.f32 %v1165_v35, %v1164_v46  ;;  %v4274_v61 = vadd.f32 %v1106_v2, %v4134_v16  ;;  %v1142_v20 = vrot.slane %v1141_v52, 1 }
  0xd7   : > { %v4276_v38 = vadd.f32 %v1115_v50, %v1114_v12  ;;  %v1151_v56 = vrot.slane %v1150_v13, 1  ;;  %v4278_v8 = vadd.f32 %v1124_v47, %v1123_v6  ;;  %v1158_v23 = vrot.slane %v1157_v55, 2 }
  0xd8   : > { %v4280_v51 = vadd.f32 %v1133_v58, %v1132_v45  ;;  %v1167_v30 = vrot.slane %v1166_v1, 2  ;;  %v4282_v34 = vadd.f32 %v1142_v20, %v1141_v52  ;;  %2802 = vrsqrt.f32 %v4274_v61 }
  0xd9   : > { %v4285_v48 = vadd.f32 %v1151_v56, %v1150_v13  ;;  %2804 = vrsqrt.f32 %v4276_v38  ;;  %v1159_v16 = vadd.f32 %v1158_v23, %v1157_v55  ;;  %v968_v44 = vadd.f32 %v4151_v28, %v4147_v18 }
  0xda   : > { %2806 = vrsqrt.f32 %v4278_v8  ;;  %v1168_v59 = vadd.f32 %v1167_v30, %v1166_v1  ;;  %v1171_v60 = vadd.f32 1.0, %v4274_v61  ;;  %v1172_v39 = vadd.f32 1.0, %v4276_v38 }
  0xdb   : > { %2808 = vrsqrt.f32 %v4280_v51  ;;  %v1160_v33 = vrot.slane %v1159_v16, 1  ;;  %v969_v31 = vadd.f32 %v968_v44, %v4160_v25  ;;  %v1173_v10 = vadd.f32 1.0, %v4278_v8 }
  0xdc   : > { %2810 = vrsqrt.f32 %v4282_v34  ;;  %v1169_v29 = vrot.slane %v1168_v59, 1  ;;  %v1174_v9 = vadd.f32 1.0, %v4280_v51  ;;  %v1175_v18 = vadd.f32 1.0, %v4282_v34 }
  0xdd   : > { %2812 = vrsqrt.f32 %v4285_v48  ;;  %v4300_v21 = vadd.f32 %v1160_v33, %v1159_v16  ;;  %v970_v54 = vadd.f32 %v969_v31, %v4178_v19  ;;  %v1176_v25 = vadd.f32 1.0, %v4285_v48 }
  0xde   : > { %2814 = vrcp.f32 %v1171_v60  ;;  %v4303_v11 = vadd.f32 %v1169_v29, %v1168_v59  ;;  %vm1229_vm0 = vcmp.eq.f32.partialorder %v4274_v61, inf  ;;  %vm1231_vm1 = vcmp.eq.f32.partialorder %v4274_v61, 0.0 }
  0xdf   : > { %2816 = vrcp.f32 %v1172_v39  ;;  %v1232_v24 = vand.u32 2147483648, %v4274_v61  ;;  %vm1236_vm2 = vcmp.eq.f32.partialorder %v4276_v38, inf  ;;  %vm1238_vm3 = vcmp.eq.f32.partialorder %v4276_v38, 0.0 }
  0xe0   : > { %2818 = vrcp.f32 %v1173_v10  ;;  %v1239_v32 = vand.u32 2147483648, %v4276_v38  ;;  %v1177_v15 = vadd.f32 1.0, %v4300_v21  ;;  %vm1243_vm4 = vcmp.eq.f32.partialorder %v4278_v8, inf }
  0xe1   : > { %2820 = vrcp.f32 %v1174_v9  ;;  %vm1245_vm5 = vcmp.eq.f32.partialorder %v4278_v8, 0.0  ;;  %v1246_v7 = vand.u32 2147483648, %v4278_v8  ;;  %v1178_v12 = vadd.f32 1.0, %v4303_v11 }
  0xe2   : > { %v2803_v28 = vpop.eup %2802  ;;  %2822 = vrcp.f32 %v1175_v18  ;;  %vm1250_vm6 = vcmp.eq.f32.partialorder %v4280_v51, inf  ;;  %vm1252_vm7 = vcmp.eq.f32.partialorder %v4280_v51, 0.0  ;;  %vm1257_vm8 = vcmp.eq.f32.partialorder %v4282_v34, inf }
  0xe3   : > { %v2805_v41 = vpop.eup %2804  ;;  %v1228_v17 = vmul.f32 %v2803_v28, %v4274_v61  ;;  %2824 = vrsqrt.f32 %v4300_v21  ;;  %v1253_v45 = vand.u32 2147483648, %v4280_v51  ;;  %vm1264_vm9 = vcmp.eq.f32.partialorder %v4285_v48, inf }
  0xe4   : > { %v2807_v14 = vpop.eup %2806  ;;  %v1235_v5 = vmul.f32 %v2805_v41, %v4276_v38  ;;  %2826 = vrsqrt.f32 %v4303_v11  ;;  %vm1259_vm10 = vcmp.eq.f32.partialorder %v4282_v34, 0.0  ;;  %v1260_v50 = vand.u32 2147483648, %v4282_v34 }
  0xe5   : > { %v2809_v57 = vpop.eup %2808  ;;  %v1242_v53 = vmul.f32 %v2807_v14, %v4278_v8  ;;  %2828 = vrcp.f32 %v1176_v25  ;;  %v1230_v62 = vsel %vm1229_vm0, %v4274_v61, %v1228_v17  ;;  %v1267_v58 = vand.u32 2147483648, %v4285_v48 }
  0xe6   : > { %v2811_v19 = vpop.eup %2810  ;;  %v1249_v26 = vmul.f32 %v2809_v57, %v4280_v51  ;;  %v1237_v63 = vsel %vm1236_vm2, %v4276_v38, %v1235_v5  ;;  %2830 = vrcp.f32 %v1177_v15  ;;  %v1233_v2 = vsel %vm1231_vm1, %v1232_v24, %v1230_v62 }
  0xe7   : > { %v2813_v22 = vpop.eup %2812  ;;  %v1256_v6 = vmul.f32 %v2811_v19, %v4282_v34  ;;  %v1244_v3 = vsel %vm1243_vm4, %v4278_v8, %v1242_v53  ;;  %2832 = vrcp.f32 %v1178_v12  ;;  %v1240_v47 = vsel %vm1238_vm3, %v1239_v32, %v1237_v63 }
  0xe8   : > { %v1263_v27 = vmul.f32 %v2813_v22, %v4285_v48  ;;  %v2815_v46 = vpop.eup %2814  ;;  %v1251_v52 = vsel %vm1250_vm6, %v4280_v51, %v1249_v26  ;;  %v971_v20 = vadd.f32 %v970_v54, %v4182_v4  ;;  %v1247_v61 = vsel %vm1245_vm5, %v1246_v7, %v1244_v3 }
  0xe9   : > { %v2817_v35 = vpop.eup %2816  ;;  %v1258_v55 = vsel %vm1257_vm8, %v4282_v34, %v1256_v6  ;;  %vm1266_vm11 = vcmp.eq.f32.partialorder %v4285_v48, 0.0  ;;  %v1254_v30 = vsel %vm1252_vm7, %v1253_v45, %v1251_v52  ;;  %vm1271_vm12 = vcmp.eq.f32.partialorder %v4300_v21, inf }
  0xea   : > { %v2819_v13 = vpop.eup %2818  ;;  %v1265_v56 = vsel %vm1264_vm9, %v4285_v48, %v1263_v27  ;;  %vm1273_vm13 = vcmp.eq.f32.partialorder %v4300_v21, 0.0  ;;  %v1283_v38 = vmul.f32 2.0, %v1233_v2  ;;  %v1261_v4 = vsel %vm1259_vm10, %v1260_v50, %v1258_v55  ;;  %v5886_v50 = vld [vmem:[#allocation21_spill] sm:$0xff]  ;;  %v5887_v55 = vld [vmem:[#allocation22_spill] sm:$0xff] }
  0xeb   : > { %v2821_v1 = vpop.eup %2820  ;;  %v1274_v8 = vand.u32 2147483648, %v4300_v21  ;;  %vm1278_vm14 = vcmp.eq.f32.partialorder %v4303_v11, inf  ;;  %v1284_v44 = vmul.f32 2.0, %v1240_v47  ;;  %v1268_v48 = vsel %vm1266_vm11, %v1267_v58, %v1265_v56  ;;  %v5888_v58 = vld [vmem:[#allocation23_spill] sm:$0xff] }
  0xec   : > { %v2823_v23 = vpop.eup %2822  ;;  %v1281_v51 = vand.u32 2147483648, %v4303_v11  ;;  %v1285_v33 = vmul.f32 2.0, %v1247_v61  ;;  %vm1280_vm15 = vcmp.eq.f32.partialorder %v4303_v11, 0.0  ;;  %v1286_v29 = vmul.f32 2.0, %v1254_v30  ;;  %v5890_v30 = vld [vmem:[#allocation25_spill] sm:$0xff] }
  0xed   : > { %v2825_v16 = vpop.eup %2824  ;;  %v972_v34 = vadd.f32 %v971_v20, %v4190_v43  ;;  %v1287_v9 = vmul.f32 2.0, %v1261_v4  ;;  %v4369_v18 = vmul.f32 %v2815_v46, %v1283_v38  ;;  %v1288_v54 = vmul.f32 2.0, %v1268_v48 }
  0xee   : > { %v2827_v59 = vpop.eup %2826  ;;  %v1270_v60 = vmul.f32 %v2825_v16, %v4300_v21  ;;  %v4376_v14 = vmul.f32 %v2817_v35, %v1284_v44  ;;  %v4378_v17 = vmul.f32 %v2819_v13, %v1285_v33  ;;  %v4380_v19 = vmul.f32 %v2821_v1, %v1286_v29 }
  0xef   : > { %v2829_v39 = vpop.eup %2828  ;;  %v1277_v31 = vmul.f32 %v2827_v59, %v4303_v11  ;;  %v4382_v32 = vmul.f32 %v2823_v23, %v1287_v9  ;;  %v973_v22 = vadd.f32 %v972_v34, %v4200_v37  ;;  %v1187_v53 = vmul.f32 2.0, %v2815_v46  ;;  %v5885_v46 = vld [vmem:[#allocation15_spill] sm:$0xff]  ;;  %v5893_v59 = vld [vmem:[#allocation28_spill] sm:$0xff] }
  0xf0   : > { %v1272_v10 = vsel %vm1271_vm12, %v4300_v21, %v1270_v60  ;;  %v2831_v25 = vpop.eup %2830  ;;  %v1307_v21 = vadd.f32 1e-15, %v4369_v18  ;;  %v4386_v15 = vmul.f32 %v2829_v39, %v1288_v54  ;;  %v1309_v26 = vadd.f32 1e-15, %v4378_v17  ;;  %v5898_v34 = vld [vmem:[#allocation31_spill] sm:$0xff]  ;;  %v5904_v54 = vld [vmem:[#allocation34_spill] sm:$0xff] }
  0xf1   : > { %v1275_v28 = vsel %vm1273_vm13, %v1274_v8, %v1272_v10  ;;  %v1279_v41 = vsel %vm1278_vm14, %v4303_v11, %v1277_v31  ;;  %v2833_v5 = vpop.eup %2832  ;;  %v1308_v11 = vadd.f32 1e-15, %v4376_v14  ;;  %v1310_v62 = vadd.f32 1e-15, %v4380_v19  ;;  %v5892_v8 = vld [vmem:[#allocation27_spill] sm:$0xff] }
  0xf2   : > { %v1282_v57 = vsel %vm1280_vm15, %v1281_v51, %v1279_v41  ;;  %v1289_v43 = vmul.f32 2.0, %v1275_v28  ;;  %5881 = vst [vmem:[#allocation7_spill] sm:$0xff] %v4386_v15  ;;  %v1188_v6 = vmul.f32 2.0, %v2817_v35  ;;  %v1311_v63 = vadd.f32 1e-15, %v4382_v32  ;;  %v5894_v51 = vld [vmem:[#allocation29_spill] sm:$0xff] }
  0xf3   : > { %v1290_v24 = vmul.f32 2.0, %v1282_v57  ;;  %2834 = vrcp.f32 %v1307_v21  ;;  %v4397_v27 = vadd.f32 %v973_v22, %v4210_v36  ;;  %v1312_v37 = vadd.f32 1e-15, %v4386_v15  ;;  %v5902_v28 = vld [vmem:[#allocation33_spill] sm:$0xff]  ;;  %v5908_v22 = vld [vmem:[#allocation38_spill] sm:$0xff] }
  0xf4   : > { %v4389_v7 = vmul.f32 %v2831_v25, %v1289_v43  ;;  %2836 = vrcp.f32 %v1308_v11  ;;  %v1189_v3 = vmul.f32 2.0, %v2819_v13  ;;  %v4401_v45 = vmul.f32 %v1187_v53, %v5885_v46  ;;  %v5889_v13 = vld [vmem:[#allocation24_spill] sm:$0xff] }
  0xf5   : > { %v4392_v12 = vmul.f32 %v2833_v5, %v1290_v24  ;;  %5884 = vst [vmem:[#allocation65_spill] sm:$0xff] %v4397_v27  ;;  %2838 = vrcp.f32 %v1309_v26  ;;  %v1190_v52 = vmul.f32 2.0, %v2821_v1  ;;  %v4405_v47 = vmul.f32 %v1187_v53, %v5886_v50  ;;  %v5891_v1 = vld [vmem:[#allocation26_spill] sm:$0xff]  ;;  %v5907_v24 = vld [vmem:[#allocation37_spill] sm:$0xff] }
  0xf6   : > { %5882 = vst [vmem:[#allocation74_spill] sm:$0xff] %v4389_v7  ;;  %v1313_v2 = vadd.f32 1e-15, %v4389_v7  ;;  %2840 = vrcp.f32 %v1310_v62  ;;  %v4409_v36 = vmul.f32 %v1187_v53, %v5887_v55  ;;  %v4412_v20 = vmul.f32 %v1187_v53, %v5888_v58  ;;  %v5910_v53 = vld [vmem:[#allocation40_spill] sm:$0xff]  ;;  %v5912_v62 = vld [vmem:[#allocation41_spill] sm:$0xff]  ;;  %v5921_v58 = vld [vmem:[#allocation47_spill] sm:$0xff] }
  0xf7   : > { %5883 = vst [vmem:[#allocation39_spill] sm:$0xff] %v4392_v12  ;;  %v1314_v35 = vadd.f32 1e-15, %v4392_v12  ;;  %v4415_v61 = vmul.f32 %v1188_v6, %v5889_v13  ;;  %2842 = vrcp.f32 %v1311_v63  ;;  %v1191_v56 = vmul.f32 2.0, %v2823_v23  ;;  %v5896_v23 = vld [vmem:[#allocation30_spill] sm:$0xff] }
  0xf8   : > { %v4418_v38 = vmul.f32 %v1188_v6, %v5890_v30  ;;  %v4421_v16 = vmul.f32 %v1188_v6, %v5891_v1  ;;  %2844 = vrcp.f32 %v1312_v37  ;;  %v1192_v4 = vmul.f32 2.0, %v2829_v39  ;;  %v5900_v39 = vld [vmem:[#allocation32_spill] sm:$0xff]  ;;  %v5914_v63 = vld [vmem:[#allocation42_spill] sm:$0xff] }
  0xf9   : > { %v4424_v44 = vmul.f32 %v1188_v6, %v5892_v8  ;;  %v4427_v48 = vmul.f32 %v1189_v3, %v5893_v59  ;;  %2846 = vrcp.f32 %v1313_v2  ;;  %v1193_v60 = vmul.f32 2.0, %v2831_v25  ;;  %v5906_v25 = vld [vmem:[#allocation36_spill] sm:$0xff]  ;;  %v5923_v8 = vld [vmem:[#allocation49_spill] sm:$0xff] }
  0xfa   : > { %v4430_v33 = vmul.f32 %v1189_v3, %v5894_v51  ;;  %v4433_v31 = vmul.f32 %v1189_v3, %v5896_v23  ;;  %2848 = vrcp.f32 %v1314_v35  ;;  %v1194_v29 = vmul.f32 2.0, %v2833_v5  ;;  %v5920_v35 = vld [vmem:[#allocation46_spill] sm:$0xff]  ;;  %v5922_v30 = vld [vmem:[#allocation48_spill] sm:$0xff] }
  0xfb   : > { %v4436_v10 = vmul.f32 %v1189_v3, %v5898_v34  ;;  %v4439_v9 = vmul.f32 %v1190_v52, %v5900_v39  ;;  %v4442_v41 = vmul.f32 %v1190_v52, %v5902_v28  ;;  %v4445_v57 = vmul.f32 %v1190_v52, %v5904_v54  ;;  %v5916_v3 = vld [vmem:[#allocation43_spill] sm:$0xff]  ;;  %v5924_v51 = vld [vmem:[#allocation50_spill] sm:$0xff] }
  0xfc   : > { %5895 = vst [vmem:[#allocation45_spill] sm:$0xff] %v4430_v33  ;;  %5897 = vst [vmem:[#allocation67_spill] sm:$0xff] %v4433_v31  ;;  %v4448_v43 = vmul.f32 %v1190_v52, %v5906_v25  ;;  %v4451_v21 = vmul.f32 %v1191_v56, %v5907_v24  ;;  %v4454_v5 = vmul.f32 %v1191_v56, %v5908_v22  ;;  %v5918_v52 = vld [vmem:[#allocation44_spill] sm:$0xff]  ;;  %v5925_v34 = vld [vmem:[#allocation51_spill] sm:$0xff]  ;;  %vm1299_vm0 = vcmp.gt.f32.partialorder %v4369_v18, 0.996 }
  0xfd   : > { %5899 = vst [vmem:[#allocation52_spill] sm:$0xff] %v4436_v10  ;;  %5901 = vst [vmem:[#allocation68_spill] sm:$0xff] %v4439_v9  ;;  %v2835_v11 = vpop.eup %2834  ;;  %v4457_v26 = vmul.f32 %v1191_v56, %v5910_v53  ;;  %v4460_v6 = vmul.f32 %v1191_v56, %v5912_v62  ;;  %v4463_v37 = vmul.f32 %v1192_v4, %v5914_v63  ;;  %v5926_v28 = vld [vmem:[#allocation54_spill] sm:$0xff]  ;;  %v5927_v25 = vld [vmem:[#allocation55_spill] sm:$0xff]  ;;  %vm1300_vm1 = vcmp.gt.f32.partialorder %v4376_v14, 0.996 }
  0xfe   : > { %5903 = vst [vmem:[#allocation8_spill] sm:$0xff] %v4442_v41  ;;  %5905 = vst [vmem:[#allocation75_spill] sm:$0xff] %v4445_v57  ;;  %v4466_v46 = vmul.f32 %v1192_v4, %v5916_v3  ;;  %v2837_v2 = vpop.eup %2836  ;;  %v4469_v50 = vmul.f32 %v1192_v4, %v5918_v52  ;;  %v4472_v55 = vmul.f32 %v1192_v4, %v5920_v35  ;;  %v1316_v22 = vmul.f32 0.996, %v2835_v11  ;;  %v5928_v62 = vld [vmem:[#allocation56_spill] sm:$0xff] }
  0xff   : > { %5909 = vst [vmem:[#allocation57_spill] sm:$0xff] %v4454_v5  ;;  %5911 = vst [vmem:[#allocation66_spill] sm:$0xff] %v4457_v26  ;;  %v4475_v13 = vmul.f32 %v1193_v60, %v5921_v58  ;;  %v4478_v1 = vmul.f32 %v1193_v60, %v5922_v30  ;;  %v2839_v56 = vpop.eup %2838  ;;  %v4481_v59 = vmul.f32 %v1193_v60, %v5923_v8  ;;  %vm1301_vm2 = vcmp.gt.f32.partialorder %v4378_v17, 0.996 }
 0x100   : > { %5913 = vst [vmem:[#allocation9_spill] sm:$0xff] %v4460_v6  ;;  %5915 = vst [vmem:[#allocation76_spill] sm:$0xff] %v4463_v37  ;;  %v4484_v23 = vmul.f32 %v1193_v60, %v5924_v51  ;;  %v4487_v39 = vmul.f32 %v1194_v29, %v5925_v34  ;;  %v4490_v54 = vmul.f32 %v1194_v29, %v5926_v28  ;;  %v2841_v4 = vpop.eup %2840  ;;  %vm1302_vm3 = vcmp.gt.f32.partialorder %v4380_v19, 0.996 }
 0x101   : > { %5917 = vst [vmem:[#allocation10_spill] sm:$0xff] %v4466_v46  ;;  %5919 = vst [vmem:[#allocation77_spill] sm:$0xff] %v4469_v50  ;;  %v4493_v24 = vmul.f32 %v1194_v29, %v5927_v25  ;;  %v2843_v53 = vpop.eup %2842  ;;  %v4498_v63 = vmul.f32 %v1194_v29, %v5928_v62  ;;  %vm1303_vm4 = vcmp.gt.f32.partialorder %v4382_v32, 0.996  ;;  %vm1304_vm5 = vcmp.gt.f32.partialorder %v4386_v15, 0.996 }
 0x102   : > { %v1318_v60 = vmul.f32 0.996, %v2837_v2  ;;  %v2845_v3 = vpop.eup %2844  ;;  %vm1305_vm6 = vcmp.gt.f32.partialorder %v4389_v7, 0.996  ;;  %vm1306_vm7 = vcmp.gt.f32.partialorder %v4392_v12, 0.996  ;;  %v1331_v11 = vmul.f32 %v1316_v22, %v4401_v45 }
 0x103   : > { %v1320_v52 = vmul.f32 0.996, %v2839_v56  ;;  %v4508_v29 = vmul.f32 %v1316_v22, %v4405_v47  ;;  %v2847_v35 = vpop.eup %2846  ;;  %v1322_v58 = vmul.f32 0.996, %v2841_v4  ;;  %v4511_v30 = vmul.f32 %v1316_v22, %v4409_v36 }
 0x104   : > { %v4514_v8 = vmul.f32 %v1316_v22, %v4412_v20  ;;  %v4517_v2 = vmul.f32 %v1318_v60, %v4415_v61  ;;  %v2849_v51 = vpop.eup %2848  ;;  %v1324_v34 = vmul.f32 0.996, %v2843_v53  ;;  %v4520_v56 = vmul.f32 %v1318_v60, %v4418_v38 }
 0x105   : > { %v4523_v28 = vmul.f32 %v1318_v60, %v4421_v16  ;;  %v4526_v25 = vmul.f32 %v1318_v60, %v4424_v44  ;;  %v1326_v4 = vmul.f32 0.996, %v2845_v3  ;;  %v4529_v62 = vmul.f32 %v1320_v52, %v4427_v48 }
 0x106   : > { %v4532_v49 = vmul.f32 %v1320_v52, %v4430_v33  ;;  %v4535_v42 = vmul.f32 %v1320_v52, %v4433_v31  ;;  %v4538_v53 = vmul.f32 %v1320_v52, %v4436_v10  ;;  %v4541_v40 = vmul.f32 %v1322_v58, %v4439_v9 }
 0x107   : > { %5929 = vst [vmem:[#allocation11_spill] sm:$0xff] %v4529_v62  ;;  %v4544_v0 = vmul.f32 %v1322_v58, %v4442_v41  ;;  %v4547_v3 = vmul.f32 %v1322_v58, %v4445_v57  ;;  %v1328_v27 = vmul.f32 0.996, %v2847_v35  ;;  %v1330_v62 = vmul.f32 0.996, %v2849_v51 }
 0x108   : > { %v4550_v33 = vmul.f32 %v1322_v58, %v4448_v43  ;;  %v4553_v31 = vmul.f32 %v1324_v34, %v4451_v21  ;;  %v4556_v10 = vmul.f32 %v1324_v34, %v4454_v5  ;;  %v4559_v9 = vmul.f32 %v1324_v34, %v4457_v26 }
 0x109   : > { %v4562_v41 = vmul.f32 %v1324_v34, %v4460_v6  ;;  %v4565_v57 = vmul.f32 %v1326_v4, %v4463_v37  ;;  %v4568_v35 = vmul.f32 %v1326_v4, %v4466_v46  ;;  %v4571_v51 = vmul.f32 %v1326_v4, %v4469_v50 }
 0x10a   : > { %5930 = vst [vmem:[#allocation78_spill] sm:$0xff] %v4553_v31  ;;  %5931 = vst [vmem:[#allocation53_spill] sm:$0xff] %v4556_v10  ;;  %v1411_v31 = vmul.f32 %v1316_v22, %v4369_v18  ;;  %v1412_v5 = vmul.f32 %v1318_v60, %v4376_v14  ;;  %v1413_v10 = vmul.f32 %v1320_v52, %v4378_v17 }
 0x10b   : > { %5932 = vst [vmem:[#allocation70_spill] sm:$0xff] %v4559_v9  ;;  %5933 = vst [vmem:[#allocation12_spill] sm:$0xff] %v4562_v41  ;;  %v1414_v9 = vmul.f32 %v1322_v58, %v4380_v19  ;;  %v1415_v6 = vmul.f32 %v1324_v34, %v4382_v32  ;;  %v1416_v41 = vmul.f32 %v1326_v4, %v4386_v15 }
 0x10c   : > { %5934 = vst [vmem:[#allocation79_spill] sm:$0xff] %v4565_v57  ;;  %5935 = vst [vmem:[#allocation58_spill] sm:$0xff] %v4568_v35  ;;  %v1417_v57 = vmul.f32 %v1328_v27, %v4389_v7  ;;  %v1418_v46 = vmul.f32 %v1330_v62, %v4392_v12  ;;  %v4589_v22 = vsel %vm1300_vm1, %v1412_v5, %v4376_v14 }
 0x10d   : > { %5936 = vst [vmem:[#allocation14_spill] sm:$0xff] %v4571_v51  ;;  %v4584_v51 = vsel %vm1299_vm0, %v1411_v31, %v4369_v18  ;;  %5937 = vst [vmem:[#allocation13_spill] sm:$0xff] %v4589_v22  ;;  %v4594_v60 = vsel %vm1301_vm2, %v1413_v10, %v4378_v17  ;;  %v4599_v52 = vsel %vm1302_vm3, %v1414_v9, %v4380_v19 }
 0x10e   : > { %5938 = vst [vmem:[#allocation16_spill] sm:$0xff] %v4594_v60  ;;  %5939 = vst [vmem:[#allocation20_spill] sm:$0xff] %v4599_v52  ;;  %v4604_v31 = vsel %vm1303_vm4, %v1415_v6, %v4382_v32  ;;  %v4609_v5 = vsel %vm1304_vm5, %v1416_v41, %v4386_v15  ;;  %v4614_v10 = vsel %vm1305_vm6, %v1417_v57, %v4389_v7  ;;  %vm1459_vm8 = vcmp.eq.f32.partialorder %v4584_v51, 0.0 }
 0x10f   : > { %5940 = vst [vmem:[#allocation59_spill] sm:$0xff] %v4604_v31  ;;  %5941 = vst [vmem:[#allocation69_spill] sm:$0xff] %v4609_v5  ;;  %v4619_v9 = vsel %vm1306_vm7, %v1418_v46, %v4392_v12  ;;  %v1427_v58 = vmul.f32 %v4584_v51, %v4584_v51  ;;  %v1428_v6 = vmul.f32 %v4589_v22, %v4589_v22  ;;  %vm1465_vm14 = vcmp.eq.f32.partialorder %v4614_v10, 0.0 }
 0x110   : > { %5942 = vst [vmem:[#allocation61_spill] sm:$0xff] %v4619_v9  ;;  %v1429_v41 = vmul.f32 %v4594_v60, %v4594_v60  ;;  %v1430_v34 = vmul.f32 %v4599_v52, %v4599_v52  ;;  %v1431_v57 = vmul.f32 %v4604_v31, %v4604_v31  ;;  %v1432_v7 = vmul.f32 %v4609_v5, %v4609_v5 }
 0x111   : > { %v1433_v46 = vmul.f32 %v4614_v10, %v4614_v10  ;;  %v1434_v12 = vmul.f32 %v4619_v9, %v4619_v9  ;;  %v1435_v50 = vsub.f32 1.0, %v1427_v58  ;;  %v1436_v35 = vsub.f32 1.0, %v1428_v6 }
 0x112   : > { %v1437_v15 = vsub.f32 1.0, %v1429_v41  ;;  %v1438_v37 = vsub.f32 1.0, %v1430_v34  ;;  %v1439_v60 = vsub.f32 1.0, %v1431_v57  ;;  %v1440_v22 = vsub.f32 1.0, %v1432_v7  ;;  %v5957_v51 = vld [vmem:[#allocation12_spill] sm:$0xff] }
 0x113   : > { %v1354_v52 = vmul.f32 %v1326_v4, %v4472_v55  ;;  %v4641_v31 = vsel %vm1299_vm0, %v1331_v11, %v4401_v45  ;;  %v1443_v5 = vadd.f32 1e-15, %v1435_v50  ;;  %v1444_v26 = vadd.f32 1e-15, %v1436_v35 }
 0x114   : > { %v4647_v9 = vsel %vm1299_vm0, %v4508_v29, %v4405_v47  ;;  %v1441_v58 = vsub.f32 1.0, %v1433_v46  ;;  %v1445_v6 = vadd.f32 1e-15, %v1437_v15  ;;  %v1446_v41 = vadd.f32 1e-15, %v1438_v37  ;;  %v5955_v19 = vld [vmem:[#allocation13_spill] sm:$0xff] }
 0x115   : > { %v1355_v7 = vmul.f32 %v1328_v27, %v4475_v13  ;;  %v1442_v34 = vsub.f32 1.0, %v1434_v12  ;;  %v1447_v4 = vadd.f32 1e-15, %v1439_v60  ;;  %2850 = vrsqrt.f32 %v1443_v5  ;;  %v5953_v5 = vld [vmem:[#allocation66_spill] sm:$0xff] }
 0x116   : > { %v1356_v57 = vmul.f32 %v1328_v27, %v4478_v1  ;;  %v1357_v45 = vmul.f32 %v1328_v27, %v4481_v59  ;;  %v1448_v50 = vadd.f32 1e-15, %v1440_v22  ;;  %2852 = vrsqrt.f32 %v1444_v26 }
 0x117   : > { %v1358_v11 = vmul.f32 %v1328_v27, %v4484_v23  ;;  %v1359_v35 = vmul.f32 %v1330_v62, %v4487_v39  ;;  %v1360_v47 = vmul.f32 %v1330_v62, %v4490_v54  ;;  %2854 = vrsqrt.f32 %v1445_v6  ;;  %v5958_v6 = vld [vmem:[#allocation76_spill] sm:$0xff] }
 0x118   : > { %v1361_v15 = vmul.f32 %v1330_v62, %v4493_v24  ;;  %v1362_v37 = vmul.f32 %v1330_v62, %v4498_v63  ;;  %v1449_v12 = vadd.f32 1e-15, %v1441_v58  ;;  %2856 = vrsqrt.f32 %v1446_v41 }
 0x119   : > { %v1381_v29 = vsel %vm1299_vm0, %v4511_v30, %v4409_v36  ;;  %v1382_v27 = vsel %vm1299_vm0, %v4514_v8, %v4412_v20  ;;  %v1450_v26 = vadd.f32 1e-15, %v1442_v34  ;;  %2858 = vrsqrt.f32 %v1447_v4  ;;  %v5943_v20 = vld [vmem:[#allocation11_spill] sm:$0xff]  ;;  %v5944_v30 = vld [vmem:[#allocation45_spill] sm:$0xff]  ;;  %v5961_v4 = vld [vmem:[#allocation10_spill] sm:$0xff] }
 0x11a   : > { %v1383_v22 = vsel %vm1300_vm1, %v4517_v2, %v4415_v61  ;;  %v1384_v62 = vsel %vm1300_vm1, %v4520_v56, %v4418_v38  ;;  %v1385_v36 = vsel %vm1300_vm1, %v4523_v28, %v4421_v16  ;;  %2860 = vrsqrt.f32 %v1448_v50  ;;  %v5945_v8 = vld [vmem:[#allocation67_spill] sm:$0xff]  ;;  %v5946_v2 = vld [vmem:[#allocation52_spill] sm:$0xff]  ;;  %v5962_v50 = vld [vmem:[#allocation58_spill] sm:$0xff] }
 0x11b   : > { %v1386_v18 = vsel %vm1300_vm1, %v4526_v25, %v4424_v44  ;;  %v1387_v61 = vsel %vm1301_vm2, %v5943_v20, %v4427_v48  ;;  %v1388_v38 = vsel %vm1301_vm2, %v4532_v49, %v5944_v30  ;;  %v1389_v16 = vsel %vm1301_vm2, %v4535_v42, %v5945_v8  ;;  %v5947_v44 = vld [vmem:[#allocation68_spill] sm:$0xff]  ;;  %v5949_v28 = vld [vmem:[#allocation75_spill] sm:$0xff]  ;;  %v5964_v30 = vld [vmem:[#allocation77_spill] sm:$0xff] }
 0x11c   : > { %v1390_v14 = vsel %vm1301_vm2, %v4538_v53, %v5946_v2  ;;  %v1391_v48 = vsel %vm1302_vm3, %v4541_v40, %v5947_v44  ;;  %v5948_v56 = vld [vmem:[#allocation8_spill] sm:$0xff]  ;;  %2862 = vrsqrt.f32 %v1449_v12  ;;  %v1393_v42 = vsel %vm1302_vm3, %v4547_v3, %v5949_v28  ;;  %v5950_v40 = vld [vmem:[#allocation78_spill] sm:$0xff]  ;;  %v5952_v53 = vld [vmem:[#allocation53_spill] sm:$0xff] }
 0x11d   : > { %v1392_v49 = vsel %vm1302_vm3, %v4544_v0, %v5948_v56  ;;  %v1394_v17 = vsel %vm1302_vm3, %v4550_v33, %v4448_v43  ;;  %2864 = vrsqrt.f32 %v1450_v26  ;;  %v1395_v25 = vsel %vm1303_vm4, %v5950_v40, %v4451_v21  ;;  %v5951_v0 = vld [vmem:[#allocation57_spill] sm:$0xff]  ;;  %v5954_v3 = vld [vmem:[#allocation70_spill] sm:$0xff]  ;;  %v5959_v21 = vld [vmem:[#allocation79_spill] sm:$0xff] }
 0x11e   : > { %v1396_v60 = vsel %vm1303_vm4, %v5952_v53, %v5951_v0  ;;  %v1397_v46 = vsel %vm1303_vm4, %v5954_v3, %v5953_v5  ;;  %vm1460_vm9 = vcmp.eq.f32.partialorder %v5955_v19, 0.0  ;;  %v5956_v43 = vld [vmem:[#allocation9_spill] sm:$0xff]  ;;  %v1399_v34 = vsel %vm1304_vm5, %v5959_v21, %v5958_v6  ;;  %v5963_v26 = vld [vmem:[#allocation16_spill] sm:$0xff]  ;;  %v5965_v8 = vld [vmem:[#allocation14_spill] sm:$0xff] }
 0x11f   : > { %v2851_v33 = vpop.eup %2850  ;;  %v1398_v58 = vsel %vm1303_vm4, %v5957_v51, %v5956_v43  ;;  %v1400_v12 = vsel %vm1304_vm5, %v5962_v50, %v5961_v4  ;;  %vm1461_vm10 = vcmp.eq.f32.partialorder %v5963_v26, 0.0  ;;  %v1401_v2 = vsel %vm1304_vm5, %v5965_v8, %v5964_v30  ;;  %v5966_v44 = vld [vmem:[#allocation20_spill] sm:$0xff]  ;;  %v5968_v19 = vld [vmem:[#allocation59_spill] sm:$0xff] }
 0x120   : > { %v2853_v20 = vpop.eup %2852  ;;  %v4747_v32 = vsel %vm1304_vm5, %v1354_v52, %v4472_v55  ;;  %vm1462_vm11 = vcmp.eq.f32.partialorder %v5966_v44, 0.0  ;;  %v1467_v56 = vsel %vm1459_vm8, 0.0, %v2851_v33  ;;  %v1403_v0 = vsel %vm1305_vm6, %v1355_v7, %v4475_v13 }
 0x121   : > { %v2855_v28 = vpop.eup %2854  ;;  %v1404_v53 = vsel %vm1305_vm6, %v1356_v57, %v4478_v1  ;;  %v4759_v5 = vsel %vm1305_vm6, %v1357_v45, %v4481_v59  ;;  %v1468_v3 = vsel %vm1460_vm9, 0.0, %v2853_v20  ;;  %v4764_v52 = vsel %vm1305_vm6, %v1358_v11, %v4484_v23 }
 0x122   : > { %v2857_v55 = vpop.eup %2856  ;;  %vm1463_vm12 = vcmp.eq.f32.partialorder %v5968_v19, 0.0  ;;  %v1469_v33 = vsel %vm1461_vm10, 0.0, %v2855_v28  ;;  %v1475_v13 = vadd.f32 %v1468_v3, %v1467_v56  ;;  %v1407_v1 = vsel %vm1306_vm7, %v1359_v35, %v4487_v39  ;;  %v5970_v39 = vld [vmem:[#allocation69_spill] sm:$0xff] }
 0x123   : > { %v2859_v7 = vpop.eup %2858  ;;  %v4773_v59 = vsel %vm1306_vm7, %v1360_v47, %v4490_v54  ;;  %v4778_v57 = vsel %vm1306_vm7, %v1361_v15, %v4493_v24  ;;  %v1470_v23 = vsel %vm1462_vm11, 0.0, %v2857_v55  ;;  %v4785_v11 = vsel %vm1306_vm7, %v1362_v37, %v4498_v63  ;;  %v5971_v35 = vld [vmem:[#allocation61_spill] sm:$0xff] }
 0x124   : > { %v2861_v45 = vpop.eup %2860  ;;  %vm1464_vm13 = vcmp.eq.f32.partialorder %v5970_v39, 0.0  ;;  %v1476_v54 = vadd.f32 %v1475_v13, %v1469_v33  ;;  %vm1466_vm15 = vcmp.eq.f32.partialorder %v5971_v35, 0.0  ;;  %v1471_v47 = vsel %vm1463_vm12, 0.0, %v2859_v7 }
 0x125   : > { %v1482_v24 = vmul.f32 %v1467_v56, %v4641_v31  ;;  %v1483_v15 = vmul.f32 %v1467_v56, %v4647_v9  ;;  %v1484_v21 = vmul.f32 %v1467_v56, %v1381_v29  ;;  %v1485_v41 = vmul.f32 %v1467_v56, %v1382_v27 }
 0x126   : > { %v2863_v51 = vpop.eup %2862  ;;  %v1477_v6 = vadd.f32 %v1476_v54, %v1470_v23  ;;  %v1486_v4 = vmul.f32 %v1468_v3, %v1383_v22  ;;  %v1472_v63 = vsel %vm1464_vm13, 0.0, %v2861_v45  ;;  %v1487_v37 = vmul.f32 %v1468_v3, %v1384_v62 }
 0x127   : > { %v2865_v50 = vpop.eup %2864  ;;  %v1488_v26 = vmul.f32 %v1468_v3, %v1385_v36  ;;  %v1489_v20 = vmul.f32 %v1468_v3, %v1386_v18  ;;  %v1490_v8 = vmul.f32 %v1469_v33, %v1387_v61  ;;  %v1491_v44 = vmul.f32 %v1469_v33, %v1388_v38 }
 0x128   : > { %v1478_v30 = vadd.f32 %v1477_v6, %v1471_v47  ;;  %v1492_v28 = vmul.f32 %v1469_v33, %v1389_v16  ;;  %v1473_v40 = vsel %vm1465_vm14, 0.0, %v2863_v51  ;;  %v1493_v31 = vmul.f32 %v1469_v33, %v1390_v14 }
 0x129   : > { %v1494_v55 = vmul.f32 %v1470_v23, %v1391_v48  ;;  %v1495_v9 = vmul.f32 %v1470_v23, %v1392_v49  ;;  %v1474_v29 = vsel %vm1466_vm15, 0.0, %v2865_v50  ;;  %v1496_v22 = vmul.f32 %v1470_v23, %v1393_v42 }
 0x12a   : > { %v1479_v27 = vadd.f32 %v1478_v30, %v1472_v63  ;;  %v1497_v56 = vmul.f32 %v1470_v23, %v1394_v17  ;;  %v1498_v19 = vmul.f32 %v1471_v47, %v1395_v25  ;;  %v1499_v62 = vmul.f32 %v1471_v47, %v1396_v60  ;;  %v5972_v23 = vld [vmem:[#allocation65_spill] sm:$0xff] }
 0x12b   : > { %v1500_v36 = vmul.f32 %v1471_v47, %v1397_v46  ;;  %v1501_v18 = vmul.f32 %v1471_v47, %v1398_v58  ;;  %v1514_v61 = vadd.f32 %v1486_v4, %v1482_v24  ;;  %v1521_v38 = vadd.f32 %v1487_v37, %v1483_v15  ;;  %v5973_v30 = vld [vmem:[#allocation5_spill] sm:$0xff] }
 0x12c   : > { %v1480_v3 = vadd.f32 %v1479_v27, %v1473_v40  ;;  %v1528_v16 = vadd.f32 %v1488_v26, %v1484_v21  ;;  %v1502_v13 = vmul.f32 %v1472_v63, %v1399_v34  ;;  %v1503_v10 = vmul.f32 %v1472_v63, %v1400_v12 }
 0x12d   : > { %v1504_v7 = vmul.f32 %v1472_v63, %v1401_v2  ;;  %v1535_v14 = vadd.f32 %v1489_v20, %v1485_v41  ;;  %v1515_v49 = vadd.f32 %v1514_v61, %v1490_v8  ;;  %v1522_v33 = vadd.f32 %v1521_v38, %v1491_v44  ;;  %v5974_v44 = vld [vmem:[#allocation72_spill] sm:$0xff]  ;;  %v2047_v61 = vld [vmem:[%s5611_s3 + $0x8] sm:$0xff]  ;;  %v2048_v38 = vld [vmem:[%s5611_s3 + $0x10] sm:$0xff] }
 0x12e   : > { %v1481_v48 = vadd.f32 %v1480_v3, %v1474_v29  ;;  %v1529_v43 = vadd.f32 %v1528_v16, %v1492_v28  ;;  %v1505_v45 = vmul.f32 %v1472_v63, %v4747_v32  ;;  %v1506_v42 = vmul.f32 %v1473_v40, %v1403_v0  ;;  %v1620_v32 = vld [vmem:[%s5610_s2] sm:$0xff] }
 0x12f   : > { %v1507_v17 = vmul.f32 %v1473_v40, %v1404_v53  ;;  %v1536_v25 = vadd.f32 %v1535_v14, %v1493_v31  ;;  %v1516_v60 = vadd.f32 %v1515_v49, %v1494_v55  ;;  %v1523_v46 = vadd.f32 %v1522_v33, %v1495_v9  ;;  %v5976_v31 = vld [vmem:[#allocation73_spill] sm:$0xff] }
 0x130   : > { %v1530_v58 = vadd.f32 %v1529_v43, %v1496_v22  ;;  %v1542_v39 = vadd.f32 %v1481_v48, %v5972_v23  ;;  %v1508_v54 = vmul.f32 %v1473_v40, %v4759_v5  ;;  %v1509_v34 = vmul.f32 %v1473_v40, %v4764_v52  ;;  %v4838_v23 = vld [vmem:[%s5611_s3 + $0x20] sm:$0xff] }
 0x131   : > { %v1510_v12 = vmul.f32 %v1474_v29, %v1407_v1  ;;  %v1537_v2 = vadd.f32 %v1536_v25, %v1497_v56  ;;  %v1517_v35 = vadd.f32 %v1516_v60, %v1498_v19  ;;  %v1524_v47 = vadd.f32 %v1523_v46, %v1499_v62  ;;  %v2046_v19 = vld [vmem:[%s5611_s3] sm:$0xff] }
 0x132   : > { %v1531_v24 = vadd.f32 %v1530_v58, %v1500_v36  ;;  %v1543_v15 = vmax.f32 %v1542_v39, 1e-15  ;;  %v1511_v0 = vmul.f32 %v1474_v29, %v4773_v59  ;;  %v1512_v53 = vmul.f32 %v1474_v29, %v4778_v57  ;;  %v1628_v59 = vld [vmem:[%s5610_s2 + $0x40] sm:$0xff] }
 0x133   : > { %v1538_v51 = vadd.f32 %v1537_v2, %v1501_v18  ;;  %vm1636_vm0 = vcmask 261120   ;;  %v1518_v6 = vadd.f32 %v1517_v35, %v1502_v13  ;;  %v1525_v5 = vadd.f32 %v1524_v47, %v1503_v10 }
 0x134   : > { %v1532_v21 = vadd.f32 %v1531_v24, %v1504_v7  ;;  %2866 = vrcp.f32 %v1543_v15  ;;  %2675 = vmatprep.mubr.msk.f32.mxu0 %vm1636_vm0, %v1620_v32  ;;  %v1513_v52 = vmul.f32 %v1474_v29, %v4785_v11  ;;  %2687 = vmatprep.mubr.msk.f32.mxu1 %vm1636_vm0, %v1628_v59  ;;  %v5975_v11 = vld [vmem:[#allocation6_spill] sm:$0xff]  ;;  %v2939_v3 = vmov 0   ;;  %v2049_v7 = vld [vmem:[%s5611_s3 + $0x18] sm:$0xff] }
 0x135   : > { %v1539_v1 = vadd.f32 %v1538_v51, %v1505_v45  ;;  %v1519_v41 = vadd.f32 %v1518_v6, %v1506_v42  ;;  %v1526_v4 = vadd.f32 %v1525_v5, %v1507_v17  ;;  %2736 = vset.pattern.permute.xlu0 %v2939_v3  ;;  %vm2078_vm1 = vcmask 7168   ;;  %2737 = vset.pattern.permute.xlu1 %v2939_v3 }
 0x136   : > { %v1533_v50 = vadd.f32 %v1532_v21, %v1508_v54  ;;  %2119 = vperm.xlu0 %2736, %v2046_v19   ;;  %v2062_v16 = vmul.f32 %v2046_v19, %v2046_v19  ;;  %v2063_v13 = vmul.f32 %v2047_v61, %v2047_v61  ;;  %v2064_v10 = vmul.f32 %v2048_v38, %v2048_v38 }
 0x137   : > { %v1540_v63 = vadd.f32 %v1539_v1, %v1509_v34  ;;  %v1520_v57 = vadd.f32 %v1519_v41, %v1510_v12  ;;  %v1527_v37 = vadd.f32 %v1526_v4, %v1511_v0  ;;  %2129 = vperm.xlu1 %2737, %v2048_v38   ;;  %v2065_v49 = vmul.f32 %v2049_v7, %v2049_v7 }
 0x138   : > { %v1534_v26 = vadd.f32 %v1533_v50, %v1512_v53  ;;  %v2079_v33 = vsel %vm2078_vm1, %v2062_v16, 0.0  ;;  %v2080_v43 = vsel %vm2078_vm1, %v2063_v13, 0.0  ;;  %v2082_v45 = vsel %vm2078_vm1, %v2064_v10, 0.0 }
 0x139   : > { %v1541_v20 = vadd.f32 %v1540_v63, %v1513_v52  ;;  %v1544_v8 = vadd.f32 %v1520_v57, %v5973_v30  ;;  %v1545_v28 = vadd.f32 %v1527_v37, %v5974_v44  ;;  %v2081_v17 = vadd.f32 %v2080_v43, %v2079_v33  ;;  %v1629_v33 = vld [vmem:[%s5610_s2 + $0x48] sm:$0xff]  ;;  %v1622_v43 = vld [vmem:[%s5610_s2 + $0x10] sm:$0xff] }
 0x13a   : > { %v1546_v40 = vadd.f32 %v1534_v26, %v5975_v11  ;;  %2124 = vperm.xlu0 %2736, %v2047_v61   ;;  %v2084_v25 = vsel %vm2078_vm1, %v2065_v49, 0.0  ;;  %v1621_v49 = vld [vmem:[%s5610_s2 + $0x8] sm:$0xff] }
 0x13b   : > { %v1547_v55 = vadd.f32 %v1541_v20, %v5976_v31  ;;  %v2083_v46 = vadd.f32 %v2082_v45, %v2081_v17  ;;  %2134 = vperm.xlu1 %2737, %v2049_v7   ;;  %v1630_v45 = vld [vmem:[%s5610_s2 + $0x50] sm:$0xff]  ;;  %v1631_v17 = vld [vmem:[%s5610_s2 + $0x58] sm:$0xff] }
 0x13d   : > { %v4840_v39 = vadd.f32 %v2084_v25, %v2083_v46  ;;  %v1624_v25 = vld [vmem:[%s5610_s2 + $0x20] sm:$0xff]  ;;  %v1625_v46 = vld [vmem:[%s5610_s2 + $0x28] sm:$0xff] }
 0x13e   : > { %v2867_v9 = vpop.eup %2866  ;;  %2139 = vperm.xlu0 %2736, %v4838_v23  }
 0x13f   : > { %v1549_v29 = vmul.f32 %v2867_v9, %v1544_v8  ;;  %v1550_v27 = vmul.f32 %v2867_v9, %v1545_v28  ;;  %v1551_v22 = vmul.f32 %v2867_v9, %v1546_v40  ;;  %v4815_v56 = vmul.f32 %v2867_v9, %v1547_v55 }
 0x141   : > { %v1553_v62 = vmul.f32 %v1549_v29, %v1549_v29  ;;  %v1554_v36 = vmul.f32 %v1550_v27, %v1550_v27  ;;  %v1555_v18 = vmul.f32 %v1551_v22, %v1551_v22  ;;  %v1556_v14 = vmul.f32 %v4815_v56, %v4815_v56 }
 0x143   : > { %v1557_v48 = vadd.f32 %v1554_v36, %v1553_v62 }
 0x145   : > { %v1558_v42 = vadd.f32 %v1557_v48, %v1555_v18 }
 0x147   : > { %v1559_v60 = vadd.f32 %v1558_v42, %v1556_v14  ;;  %v1623_v42 = vld [vmem:[%s5610_s2 + $0x18] sm:$0xff] }
 0x149   : > { %v1560_v58 = vrot.slane %v1559_v60, 4 }
 0x14b   : > { %v1561_v54 = vadd.f32 %v1560_v58, %v1559_v60  ;;  %v1632_v60 = vld [vmem:[%s5610_s2 + $0x60] sm:$0xff]  ;;  %v1633_v58 = vld [vmem:[%s5610_s2 + $0x68] sm:$0xff] }
 0x14d   : > { %v1562_v34 = vrot.slane %v1561_v54, 2 }
 0x14f   : > { %v1563_v12 = vadd.f32 %v1562_v34, %v1561_v54  ;;  %v1626_v54 = vld [vmem:[%s5610_s2 + $0x30] sm:$0xff] }
 0x150   : > { %v1634_v34 = vld [vmem:[%s5610_s2 + $0x70] sm:$0xff] }
 0x151   : > { %v1564_v2 = vrot.slane %v1563_v12, 1 }
 0x153   : > { %v1565_v35 = vadd.f32 %v1564_v2, %v1563_v12  ;;  %v1627_v12 = vld [vmem:[%s5610_s2 + $0x38] sm:$0xff] }
 0x154   : > { %v1635_v2 = vld [vmem:[%s5610_s2 + $0x78] sm:$0xff] }
 0x155   : > { %2868 = vrsqrt.f32 %v1565_v35  ;;  %vm1568_vm2 = vcmp.eq.f32.partialorder %v1565_v35, inf  ;;  %v1571_v24 = vand.u32 2147483648, %v1565_v35  ;;  %vm1570_vm3 = vcmp.eq.f32.partialorder %v1565_v35, 0.0 }
 0x15f   : > { %v2869_v47 = vpop.eup %2868 }
 0x160   : > { %v1567_v15 = vmul.f32 %v2869_v47, %v1565_v35 }
 0x162   : > { %v1569_v32 = vsel %vm1568_vm2, %v1565_v35, %v1567_v15  ;;  %v2066_v35 = vmul.f32 %v4838_v23, %v4838_v23  ;;  %v2053_v23 = vld [vmem:[%s5611_s3 + $0x38] sm:$0xff] }
 0x163   : > { %v1572_v0 = vsel %vm1570_vm3, %v1571_v24, %v1569_v32  ;;  %v2051_v24 = vld [vmem:[%s5611_s3 + $0x28] sm:$0xff]  ;;  %v2052_v32 = vld [vmem:[%s5611_s3 + $0x30] sm:$0xff] }
 0x164   : > { %v1574_v53 = vadd.f32 1e-15, %v1572_v0  ;;  %vm1573_vm4 = vcmp.gt.f32.partialorder %v1572_v0, 0.996  ;;  %v2086_v47 = vsel %vm2078_vm1, %v2066_v35, 0.0  ;;  %v2067_v15 = vmul.f32 %v2051_v24, %v2051_v24  ;;  %2144 = vperm.xlu1 %2737, %v2051_v24   ;;  %2149 = vperm.xlu0 %2736, %v2052_v32  }
 0x166   : > { %2870 = vrcp.f32 %v1574_v53  ;;  %v2068_v53 = vmul.f32 %v2052_v32, %v2052_v32 }
 0x168   : > { %2154 = vperm.xlu1 %2737, %v2053_v23  }
 0x170   : > { %v2871_v51 = vpop.eup %2870 }
 0x171   : > { %v1576_v6 = vmul.f32 0.996, %v2871_v51  ;;  %v2088_v51 = vsel %vm2078_vm1, %v2067_v15, 0.0 }
 0x173   : > { %v1577_v5 = vmul.f32 %v1576_v6, %v1549_v29  ;;  %v1578_v21 = vmul.f32 %v1576_v6, %v1550_v27  ;;  %v1587_v52 = vmul.f32 %v1576_v6, %v1572_v0  ;;  %v1579_v1 = vmul.f32 %v1576_v6, %v1551_v22 }
 0x174   : > { %v1580_v41 = vmul.f32 %v1576_v6, %v4815_v56 }
 0x175   : > { %v1583_v4 = vsel %vm1573_vm4, %v1577_v5, %v1549_v29  ;;  %v1584_v50 = vsel %vm1573_vm4, %v1578_v21, %v1550_v27  ;;  %v1588_v59 = vsel %vm1573_vm4, %v1587_v52, %v1572_v0  ;;  %v1585_v63 = vsel %vm1573_vm4, %v1579_v1, %v1551_v22  ;;  %v2054_v52 = vld [vmem:[%s5611_s3 + $0x40] sm:$0xff] }
 0x176   : > { %v1589_v57 = vmul.f32 %v1588_v59, %v1588_v59  ;;  %v1586_v37 = vsel %vm1573_vm4, %v1580_v41, %v4815_v56  ;;  %v2087_v0 = vadd.f32 %v2086_v47, %v4840_v39  ;;  %v2090_v5 = vsel %vm2078_vm1, %v2068_v53, 0.0  ;;  %2159 = vperm.xlu0 %2736, %v2054_v52  }
 0x177   : > { %v2069_v21 = vmul.f32 %v2053_v23, %v2053_v23  ;;  %v2070_v41 = vmul.f32 %v2054_v52, %v2054_v52 }
 0x178   : > { %v1590_v26 = vsub.f32 1.0, %v1589_v57  ;;  %v2089_v6 = vadd.f32 %v2088_v51, %v2087_v0  ;;  %v2056_v57 = vld [vmem:[%s5611_s3 + $0x50] sm:$0xff] }
 0x179   : > { %v2092_v39 = vsel %vm2078_vm1, %v2069_v21, 0.0 }
 0x17a   : > { %2872 = vrsqrt.f32 %v1590_v26  ;;  %vm1593_vm5 = vcmp.eq.f32.partialorder %v1590_v26, inf  ;;  %v1596_v30 = vand.u32 2147483648, %v1590_v26  ;;  %vm1595_vm6 = vcmp.eq.f32.partialorder %v1590_v26, 0.0  ;;  %2169 = vperm.xlu0 %2736, %v2056_v57  }
 0x17b   : > { %v2091_v1 = vadd.f32 %v2090_v5, %v2089_v6 }
 0x184   : > { %v2873_v20 = vpop.eup %2872 }
 0x185   : > { %v1592_v8 = vmul.f32 %v2873_v20, %v1590_v26 }
 0x187   : > { %v1594_v44 = vsel %vm1593_vm5, %v1590_v26, %v1592_v8  ;;  %v2072_v26 = vmul.f32 %v2056_v57, %v2056_v57 }
 0x188   : > { %v1597_v28 = vsel %vm1595_vm6, %v1596_v30, %v1594_v44  ;;  %v2057_v30 = vld [vmem:[%s5611_s3 + $0x58] sm:$0xff]  ;;  %v2058_v44 = vld [vmem:[%s5611_s3 + $0x60] sm:$0xff] }
 0x189   : > { %v1598_v11 = vadd.f32 1.0, %v1597_v28  ;;  %v2098_v28 = vsel %vm2078_vm1, %v2072_v26, 0.0  ;;  %2179 = vperm.xlu0 %2736, %v2058_v44  }
 0x18b   : > { %2874 = vrcp.f32 %v1598_v11  ;;  %v2073_v11 = vmul.f32 %v2057_v30, %v2057_v30 }
 0x195   : > { %v2875_v40 = vpop.eup %2874 }
 0x196   : > { %v1600_v31 = vmul.f32 %v2875_v40, %v1583_v4  ;;  %v1601_v55 = vmul.f32 %v2875_v40, %v1584_v50  ;;  %v4845_v9 = vmul.f32 %v2875_v40, %v1588_v59  ;;  %v1602_v29 = vmul.f32 %v2875_v40, %v1585_v63  ;;  %v2055_v50 = vld [vmem:[%s5611_s3 + $0x48] sm:$0xff] }
 0x197   : > { %v1603_v27 = vmul.f32 %v2875_v40, %v1586_v37  ;;  %v2093_v4 = vadd.f32 %v2092_v39, %v2091_v1  ;;  %v2094_v59 = vsel %vm2078_vm1, %v2070_v41, 0.0  ;;  %v2071_v63 = vmul.f32 %v2055_v50, %v2055_v50  ;;  %2164 = vperm.xlu1 %2737, %v2055_v50  }
 0x198   : > { %v1605_v22 = vmax.f32 %v4845_v9, 1e-15 }
 0x199   : > { %v2095_v37 = vadd.f32 %v2094_v59, %v2093_v4  ;;  %v2096_v20 = vsel %vm2078_vm1, %v2071_v63, 0.0 }
 0x19a   : > { %vm4848_vm7 = vcmp.gt.f32.partialorder %v1605_v22, 0.996  ;;  %2876 = vrcp.f32 %v1605_v22  ;;  %v2059_v22 = vld [vmem:[%s5611_s3 + $0x68] sm:$0xff] }
 0x19b   : > { %v1619_v19 = vsel %vm4848_vm7, 0.996, %v4845_v9  ;;  %2174 = vperm.xlu1 %2737, %v2057_v30   ;;  %v2097_v8 = vadd.f32 %v2096_v20, %v2095_v37 }
 0x19c   : > { %v1875_v20 = vmax.f32 %v1619_v19, 1e-15 }
 0x19d   : > { %v2099_v40 = vadd.f32 %v2098_v28, %v2097_v8 }
 0x19f   : > { %2184 = vperm.xlu1 %2737, %v2059_v22  }
 0x1a4   : > { %v2877_v62 = vpop.eup %2876 }
 0x1a5   : > { %v1608_v36 = vmul.f32 0.996, %v2877_v62  ;;  %v2075_v62 = vmul.f32 %v2059_v22, %v2059_v22 }
 0x1a7   : > { %v1609_v18 = vmul.f32 %v1608_v36, %v1600_v31  ;;  %v1610_v3 = vmul.f32 %v1608_v36, %v1601_v55  ;;  %v1611_v61 = vmul.f32 %v1608_v36, %v1602_v29  ;;  %v1612_v38 = vmul.f32 %v1608_v36, %v1603_v27  ;;  %v2060_v36 = vld [vmem:[%s5611_s3 + $0x70] sm:$0xff] }
 0x1a8   : > { %2189 = vperm.xlu0 %2736, %v2060_v36  }
 0x1a9   : > { %v1615_v16 = vsel %vm4848_vm7, %v1609_v18, %v1600_v31  ;;  %v1616_v13 = vsel %vm4848_vm7, %v1610_v3, %v1601_v55  ;;  %v1617_v10 = vsel %vm4848_vm7, %v1611_v61, %v1602_v29  ;;  %v1618_v7 = vsel %vm4848_vm7, %v1612_v38, %v1603_v27  ;;  %v2061_v38 = vld [vmem:[%s5611_s3 + $0x78] sm:$0xff] }
 0x1aa   : > { %v2699_v14 = vpack.c.bf16 %v1616_v13, %v1615_v16  ;;  %v2703_v48 = vpack.c.bf16 %v1618_v7, %v1617_v10  ;;  %v2074_v31 = vmul.f32 %v2058_v44, %v2058_v44  ;;  %v2100_v55 = vsel %vm2078_vm1, %v2073_v11, 0.0  ;;  %2194 = vperm.xlu1 %2737, %v2061_v38  }
 0x1ab   : > { %v2101_v29 = vadd.f32 %v2100_v55, %v2099_v40  ;;  %v2076_v3 = vmul.f32 %v2060_v36, %v2060_v36  ;;  %v2104_v61 = vsel %vm2078_vm1, %v2075_v62, 0.0  ;;  %v2077_v10 = vmul.f32 %v2061_v38, %v2061_v38 }
 0x1ac   : > { %2700 = vmatprep.subr.bf16.mxu0 %v2699_v14  ;;  %2707 = vmatprep.subr.bf16.mxu1 %v2699_v14  ;;  %v2102_v27 = vsel %vm2078_vm1, %v2074_v31, 0.0  ;;  %v2641_v11 = vclamps-f32 %v1875_v20, 0.9999999 }
 0x1ad   : > { %2702 = vmatpush3.bf16.msra.mxu0 %v2699_v14  ;;  %2709 = vmatpush3.bf16.msra.mxu1 %v2699_v14  ;;  %v2103_v18 = vadd.f32 %v2102_v27, %v2101_v29  ;;  %v2106_v13 = vsel %vm2078_vm1, %v2076_v3, 0.0  ;;  %v2108_v14 = vsel %vm2078_vm1, %v2077_v10, 0.0 }
 0x1ae   : > { %2704 = vmatprep.subr.bf16.mxu0 %v2703_v48  ;;  %2708 = vmatprep.subr.bf16.mxu1 %v2703_v48  ;;  %v1881_v55 = vsub.f32 1.0, %v2641_v11 }
 0x1af   : > { %v2105_v16 = vadd.f32 %v2104_v61, %v2103_v18 }
 0x1b0   : > { %2878 = vrcp.f32 %v1881_v55 }
 0x1b1   : > { %2706 = vmatpush3.bf16.msra.mxu0 %v2703_v48  ;;  %2710 = vmatpush3.bf16.msra.mxu1 %v2703_v48  ;;  %v2107_v7 = vadd.f32 %v2106_v13, %v2105_v16  ;;  %v1880_v16 = vadd.f32 1.0, %v2641_v11 }
 0x1b3   : > { %v2109_v48 = vadd.f32 %v2108_v14, %v2107_v7 }
 0x1b4   : > { %2676 = vmatmul.mubr.msk.f32.vlgmr.msra.gmra.mrb[0].mxu0 %vm1636_vm0, %v1621_v49  ;;  %2688 = vmatmul.mubr.msk.f32.vlgmr.msra.gmra.mrb[0].mxu1 %vm1636_vm0, %v1629_v33 }
 0x1b5   : > { %2678 = vmatprep.mubr.msk.f32.mxu0 %vm1636_vm0, %v1622_v43  ;;  %2690 = vmatprep.mubr.msk.f32.mxu1 %vm1636_vm0, %v1630_v45  ;;  %v2110_v49 = vrot.slane %v2109_v48, 4 }
 0x1b7   : > { %v2111_v33 = vadd.f32 %v2110_v49, %v2109_v48 }
 0x1b8   : > { %2679 = vmatmul.mubr.msk.f32.gmra.mrb[2].mxu0 %vm1636_vm0, %v1623_v42  ;;  %2691 = vmatmul.mubr.msk.f32.gmra.mrb[2].mxu1 %vm1636_vm0, %v1631_v17 }
 0x1b9   : > { %2681 = vmatprep.mubr.msk.f32.mxu0 %vm1636_vm0, %v1624_v25  ;;  %2693 = vmatprep.mubr.msk.f32.mxu1 %vm1636_vm0, %v1632_v60  ;;  %v2112_v43 = vrot.slane %v2111_v33, 2 }
 0x1ba   : > { %v2879_v10 = vpop.eup %2878 }
 0x1bb   : > { %v2113_v45 = vadd.f32 %v2112_v43, %v2111_v33  ;;  %v1883_v14 = vmul.f32 %v2879_v10, %v1880_v16 }
 0x1bc   : > { %2682 = vmatmul.mubr.msk.f32.gmra.mrb[4].mxu0 %vm1636_vm0, %v1625_v46  ;;  %2694 = vmatmul.mubr.msk.f32.gmra.mrb[4].mxu1 %vm1636_vm0, %v1633_v58 }
 0x1bd   : > { %2684 = vmatprep.mubr.msk.f32.mxu0 %vm1636_vm0, %v1626_v54  ;;  %2696 = vmatprep.mubr.msk.f32.mxu1 %vm1636_vm0, %v1634_v34  ;;  %v2114_v42 = vrot.slane %v2113_v45, 1  ;;  %2880 = vlog2.f32 %v1883_v14 }
 0x1bf   : > { %v2115_v17 = vadd.f32 %v2114_v42, %v2113_v45 }
 0x1c0   : > { %2685 = vmatmul.mubr.msk.f32.gmra.mrb[6].mxu0 %vm1636_vm0, %v1627_v12  ;;  %2697 = vmatmul.mubr.msk.f32.gmra.mrb[6].mxu1 %vm1636_vm0, %v1635_v2 }
 0x1c1   : > { %2238 = vperm.xlu0 %2736, %v2115_v17  }
 0x1c7   : > { %v2881_v43 = vpop.eup %2880 }
 0x1c8   : > { %v1885_v17 = vmul.f32 0.6931472, %v2881_v43 }
 0x287   : > { %v4967_v25 = vpop.f32.mrb[0].mxu0  ;;  %v4969_v60 = vpop.f32.mrb[0].mxu1 }
 0x288   : > { %v1831_v46 = vmul.f32 %v4967_v25, %v4967_v25  ;;  %v4973_v58 = vpop.f32.mrb[1].mxu0  ;;  %v4975_v54 = vpop.f32.mrb[1].mxu1  ;;  %v1839_v8 = vmul.f32 %v4969_v60, %v4969_v60 }
 0x289   : > { %v1830_v34 = vmul.f32 %v4973_v58, %v4973_v58  ;;  %v1838_v4 = vmul.f32 %v4975_v54, %v4975_v54 }
 0x28b   : > { %v1846_v12 = vadd.f32 %v1831_v46, %v1830_v34  ;;  %v4979_v2 = vpop.f32.mrb[2].mxu0  ;;  %v4981_v35 = vpop.f32.mrb[2].mxu1 }
 0x28c   : > { %v4983_v47 = vpop.f32.mrb[3].mxu0  ;;  %v4985_v24 = vpop.f32.mrb[3].mxu1  ;;  %v1833_v32 = vmul.f32 %v4979_v2, %v4979_v2  ;;  %v1841_v9 = vmul.f32 %v4981_v35, %v4981_v35 }
 0x28d   : > { %v1832_v15 = vmul.f32 %v4983_v47, %v4983_v47  ;;  %v1840_v44 = vmul.f32 %v4985_v24, %v4985_v24 }
 0x28f   : > { %v1847_v0 = vadd.f32 %v1846_v12, %v1832_v15  ;;  %v4991_v53 = vpop.f32.mrb[4].mxu0  ;;  %v4993_v51 = vpop.f32.mrb[4].mxu1 }
 0x290   : > { %v4995_v6 = vpop.f32.mrb[5].mxu0  ;;  %v4997_v23 = vpop.f32.mrb[5].mxu1  ;;  %2918 = vmaxabs.init.f32.vacc3 %v4967_v25, %v4991_v53  ;;  %v1835_v52 = vmul.f32 %v4991_v53, %v4991_v53  ;;  %v1843_v27 = vmul.f32 %v4993_v51, %v4993_v51 }
 0x291   : > { %v1834_v5 = vmul.f32 %v4995_v6, %v4995_v6  ;;  %v1848_v21 = vadd.f32 %v1847_v0, %v1833_v32  ;;  %v1842_v56 = vmul.f32 %v4997_v23, %v4997_v23 }
 0x292   : > { %2919 = vmaxabs.f32.vacc3 %v4973_v58, %v4995_v6 }
 0x293   : > { %v1849_v1 = vadd.f32 %v1848_v21, %v1834_v5  ;;  %v5007_v41 = vpop.f32.mrb[6].mxu0  ;;  %v5009_v39 = vpop.f32.mrb[6].mxu1  ;;  %v1886_v5 = vmul.f32 0.5, %v1885_v17 }
 0x294   : > { %v5013_v50 = vpop.f32.mrb[7].mxu0  ;;  %v5015_v59 = vpop.f32.mrb[7].mxu1  ;;  %2920 = vmaxabs.f32.vacc3 %v4969_v60, %v4975_v54  ;;  %v1837_v37 = vmul.f32 %v5007_v41, %v5007_v41  ;;  %v1845_v18 = vmul.f32 %v5009_v39, %v5009_v39 }
 0x295   : > { %v1836_v63 = vmul.f32 %v5013_v50, %v5013_v50  ;;  %v1850_v57 = vadd.f32 %v1849_v1, %v1835_v52  ;;  %v1844_v62 = vmul.f32 %v5015_v59, %v5015_v59 }
 0x296   : > { %2921 = vmaxabs.f32.vacc3 %v4979_v2, %v5007_v41 }
 0x297   : > { %v1851_v26 = vadd.f32 %v1850_v57, %v1836_v63 }
 0x298   : > { %2922 = vmaxabs.f32.vacc3 %v4993_v51, %v4983_v47 }
 0x299   : > { %v1852_v30 = vadd.f32 %v1851_v26, %v1837_v37 }
 0x29a   : > { %2923 = vmaxabs.f32.vacc3 %v5013_v50, %v4997_v23 }
 0x29b   : > { %v1853_v28 = vadd.f32 %v1852_v30, %v1838_v4 }
 0x29c   : > { %2924 = vmaxabs.f32.vacc3 %v4981_v35, %v4985_v24 }
 0x29d   : > { %v1854_v40 = vadd.f32 %v1853_v28, %v1839_v8 }
 0x29e   : > { %2925 = vmaxabs.f32.vacc3 %v5009_v39, %v5015_v59 }
 0x29f   : > { %v1855_v19 = vadd.f32 %v1854_v40, %v1840_v44 }
 0x2a0   : > { %v2926_v31 = vmovacc.low.even.vacc3 }
 0x2a1   : > { %v1856_v29 = vadd.f32 %v1855_v19, %v1841_v9 }
 0x2a2   : > { %v1938_v45 = vrot.slane %v2926_v31, 4 }
 0x2a3   : > { %v1857_v22 = vadd.f32 %v1856_v29, %v1842_v56 }
 0x2a4   : > { %v1939_v15 = vmax.f32 %v2926_v31, %v1938_v45 }
 0x2a5   : > { %v1858_v36 = vadd.f32 %v1857_v22, %v1843_v27 }
 0x2a6   : > { %v1940_v1 = vrot.slane %v1939_v15, 2 }
 0x2a7   : > { %v1859_v3 = vadd.f32 %v1858_v36, %v1844_v62 }
 0x2a8   : > { %v1941_v63 = vmax.f32 %v1939_v15, %v1940_v1 }
 0x2a9   : > { %v1860_v61 = vadd.f32 %v1859_v3, %v1845_v18 }
 0x2aa   : > { %v1942_v57 = vrot.slane %v1941_v63, 1 }
 0x2ab   : > { %v1861_v38 = vrot.slane %v1860_v61, 4 }
 0x2ac   : > { %v1943_v37 = vmax.f32 %v1941_v63, %v1942_v57 }
 0x2ad   : > { %v1862_v13 = vadd.f32 %v1861_v38, %v1860_v61 }
 0x2ae   : > { %vm1944_vm10 = vcmp.eq.f32.partialorder %v1943_v37, 0.0 }
 0x2af   : > { %v1863_v7 = vrot.slane %v1862_v13, 2 }
 0x2b1   : > { %v1864_v48 = vadd.f32 %v1863_v7, %v1862_v13 }
 0x2b3   : > { %v1865_v49 = vrot.slane %v1864_v48, 1 }
 0x2b5   : > { %v1866_v33 = vadd.f32 %v1865_v49, %v1864_v48 }
 0x2b7   : > { %2882 = vrsqrt.f32 %v1866_v33  ;;  %vm1869_vm8 = vcmp.eq.f32.partialorder %v1866_v33, inf  ;;  %v1872_v34 = vand.u32 2147483648, %v1866_v33  ;;  %vm1871_vm9 = vcmp.eq.f32.partialorder %v1866_v33, 0.0 }
 0x2b8   : > { %2884 = vrcp.f32 %v1875_v20 }
 0x2c1   : > { %v2883_v42 = vpop.eup %2882 }
 0x2c2   : > { %v1868_v46 = vmul.f32 %v2883_v42, %v1866_v33  ;;  %v2885_v32 = vpop.eup %2884 }
 0x2c4   : > { %v1870_v12 = vsel %vm1869_vm8, %v1866_v33, %v1868_v46 }
 0x2c5   : > { %v1873_v0 = vsel %vm1871_vm9, %v1872_v34, %v1870_v12 }
 0x2c6   : > { %v1874_v21 = vmax.f32 %v1873_v0, 1e-15 }
 0x2c8   : > { %v1877_v52 = vmul.f32 %v2885_v32, %v1874_v21  ;;  %2886 = vrcp.f32 %v1874_v21 }
 0x2ca   : > { %v1887_v4 = vmul.f32 %v1886_v5, %v1877_v52 }
 0x2cc   : > { %2888 = vtanh.f32 %v1887_v4 }
 0x2d2   : > { %v2887_v26 = vpop.eup %2886 }
 0x2d6   : > { %v2889_v20 = vpop.eup %2888 }
 0x2d7   : > { %v1890_v30 = vmul.f32 %v2889_v20, %v2887_v26 }
 0x2d9   : > { %v1891_v8 = vmul.f32 %v1890_v30, %v4973_v58  ;;  %v1892_v44 = vmul.f32 %v4967_v25, %v1890_v30  ;;  %v1893_v28 = vmul.f32 %v1890_v30, %v4983_v47  ;;  %v1894_v11 = vmul.f32 %v4979_v2, %v1890_v30 }
 0x2da   : > { %v1895_v40 = vmul.f32 %v1890_v30, %v4995_v6  ;;  %v1896_v9 = vmul.f32 %v4991_v53, %v1890_v30  ;;  %v1897_v56 = vmul.f32 %v1890_v30, %v5013_v50  ;;  %v1898_v19 = vmul.f32 %v5007_v41, %v1890_v30 }
 0x2db   : > { %v1899_v31 = vmul.f32 %v1890_v30, %v4975_v54  ;;  %v1900_v55 = vmul.f32 %v4969_v60, %v1890_v30  ;;  %v1901_v58 = vmul.f32 %v1890_v30, %v4985_v24  ;;  %v1902_v25 = vmul.f32 %v4981_v35, %v1890_v30 }
 0x2dc   : > { %v1903_v47 = vmul.f32 %v1890_v30, %v4997_v23  ;;  %v1904_v2 = vmul.f32 %v4993_v51, %v1890_v30  ;;  %v1905_v6 = vmul.f32 %v1890_v30, %v5015_v59  ;;  %v1906_v53 = vmul.f32 %v5009_v39, %v1890_v30 }
 0x2dd   : > { %v5068_v50 = vsel %vm1944_vm10, 0.0, %v1891_v8  ;;  %v5071_v41 = vsel %vm1944_vm10, 0.0, %v1892_v44  ;;  %v5074_v60 = vsel %vm1944_vm10, 0.0, %v1893_v28  ;;  %v5077_v54 = vsel %vm1944_vm10, 0.0, %v1894_v11 }
 0x2de   : > { %v5080_v35 = vsel %vm1944_vm10, 0.0, %v1895_v40  ;;  %v5083_v24 = vsel %vm1944_vm10, 0.0, %v1896_v9  ;;  %v5086_v51 = vsel %vm1944_vm10, 0.0, %v1897_v56  ;;  %v5089_v23 = vsel %vm1944_vm10, 0.0, %v1898_v19 }
 0x2df   : > { %v5092_v39 = vsel %vm1944_vm10, 0.0, %v1899_v31  ;;  %v5095_v59 = vsel %vm1944_vm10, 0.0, %v1900_v55  ;;  %v5098_v29 = vsel %vm1944_vm10, 0.0, %v1901_v58  ;;  %v5101_v27 = vsel %vm1944_vm10, 0.0, %v1902_v25  ;;  %v5150_v25 = vpop.permute.xlu0 %2119 }
 0x2e0   : > { %v5104_v22 = vsel %vm1944_vm10, 0.0, %v1903_v47  ;;  %v5107_v62 = vsel %vm1944_vm10, 0.0, %v1904_v2  ;;  %v5110_v36 = vsel %vm1944_vm10, 0.0, %v1905_v6  ;;  %v5113_v18 = vsel %vm1944_vm10, 0.0, %v1906_v53  ;;  %v5152_v47 = vpop.permute.xlu1 %2129 }
 0x2e1   : > { %v1963_v3 = vmul.f32 %v5068_v50, %v5068_v50  ;;  %v1964_v61 = vmul.f32 %v5071_v41, %v5071_v41  ;;  %v1965_v38 = vmul.f32 %v5074_v60, %v5074_v60  ;;  %v1966_v13 = vmul.f32 %v5077_v54, %v5077_v54 }
 0x2e2   : > { %v1967_v7 = vmul.f32 %v5080_v35, %v5080_v35  ;;  %v1968_v48 = vmul.f32 %v5083_v24, %v5083_v24  ;;  %v1969_v33 = vmul.f32 %v5086_v51, %v5086_v51  ;;  %v1970_v45 = vmul.f32 %v5089_v23, %v5089_v23 }
 0x2e3   : > { %v1979_v16 = vadd.f32 %v1964_v61, %v1963_v3  ;;  %v1971_v17 = vmul.f32 %v5092_v39, %v5092_v39  ;;  %v1972_v34 = vmul.f32 %v5095_v59, %v5095_v59  ;;  %v1973_v15 = vmul.f32 %v5098_v29, %v5098_v29  ;;  %v5154_v2 = vpop.permute.xlu0 %2124 }
 0x2e4   : > { %v1974_v0 = vmul.f32 %v5101_v27, %v5101_v27  ;;  %v1975_v21 = vmul.f32 %v5104_v22, %v5104_v22  ;;  %v1976_v1 = vmul.f32 %v5107_v62, %v5107_v62  ;;  %v1977_v63 = vmul.f32 %v5110_v36, %v5110_v36  ;;  %v5156_v6 = vpop.permute.xlu1 %2134 }
 0x2e5   : > { %v1980_v10 = vadd.f32 %v1979_v16, %v1965_v38  ;;  %v1978_v37 = vmul.f32 %v5113_v18, %v5113_v18 }
 0x2e7   : > { %v1981_v14 = vadd.f32 %v1980_v10, %v1966_v13  ;;  %v5160_v61 = vpop.permute.xlu0 %2139 }
 0x2e8   : > { %v5168_v10 = vpop.permute.xlu1 %2144 }
 0x2e9   : > { %v1982_v49 = vadd.f32 %v1981_v14, %v1967_v7 }
 0x2eb   : > { %v1983_v43 = vadd.f32 %v1982_v49, %v1968_v48 }
 0x2ed   : > { %v1984_v42 = vadd.f32 %v1983_v43, %v1969_v33 }
 0x2ef   : > { %v1985_v46 = vadd.f32 %v1984_v42, %v1970_v45 }
 0x2f1   : > { %v1986_v12 = vadd.f32 %v1985_v46, %v1971_v17 }
 0x2f3   : > { %v1987_v32 = vadd.f32 %v1986_v12, %v1972_v34 }
 0x2f5   : > { %v1988_v5 = vadd.f32 %v1987_v32, %v1973_v15  ;;  %v5215_v15 = vpop.permute.xlu1 %2154 }
 0x2f7   : > { %v1989_v52 = vadd.f32 %v1988_v5, %v1974_v0 }
 0x2f9   : > { %v1990_v4 = vadd.f32 %v1989_v52, %v1975_v21 }
 0x2fb   : > { %v1991_v57 = vadd.f32 %v1990_v4, %v1976_v1 }
 0x2fd   : > { %v1992_v26 = vadd.f32 %v1991_v57, %v1977_v63 }
 0x2ff   : > { %v1993_v20 = vadd.f32 %v1992_v26, %v1978_v37  ;;  %v5244_v37 = vpop.permute.xlu1 %2164 }
 0x301   : > { %v1994_v30 = vrot.slane %v1993_v20, 4 }
 0x303   : > { %v1995_v8 = vadd.f32 %v1994_v30, %v1993_v20 }
 0x305   : > { %v1996_v44 = vrot.slane %v1995_v8, 2 }
 0x307   : > { %v1997_v28 = vadd.f32 %v1996_v44, %v1995_v8 }
 0x309   : > { %v1998_v11 = vrot.slane %v1997_v28, 1 }
 0x30b   : > { %v1999_v40 = vadd.f32 %v1998_v11, %v1997_v28 }
 0x30d   : > { %2890 = vrsqrt.f32 %v1999_v40  ;;  %vm2002_vm11 = vcmp.eq.f32.partialorder %v1999_v40, inf  ;;  %v2005_v19 = vand.u32 2147483648, %v1999_v40  ;;  %vm2004_vm12 = vcmp.eq.f32.partialorder %v1999_v40, 0.0 }
 0x317   : > { %v2891_v9 = vpop.eup %2890 }
 0x318   : > { %v2001_v56 = vmul.f32 %v2891_v9, %v1999_v40 }
 0x31a   : > { %v2003_v31 = vsel %vm2002_vm11, %v1999_v40, %v2001_v56 }
 0x31b   : > { %v5147_v55 = vsel %vm2004_vm12, %v2005_v19, %v2003_v31  ;;  %v5277_v31 = vpop.permute.xlu1 %2174 }
 0x31c   : > { %v2007_v58 = vmax.f32 %v5147_v55, 1e-15 }
 0x31e   : > { %2892 = vrcp.f32 %v2007_v58  ;;  %vm5170_vm13 = vcmp.gt.f32.partialorder %v2007_v58, 0.996 }
 0x328   : > { %v2893_v53 = vpop.eup %2892 }
 0x329   : > { %v5158_v3 = vmul.f32 0.996, %v2893_v53 }
 0x32b   : > { %v2011_v38 = vmul.f32 %v5158_v3, %v5068_v50  ;;  %v2012_v16 = vmul.f32 %v5158_v3, %v5071_v41  ;;  %v2013_v13 = vmul.f32 %v5158_v3, %v5074_v60  ;;  %v2014_v14 = vmul.f32 %v5158_v3, %v5077_v54 }
 0x32c   : > { %v2015_v43 = vmul.f32 %v5158_v3, %v5080_v35  ;;  %v2017_v12 = vmul.f32 %v5158_v3, %v5086_v51  ;;  %v2018_v5 = vmul.f32 %v5158_v3, %v5089_v23  ;;  %v2019_v4 = vmul.f32 %v5158_v3, %v5092_v39 }
 0x32d   : > { %v5179_v48 = vsel %vm5170_vm13, %v2011_v38, %v5068_v50  ;;  %v5184_v49 = vsel %vm5170_vm13, %v2012_v16, %v5071_v41  ;;  %v5189_v33 = vsel %vm5170_vm13, %v2013_v13, %v5074_v60  ;;  %v5200_v42 = vsel %vm5170_vm13, %v2014_v14, %v5077_v54  ;;  %v5202_v41 = vpop.permute.xlu0 %2149 }
 0x32e   : > { %v2197_v45 = vmul.f32 %v5150_v25, %v5179_v48  ;;  %v2198_v50 = vmul.f32 %v5154_v2, %v5184_v49  ;;  %v2016_v60 = vmul.f32 %v5158_v3, %v5083_v24  ;;  %v2199_v46 = vmul.f32 %v5152_v47, %v5189_v33 }
 0x32f   : > { %v5211_v34 = vsel %vm5170_vm13, %v2015_v43, %v5080_v35  ;;  %v2200_v32 = vmul.f32 %v5156_v6, %v5200_v42  ;;  %v5231_v52 = vsel %vm5170_vm13, %v2017_v12, %v5086_v51  ;;  %v5242_v57 = vsel %vm5170_vm13, %v2018_v5, %v5089_v23 }
 0x330   : > { %v2213_v17 = vadd.f32 %v2198_v50, %v2197_v45  ;;  %v5222_v0 = vsel %vm5170_vm13, %v2016_v60, %v5083_v24  ;;  %v2201_v35 = vmul.f32 %v5160_v61, %v5211_v34  ;;  %v2020_v51 = vmul.f32 %v5158_v3, %v5095_v59  ;;  %v5301_v50 = vpop.permute.xlu1 %2184 }
 0x331   : > { %v5233_v1 = vpop.permute.xlu0 %2159  ;;  %v2202_v24 = vmul.f32 %v5168_v10, %v5222_v0  ;;  %v2203_v26 = vmul.f32 %v5202_v41, %v5231_v52  ;;  %v5253_v30 = vsel %vm5170_vm13, %v2019_v4, %v5092_v39  ;;  %v2021_v8 = vmul.f32 %v5158_v3, %v5098_v29 }
 0x332   : > { %v2214_v54 = vadd.f32 %v2213_v17, %v2199_v46  ;;  %v2204_v23 = vmul.f32 %v5215_v15, %v5242_v57  ;;  %v5264_v11 = vsel %vm5170_vm13, %v2020_v51, %v5095_v59  ;;  %v2022_v40 = vmul.f32 %v5158_v3, %v5101_v27 }
 0x333   : > { %v2205_v39 = vmul.f32 %v5233_v1, %v5253_v30  ;;  %v5273_v56 = vsel %vm5170_vm13, %v2021_v8, %v5098_v29  ;;  %v2023_v19 = vmul.f32 %v5158_v3, %v5104_v22  ;;  %v2206_v59 = vmul.f32 %v5244_v37, %v5264_v11 }
 0x334   : > { %v2215_v21 = vadd.f32 %v2214_v54, %v2200_v32  ;;  %v5284_v53 = vsel %vm5170_vm13, %v2022_v40, %v5101_v27  ;;  %v2024_v38 = vmul.f32 %v5158_v3, %v5107_v62  ;;  %v2025_v13 = vmul.f32 %v5158_v3, %v5110_v36 }
 0x335   : > { %v5259_v28 = vpop.permute.xlu0 %2169  ;;  %v5297_v43 = vsel %vm5170_vm13, %v2023_v19, %v5104_v22  ;;  %v2208_v27 = vmul.f32 %v5277_v31, %v5284_v53  ;;  %v2026_v17 = vmul.f32 %v5158_v3, %v5113_v18 }
 0x336   : > { %v2216_v63 = vadd.f32 %v2215_v21, %v2201_v35  ;;  %v2207_v29 = vmul.f32 %v5259_v28, %v5273_v56  ;;  %v5306_v60 = vsel %vm5170_vm13, %v2024_v38, %v5107_v62  ;;  %v5315_v22 = vsel %vm5170_vm13, %v2025_v13, %v5110_v36  ;;  %v5328_v21 = vpop.permute.xlu1 %2194 }
 0x337   : > { %v2210_v54 = vmul.f32 %v5301_v50, %v5306_v60  ;;  %v5324_v62 = vsel %vm5170_vm13, %v2026_v17, %v5113_v18  ;;  %v2045_v18 = vsel %vm5170_vm13, 0.996, %v5147_v55 }
 0x338   : > { %v2217_v20 = vadd.f32 %v2216_v63, %v2202_v24  ;;  %v2212_v36 = vmul.f32 %v5328_v21, %v5324_v62  ;;  %v2116_v40 = vmul.f32 %v2045_v18, %v2045_v18 }
 0x339   : > { %v5292_v14 = vpop.permute.xlu0 %2179 }
 0x33a   : > { %v2218_v44 = vadd.f32 %v2217_v20, %v2203_v26  ;;  %v2209_v46 = vmul.f32 %v5292_v14, %v5297_v43 }
 0x33c   : > { %v2219_v9 = vadd.f32 %v2218_v44, %v2204_v23 }
 0x33d   : > { %v5319_v5 = vpop.permute.xlu0 %2189 }
 0x33e   : > { %v2220_v58 = vadd.f32 %v2219_v9, %v2205_v39  ;;  %v2211_v3 = vmul.f32 %v5319_v5, %v5315_v22 }
 0x340   : > { %v2221_v16 = vadd.f32 %v2220_v58, %v2206_v59 }
 0x341   : > { %v2239_v39 = vpop.permute.xlu0 %2238 }
 0x342   : > { %v2222_v45 = vadd.f32 %v2221_v16, %v2207_v29  ;;  %v2291_v19 = vmul.f32 %v2239_v39, %v2116_v40  ;;  %v5337_v29 = vsub.f32 1.0, %v2116_v40 }
 0x344   : > { %v2223_v12 = vadd.f32 %v2222_v45, %v2208_v27  ;;  %v2259_v55 = vmul.f32 %v5337_v29, %v5150_v25  ;;  %v2260_v7 = vmul.f32 %v5337_v29, %v5154_v2  ;;  %v2262_v2 = vmul.f32 %v5337_v29, %v5156_v6 }
 0x345   : > { %v2267_v18 = vmul.f32 %v5337_v29, %v5233_v1 }
 0x346   : > { %v2224_v32 = vadd.f32 %v2223_v12, %v2209_v46  ;;  %v2261_v12 = vmul.f32 %v5337_v29, %v5152_v47 }
 0x348   : > { %v2225_v35 = vadd.f32 %v2224_v32, %v2210_v54  ;;  %v2263_v32 = vmul.f32 %v5337_v29, %v5160_v61 }
 0x34a   : > { %v2226_v4 = vadd.f32 %v2225_v35, %v2211_v3 }
 0x34c   : > { %v2227_v24 = vadd.f32 %v2226_v4, %v2212_v36 }
 0x34e   : > { %v2228_v63 = vrot.slane %v2227_v24, 4 }
 0x350   : > { %v2229_v51 = vadd.f32 %v2228_v63, %v2227_v24 }
 0x352   : > { %v2230_v26 = vrot.slane %v2229_v51, 2 }
 0x354   : > { %v2231_v20 = vadd.f32 %v2230_v26, %v2229_v51 }
 0x356   : > { %v2232_v8 = vrot.slane %v2231_v20, 1 }
 0x358   : > { %v2233_v23 = vadd.f32 %v2232_v8, %v2231_v20 }
 0x35a   : > { %v2234_v44 = vmul.f32 2.0, %v2233_v23 }
 0x35c   : > { %v2235_v9 = vadd.f32 1.0, %v2234_v44 }
 0x35e   : > { %v2292_v59 = vadd.f32 %v2291_v19, %v2235_v9  ;;  %v5335_v38 = vadd.f32 %v2239_v39, %v2235_v9  ;;  %v2268_v9 = vmul.f32 %v5337_v29, %v5244_v37 }
 0x360   : > { %v2293_v58 = vmax.f32 %v2292_v59, 1e-15  ;;  %v2242_v16 = vmul.f32 %v5335_v38, %v5179_v48  ;;  %v2243_v13 = vmul.f32 %v5335_v38, %v5184_v49  ;;  %v2244_v27 = vmul.f32 %v5335_v38, %v5189_v33 }
 0x361   : > { %v2245_v48 = vmul.f32 %v5335_v38, %v5200_v42  ;;  %v2246_v33 = vmul.f32 %v5335_v38, %v5211_v34  ;;  %v2247_v47 = vmul.f32 %v5335_v38, %v5222_v0  ;;  %v2264_v34 = vmul.f32 %v5337_v29, %v5168_v10 }
 0x362   : > { %2894 = vrcp.f32 %v2293_v58  ;;  %v2275_v45 = vadd.f32 %v2259_v55, %v2242_v16  ;;  %v2276_v17 = vadd.f32 %v2260_v7, %v2243_v13  ;;  %v2277_v54 = vadd.f32 %v2261_v12, %v2244_v27 }
 0x363   : > { %v2278_v42 = vadd.f32 %v2262_v2, %v2245_v48  ;;  %v2248_v36 = vmul.f32 %v5335_v38, %v5231_v52  ;;  %v2279_v61 = vadd.f32 %v2263_v32, %v2246_v33  ;;  %v2265_v0 = vmul.f32 %v5337_v29, %v5202_v41 }
 0x364   : > { %v2249_v24 = vmul.f32 %v5335_v38, %v5242_v57  ;;  %v2280_v63 = vadd.f32 %v2264_v34, %v2247_v47  ;;  %v2266_v52 = vmul.f32 %v5337_v29, %v5215_v15  ;;  %v2250_v20 = vmul.f32 %v5335_v38, %v5253_v30 }
 0x365   : > { %v2281_v8 = vadd.f32 %v2265_v0, %v2248_v36  ;;  %v2251_v44 = vmul.f32 %v5335_v38, %v5264_v11  ;;  %v2252_v19 = vmul.f32 %v5335_v38, %v5273_v56  ;;  %v2269_v16 = vmul.f32 %v5337_v29, %v5259_v28 }
 0x366   : > { %v2282_v40 = vadd.f32 %v2266_v52, %v2249_v24  ;;  %v2283_v59 = vadd.f32 %v2267_v18, %v2250_v20  ;;  %v2253_v13 = vmul.f32 %v5335_v38, %v5284_v53  ;;  %v2270_v27 = vmul.f32 %v5337_v29, %v5277_v31 }
 0x367   : > { %v2284_v55 = vadd.f32 %v2268_v9, %v2251_v44  ;;  %v2271_v48 = vmul.f32 %v5337_v29, %v5292_v14  ;;  %v2255_v2 = vmul.f32 %v5335_v38, %v5306_v60  ;;  %v2272_v32 = vmul.f32 %v5337_v29, %v5301_v50 }
 0x368   : > { %v2286_v33 = vadd.f32 %v2270_v27, %v2253_v13  ;;  %v2256_v47 = vmul.f32 %v5335_v38, %v5315_v22  ;;  %v2257_v34 = vmul.f32 %v5335_v38, %v5324_v62  ;;  %v2274_v0 = vmul.f32 %v5337_v29, %v5328_v21 }
 0x369   : > { %v2288_v36 = vadd.f32 %v2272_v32, %v2255_v2 }
 0x36a   : > { %v2290_v62 = vadd.f32 %v2274_v0, %v2257_v34 }
 0x36c   : > { %v5349_v46 = vpop.eup %2894 }
 0x36d   : > { %v5356_v49 = vmul.f32 %v5349_v46, %v2275_v45  ;;  %v5359_v25 = vmul.f32 %v5349_v46, %v2276_v17  ;;  %v5370_v3 = vmul.f32 %v5349_v46, %v2277_v54  ;;  %v5381_v4 = vmul.f32 %v5349_v46, %v2278_v42 }
 0x36e   : > { %v5388_v51 = vmul.f32 %v5349_v46, %v2279_v61  ;;  %v5397_v41 = vmul.f32 %v5349_v46, %v2280_v63  ;;  %v5406_v15 = vmul.f32 %v5349_v46, %v2281_v8  ;;  %v5415_v1 = vmul.f32 %v5349_v46, %v2282_v40 }
 0x36f   : > { %v2311_v35 = vmul.f32 %v5356_v49, %v5356_v49  ;;  %v2312_v6 = vmul.f32 %v5359_v25, %v5359_v25  ;;  %v2313_v10 = vmul.f32 %v5370_v3, %v5370_v3  ;;  %v2314_v57 = vmul.f32 %v5381_v4, %v5381_v4 }
 0x370   : > { %v2315_v30 = vmul.f32 %v5388_v51, %v5388_v51  ;;  %v2316_v11 = vmul.f32 %v5397_v41, %v5397_v41  ;;  %v5424_v37 = vmul.f32 %v5349_v46, %v2283_v59  ;;  %v2317_v56 = vmul.f32 %v5406_v15, %v5406_v15 }
 0x371   : > { %v2327_v26 = vadd.f32 %v2312_v6, %v2311_v35  ;;  %v2254_v45 = vmul.f32 %v5335_v38, %v5297_v43  ;;  %v2285_v17 = vadd.f32 %v2269_v16, %v2252_v19  ;;  %v5433_v28 = vmul.f32 %v5349_v46, %v2284_v55 }
 0x372   : > { %v2318_v53 = vmul.f32 %v5415_v1, %v5415_v1  ;;  %v2319_v43 = vmul.f32 %v5424_v37, %v5424_v37  ;;  %v5451_v14 = vmul.f32 %v5349_v46, %v2286_v33  ;;  %v2273_v6 = vmul.f32 %v5337_v29, %v5319_v5 }
 0x373   : > { %v2328_v23 = vadd.f32 %v2327_v26, %v2313_v10  ;;  %v5442_v31 = vmul.f32 %v5349_v46, %v2285_v17  ;;  %v2287_v42 = vadd.f32 %v2271_v48, %v2254_v45  ;;  %v2320_v60 = vmul.f32 %v5433_v28, %v5433_v28 }
 0x374   : > { %v2289_v24 = vadd.f32 %v2273_v6, %v2256_v47  ;;  %v5467_v63 = vmul.f32 %v5349_v46, %v2288_v36  ;;  %v2322_v5 = vmul.f32 %v5451_v14, %v5451_v14  ;;  %v5477_v20 = vmul.f32 %v5349_v46, %v2290_v62 }
 0x375   : > { %v2329_v39 = vadd.f32 %v2328_v23, %v2314_v57  ;;  %v5460_v50 = vmul.f32 %v5349_v46, %v2287_v42  ;;  %v2321_v22 = vmul.f32 %v5442_v31, %v5442_v31 }
 0x376   : > { %v5472_v38 = vmul.f32 %v5349_v46, %v2289_v24  ;;  %v2324_v21 = vmul.f32 %v5467_v63, %v5467_v63  ;;  %v2326_v23 = vmul.f32 %v5477_v20, %v5477_v20 }
 0x377   : > { %v2330_v58 = vadd.f32 %v2329_v39, %v2315_v30  ;;  %v2323_v26 = vmul.f32 %v5460_v50, %v5460_v50 }
 0x378   : > { %v2325_v8 = vmul.f32 %v5472_v38, %v5472_v38 }
 0x379   : > { %v2331_v7 = vadd.f32 %v2330_v58, %v2316_v11 }
 0x37b   : > { %v2332_v12 = vadd.f32 %v2331_v7, %v2317_v56 }
 0x37d   : > { %v2333_v54 = vadd.f32 %v2332_v12, %v2318_v53 }
 0x37f   : > { %v2334_v35 = vadd.f32 %v2333_v54, %v2319_v43 }
 0x381   : > { %v2335_v61 = vadd.f32 %v2334_v35, %v2320_v60 }
 0x383   : > { %v2336_v10 = vadd.f32 %v2335_v61, %v2321_v22 }
 0x385   : > { %v2337_v52 = vadd.f32 %v2336_v10, %v2322_v5 }
 0x387   : > { %v2338_v29 = vadd.f32 %v2337_v52, %v2323_v26 }
 0x389   : > { %v2339_v57 = vadd.f32 %v2338_v29, %v2324_v21 }
 0x38b   : > { %v2340_v18 = vadd.f32 %v2339_v57, %v2325_v8 }
 0x38d   : > { %v2341_v44 = vadd.f32 %v2340_v18, %v2326_v23 }
 0x38f   : > { %v2342_v40 = vrot.slane %v2341_v44, 4 }
 0x391   : > { %v2343_v30 = vadd.f32 %v2342_v40, %v2341_v44 }
 0x393   : > { %v2344_v39 = vrot.slane %v2343_v30, 2 }
 0x395   : > { %v2345_v9 = vadd.f32 %v2344_v39, %v2343_v30 }
 0x397   : > { %v2346_v19 = vrot.slane %v2345_v9, 1 }
 0x399   : > { %v2347_v46 = vadd.f32 %v2346_v19, %v2345_v9 }
 0x39b   : > { %2896 = vrsqrt.f32 %v2347_v46  ;;  %vm2350_vm14 = vcmp.eq.f32.partialorder %v2347_v46, inf  ;;  %v2353_v58 = vand.u32 2147483648, %v2347_v46  ;;  %vm2352_vm15 = vcmp.eq.f32.partialorder %v2347_v46, 0.0 }
 0x3a5   : > { %v2897_v59 = vpop.eup %2896 }
 0x3a6   : > { %v2349_v11 = vmul.f32 %v2897_v59, %v2347_v46 }
 0x3a8   : > { %v2351_v16 = vsel %vm2350_vm14, %v2347_v46, %v2349_v11 }
 0x3a9   : > { %v2354_v13 = vsel %vm2352_vm15, %v2353_v58, %v2351_v16 }
 0x3aa   : > { %v2355_v55 = vmax.f32 %v2354_v13, 1e-15 }
 0x3ac   : > { %vm5485_vm0 = vcmp.gt.f32.partialorder %v2355_v55, 0.996 }
 0x3ad   : > { %v2393_v7 = vsel %vm5485_vm0, 0.996, %v2354_v13 }
 0x3ae   : > { %v2394_v27 = vmax.f32 %v2393_v7, 1e-15 }
 0x3b0   : > { %v2642_v45 = vclamps-f32 %v2394_v27, 0.9999999 }
 0x3b2   : > { %v2398_v17 = vsub.f32 1.0, %v2642_v45  ;;  %v2397_v12 = vadd.f32 1.0, %v2642_v45 }
 0x3b4   : > { %2898 = vrcp.f32 %v2398_v17 }
 0x3b5   : > { %2900 = vrcp.f32 %v2355_v55 }
 0x3be   : > { %v2899_v53 = vpop.eup %2898 }
 0x3bf   : > { %v2400_v48 = vmul.f32 %v2899_v53, %v2397_v12  ;;  %v2901_v2 = vpop.eup %2900 }
 0x3c0   : > { %v2358_v33 = vmul.f32 0.996, %v2901_v2 }
 0x3c1   : > { %2902 = vlog2.f32 %v2400_v48 }
 0x3c2   : > { %2904 = vrcp.f32 %v2394_v27  ;;  %v2359_v43 = vmul.f32 %v2358_v33, %v5356_v49  ;;  %v2360_v54 = vmul.f32 %v2358_v33, %v5359_v25  ;;  %v2361_v32 = vmul.f32 %v2358_v33, %v5370_v3 }
 0x3c3   : > { %v2362_v47 = vmul.f32 %v2358_v33, %v5381_v4  ;;  %v2363_v42 = vmul.f32 %v2358_v33, %v5388_v51  ;;  %v2364_v60 = vmul.f32 %v2358_v33, %v5397_v41  ;;  %v2365_v35 = vmul.f32 %v2358_v33, %v5406_v15 }
 0x3c4   : > { %v2366_v34 = vmul.f32 %v2358_v33, %v5415_v1  ;;  %v2367_v36 = vmul.f32 %v2358_v33, %v5424_v37  ;;  %v2368_v22 = vmul.f32 %v2358_v33, %v5433_v28  ;;  %v2369_v61 = vmul.f32 %v2358_v33, %v5442_v31 }
 0x3c5   : > { %v2370_v0 = vmul.f32 %v2358_v33, %v5451_v14  ;;  %v2371_v24 = vmul.f32 %v2358_v33, %v5460_v50  ;;  %v2372_v5 = vmul.f32 %v2358_v33, %v5467_v63  ;;  %v2373_v62 = vmul.f32 %v2358_v33, %v5472_v38 }
 0x3c6   : > { %v2374_v26 = vmul.f32 %v2358_v33, %v5477_v20  ;;  %v2377_v52 = vsel %vm5485_vm0, %v2359_v43, %v5356_v49  ;;  %v2378_v21 = vsel %vm5485_vm0, %v2360_v54, %v5359_v25  ;;  %v2379_v29 = vsel %vm5485_vm0, %v2361_v32, %v5370_v3 }
 0x3c7   : > { %v2380_v8 = vsel %vm5485_vm0, %v2362_v47, %v5381_v4  ;;  %v2381_v57 = vsel %vm5485_vm0, %v2363_v42, %v5388_v51  ;;  %v2382_v25 = vsel %vm5485_vm0, %v2364_v60, %v5397_v41  ;;  %v2383_v18 = vsel %vm5485_vm0, %v2365_v35, %v5406_v15 }
 0x3c8   : > { %v2384_v3 = vsel %vm5485_vm0, %v2366_v34, %v5415_v1  ;;  %v2385_v4 = vsel %vm5485_vm0, %v2367_v36, %v5424_v37  ;;  %v2386_v51 = vsel %vm5485_vm0, %v2368_v22, %v5433_v28  ;;  %v2387_v41 = vsel %vm5485_vm0, %v2369_v61, %v5442_v31 }
 0x3c9   : > { %v2388_v15 = vsel %vm5485_vm0, %v2370_v0, %v5451_v14  ;;  %v2389_v1 = vsel %vm5485_vm0, %v2371_v24, %v5460_v50  ;;  %v2390_v37 = vsel %vm5485_vm0, %v2372_v5, %v5467_v63  ;;  %v2391_v28 = vsel %vm5485_vm0, %v2373_v62, %v5472_v38 }
 0x3ca   : > { %v2392_v31 = vsel %vm5485_vm0, %v2374_v26, %v5477_v20 }
 0x3cb   : > { %v2903_v6 = vpop.eup %2902 }
 0x3cc   : > { %v2402_v10 = vmul.f32 0.6931472, %v2903_v6  ;;  %v2905_v49 = vpop.eup %2904 }
 0x3ce   : > { %v2403_v23 = vmul.f32 0.5, %v2402_v10 }
 0x3d0   : > { %v2405_v44 = vmul.f32 %v2905_v49, %v2403_v23 }
 0x3d2   : > { %v2406_v40 = vmul.f32 %v2405_v44, %v2377_v52  ;;  %v2407_v30 = vmul.f32 %v2405_v44, %v2378_v21  ;;  %v2408_v14 = vmul.f32 %v2405_v44, %v2379_v29  ;;  %v2409_v39 = vmul.f32 %v2405_v44, %v2380_v8 }
 0x3d3   : > { %v2410_v9 = vmul.f32 %v2405_v44, %v2381_v57  ;;  %v2411_v19 = vmul.f32 %v2405_v44, %v2382_v25  ;;  %v2412_v46 = vmul.f32 %v2405_v44, %v2383_v18  ;;  %v2413_v50 = vmul.f32 %v2405_v44, %v2384_v3 }
 0x3d4   : > { %v2414_v59 = vmul.f32 %v2405_v44, %v2385_v4  ;;  %v2415_v11 = vmul.f32 %v2405_v44, %v2386_v51  ;;  %v2416_v58 = vmul.f32 %v2405_v44, %v2387_v41  ;;  %v2417_v63 = vmul.f32 %v2405_v44, %v2388_v15  ;;  %2422 = vst [vmem:[%s5557_s15] sm:$0xff] %v2406_v40 }
 0x3d5   : > { %2423 = vst [vmem:[%s5557_s15 + $0x8] sm:$0xff] %v2407_v30  ;;  %2424 = vst [vmem:[%s5557_s15 + $0x10] sm:$0xff] %v2408_v14  ;;  %v2418_v38 = vmul.f32 %v2405_v44, %v2389_v1  ;;  %v2419_v20 = vmul.f32 %v2405_v44, %v2390_v37  ;;  %v2420_v16 = vmul.f32 %v2405_v44, %v2391_v28 }
 0x3d6   : > { %2425 = vst [vmem:[%s5557_s15 + $0x18] sm:$0xff] %v2409_v39  ;;  %v2421_v13 = vmul.f32 %v2405_v44, %v2392_v31  ;;  %2426 = vst [vmem:[%s5557_s15 + $0x20] sm:$0xff] %v2410_v9  ;;  %2444 = sbr.rel (!%p2999_p5) target bundleno = 997 (0x3e5), region = 116 }
 0x3d7   : > { %2427 = vst [vmem:[%s5557_s15 + $0x28] sm:$0xff] %v2411_v19  ;;  %2428 = vst [vmem:[%s5557_s15 + $0x30] sm:$0xff] %v2412_v46 }
 0x3d8   : > { %2429 = vst [vmem:[%s5557_s15 + $0x38] sm:$0xff] %v2413_v50  ;;  %2430 = vst [vmem:[%s5557_s15 + $0x40] sm:$0xff] %v2414_v59 }
 0x3d9   : > { %2431 = vst [vmem:[%s5557_s15 + $0x48] sm:$0xff] %v2415_v11  ;;  %2432 = vst [vmem:[%s5557_s15 + $0x50] sm:$0xff] %v2416_v58 }
 0x3da   : > { %2433 = vst [vmem:[%s5557_s15 + $0x58] sm:$0xff] %v2417_v63  ;;  %2434 = vst [vmem:[%s5557_s15 + $0x60] sm:$0xff] %v2418_v38 }
 0x3db   : > { %2435 = vst [vmem:[%s5557_s15 + $0x68] sm:$0xff] %v2419_v20  ;;  %2436 = vst [vmem:[%s5557_s15 + $0x70] sm:$0xff] %v2420_v16  ;;  %v2504_v55 = vld [vmem:[%s5557_s15] sm:$0xff] (%p2999_p5) }
 0x3dc   : > { %2437 = vst [vmem:[%s5557_s15 + $0x78] sm:$0xff] %v2421_v13  ;;  %v2506_v56 = vld [vmem:[%s5557_s15 + $0x8] sm:$0xff] (%p2999_p5)  ;;  %v2508_v7 = vld [vmem:[%s5557_s15 + $0x10] sm:$0xff] (%p2999_p5)  ;;  %2505 = vst [vmem:[%s2446_s24] sm:$0xff] (%p2999_p5), %v2504_v55 }
 0x3dd   : > { %v2510_v27 = vld [vmem:[%s5557_s15 + $0x18] sm:$0xff]  ;;  %v2512_v45 = vld [vmem:[%s5557_s15 + $0x20] sm:$0xff]  ;;  %2507 = vst [vmem:[%s2446_s24 + $0x10] sm:$0xff] %v2506_v56  ;;  %2509 = vst [vmem:[%s2446_s24 + $0x20] sm:$0xff] %v2508_v7 }
 0x3de   : > { %v2514_v17 = vld [vmem:[%s5557_s15 + $0x28] sm:$0xff]  ;;  %2511 = vst [vmem:[%s2446_s24 + $0x30] sm:$0xff] %v2510_v27  ;;  %2513 = vst [vmem:[%s2446_s24 + $0x40] sm:$0xff] %v2512_v45  ;;  %v2516_v53 = vld [vmem:[%s5557_s15 + $0x30] sm:$0xff] }
 0x3df   : > { %2515 = vst [vmem:[%s2446_s24 + $0x50] sm:$0xff] %v2514_v17  ;;  %v2518_v12 = vld [vmem:[%s5557_s15 + $0x38] sm:$0xff]  ;;  %v2520_v48 = vld [vmem:[%s5557_s15 + $0x40] sm:$0xff]  ;;  %2517 = vst [vmem:[%s2446_s24 + $0x60] sm:$0xff] %v2516_v53 }
 0x3e0   : > { %2519 = vst [vmem:[%s2446_s24 + $0x70] sm:$0xff] %v2518_v12  ;;  %2521 = vst [vmem:[%s2446_s24 + $0x80] sm:$0xff] %v2520_v48  ;;  %v2522_v2 = vld [vmem:[%s5557_s15 + $0x48] sm:$0xff]  ;;  %v2524_v33 = vld [vmem:[%s5557_s15 + $0x50] sm:$0xff] }
 0x3e1   : > { %v2526_v43 = vld [vmem:[%s5557_s15 + $0x58] sm:$0xff]  ;;  %2523 = vst [vmem:[%s2446_s24 + $0x90] sm:$0xff] %v2522_v2  ;;  %2525 = vst [vmem:[%s2446_s24 + $0xa0] sm:$0xff] %v2524_v33  ;;  %v2528_v54 = vld [vmem:[%s5557_s15 + $0x60] sm:$0xff] }
 0x3e2   : > { %2527 = vst [vmem:[%s2446_s24 + $0xb0] sm:$0xff] %v2526_v43  ;;  %v2530_v32 = vld [vmem:[%s5557_s15 + $0x68] sm:$0xff]  ;;  %v2532_v47 = vld [vmem:[%s5557_s15 + $0x70] sm:$0xff]  ;;  %2529 = vst [vmem:[%s2446_s24 + $0xc0] sm:$0xff] %v2528_v54 }
 0x3e3   : > { %2531 = vst [vmem:[%s2446_s24 + $0xd0] sm:$0xff] %v2530_v32  ;;  %2533 = vst [vmem:[%s2446_s24 + $0xe0] sm:$0xff] %v2532_v47  ;;  %v2534_v42 = vld [vmem:[%s5557_s15 + $0x78] sm:$0xff] }
 0x3e4   : > { %2535 = vst [vmem:[%s2446_s24 + $0xf0] sm:$0xff] %v2534_v42 }
 0x3e5 PF: > { %p11_p10 = scmp.ge.s32.totalorder %s2982_s19, 4   ;;  %s5983_s15 = smov %s2933_s16 }
 0x3e6   : > { %s5984_s16 = smov %s2993_s22  ;;  %s5985_s17 = smov %s2982_s19 }
 0x3e7   :  { %13 = sbr.rel (!%p11_p10) target bundleno = 2 (0x2), region = 193 }

</bundles_post_ra>
